<compile_context>
chip_gen: v7x
topology: tpu7x:2x2x1
jax: 0.10.0
libtpu: 0.0.40
codegen_flags: <defaults>
</compile_context>

<pallas_src>
import jax
import jax.numpy as jnp
from jax import lax
from jax.experimental import pallas as pl
from jax.experimental.pallas import tpu as pltpu


def lstm_kernel(x_ref, wih_ref, whh_hi_ref, whh_lo_ref, b_ref,
                wlin_ref, blin_ref, out_ref):
    S = x_ref.shape[0]
    H = whh_hi_ref.shape[0]

    # --- Hoisted input projection: one batched MXU matmul over all timesteps.
    #     Kept as SSA values (4 vregs at S=8, 4H=512) -- no VMEM round trip.
    xw = (jnp.dot(x_ref[...], wih_ref[...],
                  preferred_element_type=jnp.float32)
          + b_ref[...])                                        # (S, 4H) f32

    h = jnp.zeros((1, H), jnp.float32)
    c = jnp.zeros((1, H), jnp.float32)

    # --- Fully unrolled recurrence (S is a compile-time constant).
    for t in range(S):
        # Compensated bf16 split of h (VPU, one vreg): h = h_hi + h_lo (+eps).
        h_hi = h.astype(jnp.bfloat16)
        h_lo = (h - h_hi.astype(jnp.float32)).astype(jnp.bfloat16)

        # Recurrent matmul as three single-pass bf16 MXU ops, f32 accumulate.
        # Weight refs are read at the call sites (not hoisted) to avoid
        # pinning 256 KiB of weights in the register file across the unroll.
        rec = (jnp.dot(h_hi, whh_hi_ref[...], preferred_element_type=jnp.float32)
               + jnp.dot(h_hi, whh_lo_ref[...], preferred_element_type=jnp.float32)
               + jnp.dot(h_lo, whh_hi_ref[...], preferred_element_type=jnp.float32))

        gates = xw[t:t + 1, :] + rec                           # (1, 4H)

        # Gate layout (pre-permuted in the wrapper): [i | f | o | g].
        # sigmoid(x) == 0.5 * tanh(0.5 * x) + 0.5  -> one EUP slab trip.
        sg = 0.5 * jnp.tanh(0.5 * gates[:, 0:3 * H]) + 0.5
        i_g = sg[:, 0 * H:1 * H]
        f_g = sg[:, 1 * H:2 * H]
        o_g = sg[:, 2 * H:3 * H]
        g_g = jnp.tanh(gates[:, 3 * H:4 * H])

        c = f_g * c + i_g * g_g
        h = o_g * jnp.tanh(c)

    # Final Linear on the last hidden state == predictions[-1].
    out_ref[...] = (jnp.dot(h, wlin_ref[...],
                            preferred_element_type=jnp.float32)
                    + blin_ref[...])


def prepare_lstm_params(w_ih, w_hh, b_ih, b_hh, w_lin, b_lin):
    """One-time host-side weight preparation (permute, transpose, fold, split).

    PyTorch gate row order (i, f, g, o) is permuted to (i, f, o, g) so the
    kernel's sigmoid slab is one contiguous (1, 3H) slice.
    """
    H = w_hh.shape[1]
    O = w_lin.shape[0]
    perm = jnp.concatenate([
        jnp.arange(0 * H, 1 * H),   # i
        jnp.arange(1 * H, 2 * H),   # f
        jnp.arange(3 * H, 4 * H),   # o
        jnp.arange(2 * H, 3 * H),   # g
    ])

    wih_t = jnp.asarray(w_ih, jnp.float32)[perm].T             # (D, 4H) f32
    whh_t = jnp.asarray(w_hh, jnp.float32)[perm].T             # (H, 4H) f32
    whh_hi = whh_t.astype(jnp.bfloat16)                        # (H, 4H) bf16
    whh_lo = (whh_t - whh_hi.astype(jnp.float32)).astype(jnp.bfloat16)
    b = (jnp.asarray(b_ih, jnp.float32)
         + jnp.asarray(b_hh, jnp.float32))[perm].reshape(1, 4 * H)
    wlin_t = jnp.asarray(w_lin, jnp.float32).T                 # (H, O) f32
    blin = jnp.asarray(b_lin, jnp.float32).reshape(1, O)

    return dict(wih=wih_t, whh_hi=whh_hi, whh_lo=whh_lo, b=b,
                wlin=wlin_t, blin=blin)


@jax.jit
def lstm_forward(x, params):
    """x: (S, D) f32.  Returns (O,) == predictions[-1] of the PyTorch module."""
    x = jnp.asarray(x, jnp.float32)
    O = params["wlin"].shape[1]

    vmem_spec = pl.BlockSpec(memory_space=pltpu.MemorySpace.VMEM)

    out = pl.pallas_call(
        lstm_kernel,
        out_shape=jax.ShapeDtypeStruct((1, O), jnp.float32),
        in_specs=[vmem_spec] * 7,
        out_specs=vmem_spec,
    )(x, params["wih"], params["whh_hi"], params["whh_lo"],
      params["b"], params["wlin"], params["blin"])
    return out[0]


def lstm_reference(x, w_ih, w_hh, b_ih, b_hh, w_lin, b_lin):
    """Pure-JAX reference matching torch.nn.LSTM + nn.Linear f32 semantics.

    Matmul precision is pinned to HIGHEST so the reference is a stable f32
    baseline regardless of the platform's default matmul precision.
    """
    H = w_hh.shape[1]
    hp = lax.Precision.HIGHEST

    def step(carry, x_t):
        h, c = carry
        gates = (jnp.dot(x_t, w_ih.T, precision=hp)
                 + jnp.dot(h, w_hh.T, precision=hp) + b_ih + b_hh)
        i = jax.nn.sigmoid(gates[0 * H:1 * H])
        f = jax.nn.sigmoid(gates[1 * H:2 * H])
        g = jnp.tanh(gates[2 * H:3 * H])
        o = jax.nn.sigmoid(gates[3 * H:4 * H])
        c_new = f * c + i * g
        h_new = o * jnp.tanh(c_new)
        return (h_new, c_new), h_new

    h0 = jnp.zeros((H,), jnp.float32)
    c0 = jnp.zeros((H,), jnp.float32)
    (_, _), hs = lax.scan(step, (h0, c0), x)
    preds = jnp.dot(hs, w_lin.T, precision=hp) + b_lin
    return preds[-1]


if __name__ == "__main__":
    SEQ, D_IN, HID, OUT = 8, 128, 128, 128   # small, lane-aligned (H % 128 == 0)

    key = jax.random.PRNGKey(0)
    ks = jax.random.split(key, 7)
    bound = 1.0 / jnp.sqrt(HID)

    x = jax.random.normal(ks[0], (SEQ, D_IN), dtype=jnp.float32)
    w_ih = jax.random.uniform(ks[1], (4 * HID, D_IN), jnp.float32, -bound, bound)
    w_hh = jax.random.uniform(ks[2], (4 * HID, HID), jnp.float32, -bound, bound)
    b_ih = jax.random.uniform(ks[3], (4 * HID,), jnp.float32, -bound, bound)
    b_hh = jax.random.uniform(ks[4], (4 * HID,), jnp.float32, -bound, bound)
    w_lin = jax.random.uniform(ks[5], (OUT, HID), jnp.float32, -bound, bound)
    b_lin = jax.random.uniform(ks[6], (OUT,), jnp.float32, -bound, bound)

    params = prepare_lstm_params(w_ih, w_hh, b_ih, b_hh, w_lin, b_lin)

    out = lstm_forward(x, params)
    out = jax.block_until_ready(out)

    ref = lstm_reference(x, w_ih, w_hh, b_ih, b_hh, w_lin, b_lin)
    assert out.shape == (OUT,)
    # The compensated hi/lo bf16 recurrent matmul keeps the end-to-end error
    # at the ~1e-4 level vs the exact-f32 reference; 5e-4 gives headroom.
    assert jnp.allclose(out, ref, atol=5e-4, rtol=5e-4), "mismatch vs reference"

    print("KERNEL_OK")
</pallas_src>

<mosaic_0001>
module attributes {stable_mosaic.version = 11 : i64} {
  func.func @lstm_kernel(%arg0: memref<8x128xf32, #tpu.memory_space<vmem>>, %arg1: memref<128x512xf32, #tpu.memory_space<vmem>>, %arg2: memref<128x512xbf16, #tpu.memory_space<vmem>>, %arg3: memref<128x512xbf16, #tpu.memory_space<vmem>>, %arg4: memref<1x512xf32, #tpu.memory_space<vmem>>, %arg5: memref<128x128xf32, #tpu.memory_space<vmem>>, %arg6: memref<1x128xf32, #tpu.memory_space<vmem>>, %arg7: memref<1x128xf32, #tpu.memory_space<vmem>>) attributes {dimension_semantics = [], scalar_prefetch = 0 : i64, scratch_operands = 0 : i64, tpu.core_type = #tpu.core_type<tc>} {
    %c0 = arith.constant 0 : index
    %c0_0 = arith.constant 0 : index
    %0 = vector.load %arg0[%c0, %c0_0] : memref<8x128xf32, #tpu.memory_space<vmem>>, vector<8x128xf32>
    %c0_1 = arith.constant 0 : index
    %c0_2 = arith.constant 0 : index
    %1 = vector.load %arg1[%c0_1, %c0_2] : memref<128x512xf32, #tpu.memory_space<vmem>>, vector<128x512xf32>
    %cst = arith.constant dense<0.000000e+00> : vector<8x512xf32>
    %2 = tpu.matmul %0, %1, %cst {dimension_numbers = #tpu.dot_dimension_numbers<[1], [0], [0], [1], [0, 0, 1, 1], [], []>} : vector<8x128xf32>, vector<128x512xf32>, vector<8x512xf32> -> vector<8x512xf32>
    %c0_3 = arith.constant 0 : index
    %c0_4 = arith.constant 0 : index
    %3 = vector.load %arg4[%c0_3, %c0_4] : memref<1x512xf32, #tpu.memory_space<vmem>>, vector<1x512xf32>
    %4 = vector.broadcast %3 : vector<1x512xf32> to vector<8x512xf32>
    %5 = arith.addf %2, %4 : vector<8x512xf32>
    %cst_5 = arith.constant 0.000000e+00 : f32
    %6 = vector.broadcast %cst_5 : f32 to vector<1x128xf32>
    %cst_6 = arith.constant 0.000000e+00 : f32
    %7 = vector.broadcast %cst_6 : f32 to vector<1x128xf32>
    %8 = arith.truncf %6 : vector<1x128xf32> to vector<1x128xbf16>
    %9 = arith.extf %8 : vector<1x128xbf16> to vector<1x128xf32>
    %10 = arith.subf %6, %9 : vector<1x128xf32>
    %11 = arith.truncf %10 : vector<1x128xf32> to vector<1x128xbf16>
    %c0_7 = arith.constant 0 : index
    %c0_8 = arith.constant 0 : index
    %12 = vector.load %arg2[%c0_7, %c0_8] : memref<128x512xbf16, #tpu.memory_space<vmem>>, vector<128x512xbf16>
    %cst_9 = arith.constant dense<0.000000e+00> : vector<1x512xf32>
    %13 = tpu.matmul %8, %12, %cst_9 {dimension_numbers = #tpu.dot_dimension_numbers<[1], [0], [0], [1], [0, 0, 1, 1], [], []>} : vector<1x128xbf16>, vector<128x512xbf16>, vector<1x512xf32> -> vector<1x512xf32>
    %c0_10 = arith.constant 0 : index
    %c0_11 = arith.constant 0 : index
    %14 = vector.load %arg3[%c0_10, %c0_11] : memref<128x512xbf16, #tpu.memory_space<vmem>>, vector<128x512xbf16>
    %cst_12 = arith.constant dense<0.000000e+00> : vector<1x512xf32>
    %15 = tpu.matmul %8, %14, %cst_12 {dimension_numbers = #tpu.dot_dimension_numbers<[1], [0], [0], [1], [0, 0, 1, 1], [], []>} : vector<1x128xbf16>, vector<128x512xbf16>, vector<1x512xf32> -> vector<1x512xf32>
    %16 = arith.addf %13, %15 : vector<1x512xf32>
    %c0_13 = arith.constant 0 : index
    %c0_14 = arith.constant 0 : index
    %17 = vector.load %arg2[%c0_13, %c0_14] : memref<128x512xbf16, #tpu.memory_space<vmem>>, vector<128x512xbf16>
    %cst_15 = arith.constant dense<0.000000e+00> : vector<1x512xf32>
    %18 = tpu.matmul %11, %17, %cst_15 {dimension_numbers = #tpu.dot_dimension_numbers<[1], [0], [0], [1], [0, 0, 1, 1], [], []>} : vector<1x128xbf16>, vector<128x512xbf16>, vector<1x512xf32> -> vector<1x512xf32>
    %19 = arith.addf %16, %18 : vector<1x512xf32>
    %20 = vector.extract_strided_slice %5 {offsets = [0, 0], sizes = [1, 512], strides = [1, 1]} : vector<8x512xf32> to vector<1x512xf32>
    %21 = arith.addf %20, %19 : vector<1x512xf32>
    %22 = vector.extract_strided_slice %21 {offsets = [0, 0], sizes = [1, 384], strides = [1, 1]} : vector<1x512xf32> to vector<1x384xf32>
    %cst_16 = arith.constant 5.000000e-01 : f32
    %23 = vector.broadcast %cst_16 : f32 to vector<1x384xf32>
    %24 = arith.mulf %23, %22 : vector<1x384xf32>
    %25 = math.tanh %24 : vector<1x384xf32>
    %cst_17 = arith.constant 5.000000e-01 : f32
    %26 = vector.broadcast %cst_17 : f32 to vector<1x384xf32>
    %27 = arith.mulf %26, %25 : vector<1x384xf32>
    %cst_18 = arith.constant 5.000000e-01 : f32
    %28 = vector.broadcast %cst_18 : f32 to vector<1x384xf32>
    %29 = arith.addf %27, %28 : vector<1x384xf32>
    %30 = vector.extract_strided_slice %29 {offsets = [0, 0], sizes = [1, 128], strides = [1, 1]} : vector<1x384xf32> to vector<1x128xf32>
    %31 = vector.extract_strided_slice %29 {offsets = [0, 128], sizes = [1, 128], strides = [1, 1]} : vector<1x384xf32> to vector<1x128xf32>
    %32 = vector.extract_strided_slice %29 {offsets = [0, 256], sizes = [1, 128], strides = [1, 1]} : vector<1x384xf32> to vector<1x128xf32>
    %33 = vector.extract_strided_slice %21 {offsets = [0, 384], sizes = [1, 128], strides = [1, 1]} : vector<1x512xf32> to vector<1x128xf32>
    %34 = math.tanh %33 : vector<1x128xf32>
    %35 = arith.mulf %31, %7 : vector<1x128xf32>
    %36 = arith.mulf %30, %34 : vector<1x128xf32>
    %37 = arith.addf %35, %36 : vector<1x128xf32>
    %38 = math.tanh %37 : vector<1x128xf32>
    %39 = arith.mulf %32, %38 : vector<1x128xf32>
    %40 = arith.truncf %39 : vector<1x128xf32> to vector<1x128xbf16>
    %41 = arith.extf %40 : vector<1x128xbf16> to vector<1x128xf32>
    %42 = arith.subf %39, %41 : vector<1x128xf32>
    %43 = arith.truncf %42 : vector<1x128xf32> to vector<1x128xbf16>
    %c0_19 = arith.constant 0 : index
    %c0_20 = arith.constant 0 : index
    %44 = vector.load %arg2[%c0_19, %c0_20] : memref<128x512xbf16, #tpu.memory_space<vmem>>, vector<128x512xbf16>
    %cst_21 = arith.constant dense<0.000000e+00> : vector<1x512xf32>
    %45 = tpu.matmul %40, %44, %cst_21 {dimension_numbers = #tpu.dot_dimension_numbers<[1], [0], [0], [1], [0, 0, 1, 1], [], []>} : vector<1x128xbf16>, vector<128x512xbf16>, vector<1x512xf32> -> vector<1x512xf32>
    %c0_22 = arith.constant 0 : index
    %c0_23 = arith.constant 0 : index
    %46 = vector.load %arg3[%c0_22, %c0_23] : memref<128x512xbf16, #tpu.memory_space<vmem>>, vector<128x512xbf16>
    %cst_24 = arith.constant dense<0.000000e+00> : vector<1x512xf32>
    %47 = tpu.matmul %40, %46, %cst_24 {dimension_numbers = #tpu.dot_dimension_numbers<[1], [0], [0], [1], [0, 0, 1, 1], [], []>} : vector<1x128xbf16>, vector<128x512xbf16>, vector<1x512xf32> -> vector<1x512xf32>
    %48 = arith.addf %45, %47 : vector<1x512xf32>
    %c0_25 = arith.constant 0 : index
    %c0_26 = arith.constant 0 : index
    %49 = vector.load %arg2[%c0_25, %c0_26] : memref<128x512xbf16, #tpu.memory_space<vmem>>, vector<128x512xbf16>
    %cst_27 = arith.constant dense<0.000000e+00> : vector<1x512xf32>
    %50 = tpu.matmul %43, %49, %cst_27 {dimension_numbers = #tpu.dot_dimension_numbers<[1], [0], [0], [1], [0, 0, 1, 1], [], []>} : vector<1x128xbf16>, vector<128x512xbf16>, vector<1x512xf32> -> vector<1x512xf32>
    %51 = arith.addf %48, %50 : vector<1x512xf32>
    %52 = vector.extract_strided_slice %5 {offsets = [1, 0], sizes = [1, 512], strides = [1, 1]} : vector<8x512xf32> to vector<1x512xf32>
    %53 = arith.addf %52, %51 : vector<1x512xf32>
    %54 = vector.extract_strided_slice %53 {offsets = [0, 0], sizes = [1, 384], strides = [1, 1]} : vector<1x512xf32> to vector<1x384xf32>
    %cst_28 = arith.constant 5.000000e-01 : f32
    %55 = vector.broadcast %cst_28 : f32 to vector<1x384xf32>
    %56 = arith.mulf %55, %54 : vector<1x384xf32>
    %57 = math.tanh %56 : vector<1x384xf32>
    %cst_29 = arith.constant 5.000000e-01 : f32
    %58 = vector.broadcast %cst_29 : f32 to vector<1x384xf32>
    %59 = arith.mulf %58, %57 : vector<1x384xf32>
    %cst_30 = arith.constant 5.000000e-01 : f32
    %60 = vector.broadcast %cst_30 : f32 to vector<1x384xf32>
    %61 = arith.addf %59, %60 : vector<1x384xf32>
    %62 = vector.extract_strided_slice %61 {offsets = [0, 0], sizes = [1, 128], strides = [1, 1]} : vector<1x384xf32> to vector<1x128xf32>
    %63 = vector.extract_strided_slice %61 {offsets = [0, 128], sizes = [1, 128], strides = [1, 1]} : vector<1x384xf32> to vector<1x128xf32>
    %64 = vector.extract_strided_slice %61 {offsets = [0, 256], sizes = [1, 128], strides = [1, 1]} : vector<1x384xf32> to vector<1x128xf32>
    %65 = vector.extract_strided_slice %53 {offsets = [0, 384], sizes = [1, 128], strides = [1, 1]} : vector<1x512xf32> to vector<1x128xf32>
    %66 = math.tanh %65 : vector<1x128xf32>
    %67 = arith.mulf %63, %37 : vector<1x128xf32>
    %68 = arith.mulf %62, %66 : vector<1x128xf32>
    %69 = arith.addf %67, %68 : vector<1x128xf32>
    %70 = math.tanh %69 : vector<1x128xf32>
    %71 = arith.mulf %64, %70 : vector<1x128xf32>
    %72 = arith.truncf %71 : vector<1x128xf32> to vector<1x128xbf16>
    %73 = arith.extf %72 : vector<1x128xbf16> to vector<1x128xf32>
    %74 = arith.subf %71, %73 : vector<1x128xf32>
    %75 = arith.truncf %74 : vector<1x128xf32> to vector<1x128xbf16>
    %c0_31 = arith.constant 0 : index
    %c0_32 = arith.constant 0 : index
    %76 = vector.load %arg2[%c0_31, %c0_32] : memref<128x512xbf16, #tpu.memory_space<vmem>>, vector<128x512xbf16>
    %cst_33 = arith.constant dense<0.000000e+00> : vector<1x512xf32>
    %77 = tpu.matmul %72, %76, %cst_33 {dimension_numbers = #tpu.dot_dimension_numbers<[1], [0], [0], [1], [0, 0, 1, 1], [], []>} : vector<1x128xbf16>, vector<128x512xbf16>, vector<1x512xf32> -> vector<1x512xf32>
    %c0_34 = arith.constant 0 : index
    %c0_35 = arith.constant 0 : index
    %78 = vector.load %arg3[%c0_34, %c0_35] : memref<128x512xbf16, #tpu.memory_space<vmem>>, vector<128x512xbf16>
    %cst_36 = arith.constant dense<0.000000e+00> : vector<1x512xf32>
    %79 = tpu.matmul %72, %78, %cst_36 {dimension_numbers = #tpu.dot_dimension_numbers<[1], [0], [0], [1], [0, 0, 1, 1], [], []>} : vector<1x128xbf16>, vector<128x512xbf16>, vector<1x512xf32> -> vector<1x512xf32>
    %80 = arith.addf %77, %79 : vector<1x512xf32>
    %c0_37 = arith.constant 0 : index
    %c0_38 = arith.constant 0 : index
    %81 = vector.load %arg2[%c0_37, %c0_38] : memref<128x512xbf16, #tpu.memory_space<vmem>>, vector<128x512xbf16>
    %cst_39 = arith.constant dense<0.000000e+00> : vector<1x512xf32>
    %82 = tpu.matmul %75, %81, %cst_39 {dimension_numbers = #tpu.dot_dimension_numbers<[1], [0], [0], [1], [0, 0, 1, 1], [], []>} : vector<1x128xbf16>, vector<128x512xbf16>, vector<1x512xf32> -> vector<1x512xf32>
    %83 = arith.addf %80, %82 : vector<1x512xf32>
    %84 = vector.extract_strided_slice %5 {offsets = [2, 0], sizes = [1, 512], strides = [1, 1]} : vector<8x512xf32> to vector<1x512xf32>
    %85 = arith.addf %84, %83 : vector<1x512xf32>
    %86 = vector.extract_strided_slice %85 {offsets = [0, 0], sizes = [1, 384], strides = [1, 1]} : vector<1x512xf32> to vector<1x384xf32>
    %cst_40 = arith.constant 5.000000e-01 : f32
    %87 = vector.broadcast %cst_40 : f32 to vector<1x384xf32>
    %88 = arith.mulf %87, %86 : vector<1x384xf32>
    %89 = math.tanh %88 : vector<1x384xf32>
    %cst_41 = arith.constant 5.000000e-01 : f32
    %90 = vector.broadcast %cst_41 : f32 to vector<1x384xf32>
    %91 = arith.mulf %90, %89 : vector<1x384xf32>
    %cst_42 = arith.constant 5.000000e-01 : f32
    %92 = vector.broadcast %cst_42 : f32 to vector<1x384xf32>
    %93 = arith.addf %91, %92 : vector<1x384xf32>
    %94 = vector.extract_strided_slice %93 {offsets = [0, 0], sizes = [1, 128], strides = [1, 1]} : vector<1x384xf32> to vector<1x128xf32>
    %95 = vector.extract_strided_slice %93 {offsets = [0, 128], sizes = [1, 128], strides = [1, 1]} : vector<1x384xf32> to vector<1x128xf32>
    %96 = vector.extract_strided_slice %93 {offsets = [0, 256], sizes = [1, 128], strides = [1, 1]} : vector<1x384xf32> to vector<1x128xf32>
    %97 = vector.extract_strided_slice %85 {offsets = [0, 384], sizes = [1, 128], strides = [1, 1]} : vector<1x512xf32> to vector<1x128xf32>
    %98 = math.tanh %97 : vector<1x128xf32>
    %99 = arith.mulf %95, %69 : vector<1x128xf32>
    %100 = arith.mulf %94, %98 : vector<1x128xf32>
    %101 = arith.addf %99, %100 : vector<1x128xf32>
    %102 = math.tanh %101 : vector<1x128xf32>
    %103 = arith.mulf %96, %102 : vector<1x128xf32>
    %104 = arith.truncf %103 : vector<1x128xf32> to vector<1x128xbf16>
    %105 = arith.extf %104 : vector<1x128xbf16> to vector<1x128xf32>
    %106 = arith.subf %103, %105 : vector<1x128xf32>
    %107 = arith.truncf %106 : vector<1x128xf32> to vector<1x128xbf16>
    %c0_43 = arith.constant 0 : index
    %c0_44 = arith.constant 0 : index
    %108 = vector.load %arg2[%c0_43, %c0_44] : memref<128x512xbf16, #tpu.memory_space<vmem>>, vector<128x512xbf16>
    %cst_45 = arith.constant dense<0.000000e+00> : vector<1x512xf32>
    %109 = tpu.matmul %104, %108, %cst_45 {dimension_numbers = #tpu.dot_dimension_numbers<[1], [0], [0], [1], [0, 0, 1, 1], [], []>} : vector<1x128xbf16>, vector<128x512xbf16>, vector<1x512xf32> -> vector<1x512xf32>
    %c0_46 = arith.constant 0 : index
    %c0_47 = arith.constant 0 : index
    %110 = vector.load %arg3[%c0_46, %c0_47] : memref<128x512xbf16, #tpu.memory_space<vmem>>, vector<128x512xbf16>
    %cst_48 = arith.constant dense<0.000000e+00> : vector<1x512xf32>
    %111 = tpu.matmul %104, %110, %cst_48 {dimension_numbers = #tpu.dot_dimension_numbers<[1], [0], [0], [1], [0, 0, 1, 1], [], []>} : vector<1x128xbf16>, vector<128x512xbf16>, vector<1x512xf32> -> vector<1x512xf32>
    %112 = arith.addf %109, %111 : vector<1x512xf32>
    %c0_49 = arith.constant 0 : index
    %c0_50 = arith.constant 0 : index
    %113 = vector.load %arg2[%c0_49, %c0_50] : memref<128x512xbf16, #tpu.memory_space<vmem>>, vector<128x512xbf16>
    %cst_51 = arith.constant dense<0.000000e+00> : vector<1x512xf32>
    %114 = tpu.matmul %107, %113, %cst_51 {dimension_numbers = #tpu.dot_dimension_numbers<[1], [0], [0], [1], [0, 0, 1, 1], [], []>} : vector<1x128xbf16>, vector<128x512xbf16>, vector<1x512xf32> -> vector<1x512xf32>
    %115 = arith.addf %112, %114 : vector<1x512xf32>
    %116 = vector.extract_strided_slice %5 {offsets = [3, 0], sizes = [1, 512], strides = [1, 1]} : vector<8x512xf32> to vector<1x512xf32>
    %117 = arith.addf %116, %115 : vector<1x512xf32>
    %118 = vector.extract_strided_slice %117 {offsets = [0, 0], sizes = [1, 384], strides = [1, 1]} : vector<1x512xf32> to vector<1x384xf32>
    %cst_52 = arith.constant 5.000000e-01 : f32
    %119 = vector.broadcast %cst_52 : f32 to vector<1x384xf32>
    %120 = arith.mulf %119, %118 : vector<1x384xf32>
    %121 = math.tanh %120 : vector<1x384xf32>
    %cst_53 = arith.constant 5.000000e-01 : f32
    %122 = vector.broadcast %cst_53 : f32 to vector<1x384xf32>
    %123 = arith.mulf %122, %121 : vector<1x384xf32>
    %cst_54 = arith.constant 5.000000e-01 : f32
    %124 = vector.broadcast %cst_54 : f32 to vector<1x384xf32>
    %125 = arith.addf %123, %124 : vector<1x384xf32>
    %126 = vector.extract_strided_slice %125 {offsets = [0, 0], sizes = [1, 128], strides = [1, 1]} : vector<1x384xf32> to vector<1x128xf32>
    %127 = vector.extract_strided_slice %125 {offsets = [0, 128], sizes = [1, 128], strides = [1, 1]} : vector<1x384xf32> to vector<1x128xf32>
    %128 = vector.extract_strided_slice %125 {offsets = [0, 256], sizes = [1, 128], strides = [1, 1]} : vector<1x384xf32> to vector<1x128xf32>
    %129 = vector.extract_strided_slice %117 {offsets = [0, 384], sizes = [1, 128], strides = [1, 1]} : vector<1x512xf32> to vector<1x128xf32>
    %130 = math.tanh %129 : vector<1x128xf32>
    %131 = arith.mulf %127, %101 : vector<1x128xf32>
    %132 = arith.mulf %126, %130 : vector<1x128xf32>
    %133 = arith.addf %131, %132 : vector<1x128xf32>
    %134 = math.tanh %133 : vector<1x128xf32>
    %135 = arith.mulf %128, %134 : vector<1x128xf32>
    %136 = arith.truncf %135 : vector<1x128xf32> to vector<1x128xbf16>
    %137 = arith.extf %136 : vector<1x128xbf16> to vector<1x128xf32>
    %138 = arith.subf %135, %137 : vector<1x128xf32>
    %139 = arith.truncf %138 : vector<1x128xf32> to vector<1x128xbf16>
    %c0_55 = arith.constant 0 : index
    %c0_56 = arith.constant 0 : index
    %140 = vector.load %arg2[%c0_55, %c0_56] : memref<128x512xbf16, #tpu.memory_space<vmem>>, vector<128x512xbf16>
    %cst_57 = arith.constant dense<0.000000e+00> : vector<1x512xf32>
    %141 = tpu.matmul %136, %140, %cst_57 {dimension_numbers = #tpu.dot_dimension_numbers<[1], [0], [0], [1], [0, 0, 1, 1], [], []>} : vector<1x128xbf16>, vector<128x512xbf16>, vector<1x512xf32> -> vector<1x512xf32>
    %c0_58 = arith.constant 0 : index
    %c0_59 = arith.constant 0 : index
    %142 = vector.load %arg3[%c0_58, %c0_59] : memref<128x512xbf16, #tpu.memory_space<vmem>>, vector<128x512xbf16>
    %cst_60 = arith.constant dense<0.000000e+00> : vector<1x512xf32>
    %143 = tpu.matmul %136, %142, %cst_60 {dimension_numbers = #tpu.dot_dimension_numbers<[1], [0], [0], [1], [0, 0, 1, 1], [], []>} : vector<1x128xbf16>, vector<128x512xbf16>, vector<1x512xf32> -> vector<1x512xf32>
    %144 = arith.addf %141, %143 : vector<1x512xf32>
    %c0_61 = arith.constant 0 : index
    %c0_62 = arith.constant 0 : index
    %145 = vector.load %arg2[%c0_61, %c0_62] : memref<128x512xbf16, #tpu.memory_space<vmem>>, vector<128x512xbf16>
    %cst_63 = arith.constant dense<0.000000e+00> : vector<1x512xf32>
    %146 = tpu.matmul %139, %145, %cst_63 {dimension_numbers = #tpu.dot_dimension_numbers<[1], [0], [0], [1], [0, 0, 1, 1], [], []>} : vector<1x128xbf16>, vector<128x512xbf16>, vector<1x512xf32> -> vector<1x512xf32>
    %147 = arith.addf %144, %146 : vector<1x512xf32>
    %148 = vector.extract_strided_slice %5 {offsets = [4, 0], sizes = [1, 512], strides = [1, 1]} : vector<8x512xf32> to vector<1x512xf32>
    %149 = arith.addf %148, %147 : vector<1x512xf32>
    %150 = vector.extract_strided_slice %149 {offsets = [0, 0], sizes = [1, 384], strides = [1, 1]} : vector<1x512xf32> to vector<1x384xf32>
    %cst_64 = arith.constant 5.000000e-01 : f32
    %151 = vector.broadcast %cst_64 : f32 to vector<1x384xf32>
    %152 = arith.mulf %151, %150 : vector<1x384xf32>
    %153 = math.tanh %152 : vector<1x384xf32>
    %cst_65 = arith.constant 5.000000e-01 : f32
    %154 = vector.broadcast %cst_65 : f32 to vector<1x384xf32>
    %155 = arith.mulf %154, %153 : vector<1x384xf32>
    %cst_66 = arith.constant 5.000000e-01 : f32
    %156 = vector.broadcast %cst_66 : f32 to vector<1x384xf32>
    %157 = arith.addf %155, %156 : vector<1x384xf32>
    %158 = vector.extract_strided_slice %157 {offsets = [0, 0], sizes = [1, 128], strides = [1, 1]} : vector<1x384xf32> to vector<1x128xf32>
    %159 = vector.extract_strided_slice %157 {offsets = [0, 128], sizes = [1, 128], strides = [1, 1]} : vector<1x384xf32> to vector<1x128xf32>
    %160 = vector.extract_strided_slice %157 {offsets = [0, 256], sizes = [1, 128], strides = [1, 1]} : vector<1x384xf32> to vector<1x128xf32>
    %161 = vector.extract_strided_slice %149 {offsets = [0, 384], sizes = [1, 128], strides = [1, 1]} : vector<1x512xf32> to vector<1x128xf32>
    %162 = math.tanh %161 : vector<1x128xf32>
    %163 = arith.mulf %159, %133 : vector<1x128xf32>
    %164 = arith.mulf %158, %162 : vector<1x128xf32>
    %165 = arith.addf %163, %164 : vector<1x128xf32>
    %166 = math.tanh %165 : vector<1x128xf32>
    %167 = arith.mulf %160, %166 : vector<1x128xf32>
    %168 = arith.truncf %167 : vector<1x128xf32> to vector<1x128xbf16>
    %169 = arith.extf %168 : vector<1x128xbf16> to vector<1x128xf32>
    %170 = arith.subf %167, %169 : vector<1x128xf32>
    %171 = arith.truncf %170 : vector<1x128xf32> to vector<1x128xbf16>
    %c0_67 = arith.constant 0 : index
    %c0_68 = arith.constant 0 : index
    %172 = vector.load %arg2[%c0_67, %c0_68] : memref<128x512xbf16, #tpu.memory_space<vmem>>, vector<128x512xbf16>
    %cst_69 = arith.constant dense<0.000000e+00> : vector<1x512xf32>
    %173 = tpu.matmul %168, %172, %cst_69 {dimension_numbers = #tpu.dot_dimension_numbers<[1], [0], [0], [1], [0, 0, 1, 1], [], []>} : vector<1x128xbf16>, vector<128x512xbf16>, vector<1x512xf32> -> vector<1x512xf32>
    %c0_70 = arith.constant 0 : index
    %c0_71 = arith.constant 0 : index
    %174 = vector.load %arg3[%c0_70, %c0_71] : memref<128x512xbf16, #tpu.memory_space<vmem>>, vector<128x512xbf16>
    %cst_72 = arith.constant dense<0.000000e+00> : vector<1x512xf32>
    %175 = tpu.matmul %168, %174, %cst_72 {dimension_numbers = #tpu.dot_dimension_numbers<[1], [0], [0], [1], [0, 0, 1, 1], [], []>} : vector<1x128xbf16>, vector<128x512xbf16>, vector<1x512xf32> -> vector<1x512xf32>
    %176 = arith.addf %173, %175 : vector<1x512xf32>
    %c0_73 = arith.constant 0 : index
    %c0_74 = arith.constant 0 : index
    %177 = vector.load %arg2[%c0_73, %c0_74] : memref<128x512xbf16, #tpu.memory_space<vmem>>, vector<128x512xbf16>
    %cst_75 = arith.constant dense<0.000000e+00> : vector<1x512xf32>
    %178 = tpu.matmul %171, %177, %cst_75 {dimension_numbers = #tpu.dot_dimension_numbers<[1], [0], [0], [1], [0, 0, 1, 1], [], []>} : vector<1x128xbf16>, vector<128x512xbf16>, vector<1x512xf32> -> vector<1x512xf32>
    %179 = arith.addf %176, %178 : vector<1x512xf32>
    %180 = vector.extract_strided_slice %5 {offsets = [5, 0], sizes = [1, 512], strides = [1, 1]} : vector<8x512xf32> to vector<1x512xf32>
    %181 = arith.addf %180, %179 : vector<1x512xf32>
    %182 = vector.extract_strided_slice %181 {offsets = [0, 0], sizes = [1, 384], strides = [1, 1]} : vector<1x512xf32> to vector<1x384xf32>
    %cst_76 = arith.constant 5.000000e-01 : f32
    %183 = vector.broadcast %cst_76 : f32 to vector<1x384xf32>
    %184 = arith.mulf %183, %182 : vector<1x384xf32>
    %185 = math.tanh %184 : vector<1x384xf32>
    %cst_77 = arith.constant 5.000000e-01 : f32
    %186 = vector.broadcast %cst_77 : f32 to vector<1x384xf32>
    %187 = arith.mulf %186, %185 : vector<1x384xf32>
    %cst_78 = arith.constant 5.000000e-01 : f32
    %188 = vector.broadcast %cst_78 : f32 to vector<1x384xf32>
    %189 = arith.addf %187, %188 : vector<1x384xf32>
    %190 = vector.extract_strided_slice %189 {offsets = [0, 0], sizes = [1, 128], strides = [1, 1]} : vector<1x384xf32> to vector<1x128xf32>
    %191 = vector.extract_strided_slice %189 {offsets = [0, 128], sizes = [1, 128], strides = [1, 1]} : vector<1x384xf32> to vector<1x128xf32>
    %192 = vector.extract_strided_slice %189 {offsets = [0, 256], sizes = [1, 128], strides = [1, 1]} : vector<1x384xf32> to vector<1x128xf32>
    %193 = vector.extract_strided_slice %181 {offsets = [0, 384], sizes = [1, 128], strides = [1, 1]} : vector<1x512xf32> to vector<1x128xf32>
    %194 = math.tanh %193 : vector<1x128xf32>
    %195 = arith.mulf %191, %165 : vector<1x128xf32>
    %196 = arith.mulf %190, %194 : vector<1x128xf32>
    %197 = arith.addf %195, %196 : vector<1x128xf32>
    %198 = math.tanh %197 : vector<1x128xf32>
    %199 = arith.mulf %192, %198 : vector<1x128xf32>
    %200 = arith.truncf %199 : vector<1x128xf32> to vector<1x128xbf16>
    %201 = arith.extf %200 : vector<1x128xbf16> to vector<1x128xf32>
    %202 = arith.subf %199, %201 : vector<1x128xf32>
    %203 = arith.truncf %202 : vector<1x128xf32> to vector<1x128xbf16>
    %c0_79 = arith.constant 0 : index
    %c0_80 = arith.constant 0 : index
    %204 = vector.load %arg2[%c0_79, %c0_80] : memref<128x512xbf16, #tpu.memory_space<vmem>>, vector<128x512xbf16>
    %cst_81 = arith.constant dense<0.000000e+00> : vector<1x512xf32>
    %205 = tpu.matmul %200, %204, %cst_81 {dimension_numbers = #tpu.dot_dimension_numbers<[1], [0], [0], [1], [0, 0, 1, 1], [], []>} : vector<1x128xbf16>, vector<128x512xbf16>, vector<1x512xf32> -> vector<1x512xf32>
    %c0_82 = arith.constant 0 : index
    %c0_83 = arith.constant 0 : index
    %206 = vector.load %arg3[%c0_82, %c0_83] : memref<128x512xbf16, #tpu.memory_space<vmem>>, vector<128x512xbf16>
    %cst_84 = arith.constant dense<0.000000e+00> : vector<1x512xf32>
    %207 = tpu.matmul %200, %206, %cst_84 {dimension_numbers = #tpu.dot_dimension_numbers<[1], [0], [0], [1], [0, 0, 1, 1], [], []>} : vector<1x128xbf16>, vector<128x512xbf16>, vector<1x512xf32> -> vector<1x512xf32>
    %208 = arith.addf %205, %207 : vector<1x512xf32>
    %c0_85 = arith.constant 0 : index
    %c0_86 = arith.constant 0 : index
    %209 = vector.load %arg2[%c0_85, %c0_86] : memref<128x512xbf16, #tpu.memory_space<vmem>>, vector<128x512xbf16>
    %cst_87 = arith.constant dense<0.000000e+00> : vector<1x512xf32>
    %210 = tpu.matmul %203, %209, %cst_87 {dimension_numbers = #tpu.dot_dimension_numbers<[1], [0], [0], [1], [0, 0, 1, 1], [], []>} : vector<1x128xbf16>, vector<128x512xbf16>, vector<1x512xf32> -> vector<1x512xf32>
    %211 = arith.addf %208, %210 : vector<1x512xf32>
    %212 = vector.extract_strided_slice %5 {offsets = [6, 0], sizes = [1, 512], strides = [1, 1]} : vector<8x512xf32> to vector<1x512xf32>
    %213 = arith.addf %212, %211 : vector<1x512xf32>
    %214 = vector.extract_strided_slice %213 {offsets = [0, 0], sizes = [1, 384], strides = [1, 1]} : vector<1x512xf32> to vector<1x384xf32>
    %cst_88 = arith.constant 5.000000e-01 : f32
    %215 = vector.broadcast %cst_88 : f32 to vector<1x384xf32>
    %216 = arith.mulf %215, %214 : vector<1x384xf32>
    %217 = math.tanh %216 : vector<1x384xf32>
    %cst_89 = arith.constant 5.000000e-01 : f32
    %218 = vector.broadcast %cst_89 : f32 to vector<1x384xf32>
    %219 = arith.mulf %218, %217 : vector<1x384xf32>
    %cst_90 = arith.constant 5.000000e-01 : f32
    %220 = vector.broadcast %cst_90 : f32 to vector<1x384xf32>
    %221 = arith.addf %219, %220 : vector<1x384xf32>
    %222 = vector.extract_strided_slice %221 {offsets = [0, 0], sizes = [1, 128], strides = [1, 1]} : vector<1x384xf32> to vector<1x128xf32>
    %223 = vector.extract_strided_slice %221 {offsets = [0, 128], sizes = [1, 128], strides = [1, 1]} : vector<1x384xf32> to vector<1x128xf32>
    %224 = vector.extract_strided_slice %221 {offsets = [0, 256], sizes = [1, 128], strides = [1, 1]} : vector<1x384xf32> to vector<1x128xf32>
    %225 = vector.extract_strided_slice %213 {offsets = [0, 384], sizes = [1, 128], strides = [1, 1]} : vector<1x512xf32> to vector<1x128xf32>
    %226 = math.tanh %225 : vector<1x128xf32>
    %227 = arith.mulf %223, %197 : vector<1x128xf32>
    %228 = arith.mulf %222, %226 : vector<1x128xf32>
    %229 = arith.addf %227, %228 : vector<1x128xf32>
    %230 = math.tanh %229 : vector<1x128xf32>
    %231 = arith.mulf %224, %230 : vector<1x128xf32>
    %232 = arith.truncf %231 : vector<1x128xf32> to vector<1x128xbf16>
    %233 = arith.extf %232 : vector<1x128xbf16> to vector<1x128xf32>
    %234 = arith.subf %231, %233 : vector<1x128xf32>
    %235 = arith.truncf %234 : vector<1x128xf32> to vector<1x128xbf16>
    %c0_91 = arith.constant 0 : index
    %c0_92 = arith.constant 0 : index
    %236 = vector.load %arg2[%c0_91, %c0_92] : memref<128x512xbf16, #tpu.memory_space<vmem>>, vector<128x512xbf16>
    %cst_93 = arith.constant dense<0.000000e+00> : vector<1x512xf32>
    %237 = tpu.matmul %232, %236, %cst_93 {dimension_numbers = #tpu.dot_dimension_numbers<[1], [0], [0], [1], [0, 0, 1, 1], [], []>} : vector<1x128xbf16>, vector<128x512xbf16>, vector<1x512xf32> -> vector<1x512xf32>
    %c0_94 = arith.constant 0 : index
    %c0_95 = arith.constant 0 : index
    %238 = vector.load %arg3[%c0_94, %c0_95] : memref<128x512xbf16, #tpu.memory_space<vmem>>, vector<128x512xbf16>
    %cst_96 = arith.constant dense<0.000000e+00> : vector<1x512xf32>
    %239 = tpu.matmul %232, %238, %cst_96 {dimension_numbers = #tpu.dot_dimension_numbers<[1], [0], [0], [1], [0, 0, 1, 1], [], []>} : vector<1x128xbf16>, vector<128x512xbf16>, vector<1x512xf32> -> vector<1x512xf32>
    %240 = arith.addf %237, %239 : vector<1x512xf32>
    %c0_97 = arith.constant 0 : index
    %c0_98 = arith.constant 0 : index
    %241 = vector.load %arg2[%c0_97, %c0_98] : memref<128x512xbf16, #tpu.memory_space<vmem>>, vector<128x512xbf16>
    %cst_99 = arith.constant dense<0.000000e+00> : vector<1x512xf32>
    %242 = tpu.matmul %235, %241, %cst_99 {dimension_numbers = #tpu.dot_dimension_numbers<[1], [0], [0], [1], [0, 0, 1, 1], [], []>} : vector<1x128xbf16>, vector<128x512xbf16>, vector<1x512xf32> -> vector<1x512xf32>
    %243 = arith.addf %240, %242 : vector<1x512xf32>
    %244 = vector.extract_strided_slice %5 {offsets = [7, 0], sizes = [1, 512], strides = [1, 1]} : vector<8x512xf32> to vector<1x512xf32>
    %245 = arith.addf %244, %243 : vector<1x512xf32>
    %246 = vector.extract_strided_slice %245 {offsets = [0, 0], sizes = [1, 384], strides = [1, 1]} : vector<1x512xf32> to vector<1x384xf32>
    %cst_100 = arith.constant 5.000000e-01 : f32
    %247 = vector.broadcast %cst_100 : f32 to vector<1x384xf32>
    %248 = arith.mulf %247, %246 : vector<1x384xf32>
    %249 = math.tanh %248 : vector<1x384xf32>
    %cst_101 = arith.constant 5.000000e-01 : f32
    %250 = vector.broadcast %cst_101 : f32 to vector<1x384xf32>
    %251 = arith.mulf %250, %249 : vector<1x384xf32>
    %cst_102 = arith.constant 5.000000e-01 : f32
    %252 = vector.broadcast %cst_102 : f32 to vector<1x384xf32>
    %253 = arith.addf %251, %252 : vector<1x384xf32>
    %254 = vector.extract_strided_slice %253 {offsets = [0, 0], sizes = [1, 128], strides = [1, 1]} : vector<1x384xf32> to vector<1x128xf32>
    %255 = vector.extract_strided_slice %253 {offsets = [0, 128], sizes = [1, 128], strides = [1, 1]} : vector<1x384xf32> to vector<1x128xf32>
    %256 = vector.extract_strided_slice %253 {offsets = [0, 256], sizes = [1, 128], strides = [1, 1]} : vector<1x384xf32> to vector<1x128xf32>
    %257 = vector.extract_strided_slice %245 {offsets = [0, 384], sizes = [1, 128], strides = [1, 1]} : vector<1x512xf32> to vector<1x128xf32>
    %258 = math.tanh %257 : vector<1x128xf32>
    %259 = arith.mulf %255, %229 : vector<1x128xf32>
    %260 = arith.mulf %254, %258 : vector<1x128xf32>
    %261 = arith.addf %259, %260 : vector<1x128xf32>
    %262 = math.tanh %261 : vector<1x128xf32>
    %263 = arith.mulf %256, %262 : vector<1x128xf32>
    %c0_103 = arith.constant 0 : index
    %c0_104 = arith.constant 0 : index
    %264 = vector.load %arg5[%c0_103, %c0_104] : memref<128x128xf32, #tpu.memory_space<vmem>>, vector<128x128xf32>
    %cst_105 = arith.constant dense<0.000000e+00> : vector<1x128xf32>
    %265 = tpu.matmul %263, %264, %cst_105 {dimension_numbers = #tpu.dot_dimension_numbers<[1], [0], [0], [1], [0, 0, 1, 1], [], []>} : vector<1x128xf32>, vector<128x128xf32>, vector<1x128xf32> -> vector<1x128xf32>
    %c0_106 = arith.constant 0 : index
    %c0_107 = arith.constant 0 : index
    %266 = vector.load %arg6[%c0_106, %c0_107] : memref<1x128xf32, #tpu.memory_space<vmem>>, vector<1x128xf32>
    %267 = arith.addf %265, %266 : vector<1x128xf32>
    %c0_108 = arith.constant 0 : index
    %c0_109 = arith.constant 0 : index
    %268 = vector.load %arg7[%c0_108, %c0_109] : memref<1x128xf32, #tpu.memory_space<vmem>>, vector<1x128xf32>
    tpu.vector_store %arg7[%c0_108, %c0_109], %267 {strides = array<i32>} : memref<1x128xf32, #tpu.memory_space<vmem>>, vector<1x128xf32>,
    return
  }
}

</mosaic_0001>

<bundles_post_ra>
// kernel: lstm_forward.1
= control target key start
LH: loop header
LB: loop body
LE: loop exit
PB: predicated region body
PF: predicated region fallthrough
CT: control target
= control target key end

     0   :  { %12 = vsyncpa [#allocation3], 0  ;;  %s5279_s0 = inlined_call_operand.hbm [shape: f32[8,128], index: 0, kind: input, shape index: {}]   ;;  %s5280_s1 = inlined_call_operand.hbm [shape: f32[128,512], index: 1, kind: input, shape index: {}]   ;;  %s5281_s2 = inlined_call_operand.hbm [shape: bf16[128,512], index: 2, kind: input, shape index: {}]   ;;  %s5282_s3 = inlined_call_operand.hbm [shape: bf16[128,512], index: 3, kind: input, shape index: {}]   ;;  %s5283_s4 = inlined_call_operand.hbm [shape: f32[1,512], index: 4, kind: input, shape index: {}]   ;;  %s5284_s5 = inlined_call_operand.hbm [shape: f32[128,128], index: 5, kind: input, shape index: {}]   ;;  %s5285_s6 = inlined_call_operand.vmem [shape: f32[1,128], index: 6, kind: input, shape index: {}]   ;;  %s5286_s7 = inlined_call_operand.hbm [shape: f32[1,128], index: 7, kind: output, shape index: {}]  }
   0x1   :  { %13 = vsyncpa [#allocation6], 0 }
   0x2   :  { %14 = vsyncpa [#allocation9], 0 }
   0x3   :  { %15 = vsyncpa [#allocation12], 0 }
   0x4   :  { %16 = vsyncpa [#allocation4], 0  ;;  %s3975_s24 = smov [#allocation5]   ;;  %s3811_s28 = scalar_lea.hbm %s5280_s1, 8192 }
   0x5   :  { %s32_s25 = sshll.u32 %s3975_s24, 4  ;;  %p3812_p0 = scmp.ne.s32.totalorder %s5280_s1, %s3811_s28  ;;  %s33_s25 = int_to_ptr.vmem [resolvable:$true] %s32_s25 }
   0x6   :  { %p3815_p1 = scmp.lt.u32.totalorder %s3811_s28, %s5280_s1 }
   0x8   :  { %p3817_p2 = pnand %p3815_p1, %p3812_p0 }
   0xa   :  { %3820 = shalt.err (!%p3817_p2)
}
   0xb   :  { %s3821_s10 = scalar_lea.vmem %s33_s25, 8192  ;;  %p3826_p4 = scmp.lt.s32.totalorder %s33_s25, %s33_s25 }
   0xc   :  { %p3822_p3 = scmp.ne.s32.totalorder %s33_s25, %s3821_s10  ;;  %p3827_p5 = scmp.lt.s32.totalorder %s3821_s10, %s3821_s10 }
   0xe   :  { %p3828_p6 = por %p3827_p5, %p3826_p4 }
  0x10   :  { %p3829_p7 = pnand %p3828_p6, %p3822_p3 }
  0x12   :  { %3832 = shalt.err (!%p3829_p7)
}
  0x13   :  { %s3976_s11 = smov 512   ;;  %s3977_s12 = smov 32  }
  0x14   :  { %38 = dma.hbm_to_vmem [thread:$0]  %s5280_s1, 8192, %s33_s25, [#allocation6], %s3976_s11, %s3976_s11, %s3977_s12  }
  0x15   :  { %s3978_s15 = smov [#allocation8]   ;;  %s3979_s17 = smov [#allocation2]  }
  0x16   :  { %s56_s16 = sshll.u32 %s3978_s15, 4  ;;  %s23_s18 = sshll.u32 %s3979_s17, 4  ;;  %s57_s16 = int_to_ptr.vmem [resolvable:$true] %s56_s16  ;;  %s24_s18 = int_to_ptr.vmem [resolvable:$true] %s23_s18 }
  0x17   :  { %s3833_s21 = scalar_lea.hbm %s5282_s3, 4096 }
  0x18   :  { %p3834_p8 = scmp.ne.s32.totalorder %s5282_s3, %s3833_s21  ;;  %p3837_p9 = scmp.lt.u32.totalorder %s3833_s21, %s5282_s3 }
  0x1a   :  { %p3839_p10 = pnand %p3837_p9, %p3834_p8 }
  0x1c   :  { %3842 = shalt.err (!%p3839_p10)
}
  0x1d   :  { %s3843_s1 = scalar_lea.vmem %s57_s16, 4096  ;;  %p3848_p12 = scmp.lt.s32.totalorder %s57_s16, %s57_s16 }
  0x1e   :  { %p3844_p11 = scmp.ne.s32.totalorder %s57_s16, %s3843_s1  ;;  %p3849_p13 = scmp.lt.s32.totalorder %s3843_s1, %s3843_s1 }
  0x20   :  { %p3850_p0 = por %p3849_p13, %p3848_p12 }
  0x22   :  { %p3851_p1 = pnand %p3850_p0, %p3844_p11 }
  0x24   :  { %3854 = shalt.err (!%p3851_p1)
}
  0x25   :  { %s3980_s25 = smov 256   ;;  %s3981_s27 = smov 16  }
  0x26   :  { %62 = dma.hbm_to_vmem [thread:$0]  %s5282_s3, 4096, %s57_s16, [#allocation9], %s3980_s25, %s3980_s25, %s3981_s27  }
  0x27   :  { %s3855_s9 = scalar_lea.hbm %s5279_s0, 128 }
  0x28   :  { %p3856_p2 = scmp.ne.s32.totalorder %s5279_s0, %s3855_s9  ;;  %p3859_p3 = scmp.lt.u32.totalorder %s3855_s9, %s5279_s0 }
  0x2a   :  { %p3861_p4 = pnand %p3859_p3, %p3856_p2 }
  0x2c   :  { %3864 = shalt.err (!%p3861_p4)
}
  0x2d   :  { %s3865_s14 = scalar_lea.vmem %s24_s18, 128  ;;  %p3870_p6 = scmp.lt.s32.totalorder %s24_s18, %s24_s18 }
  0x2e   :  { %p3866_p5 = scmp.ne.s32.totalorder %s24_s18, %s3865_s14  ;;  %p3871_p7 = scmp.lt.s32.totalorder %s3865_s14, %s3865_s14 }
  0x30   :  { %p3872_p8 = por %p3871_p7, %p3870_p6 }
  0x32   :  { %p3873_p9 = pnand %p3872_p8, %p3866_p5 }
  0x34   :  { %3876 = shalt.err (!%p3873_p9)
}
  0x35   :  { %26 = dma.hbm_to_vmem [thread:$0]  %s5279_s0, 128, %s24_s18, [#allocation3]  }
  0x36   :  { %s3982_s16 = smov [#allocation7]   ;;  %s3983_s19 = smov [#allocation10]  }
  0x37   :  { %s44_s17 = sshll.u32 %s3982_s16, 4  ;;  %s69_s20 = sshll.u32 %s3983_s19, 4  ;;  %s45_s17 = int_to_ptr.vmem [resolvable:$true] %s44_s17  ;;  %s70_s20 = int_to_ptr.vmem [resolvable:$true] %s69_s20 }
  0x38   :  { %s3877_s23 = scalar_lea.hbm %s5281_s2, 4096 }
  0x39   :  { %p3878_p10 = scmp.ne.s32.totalorder %s5281_s2, %s3877_s23  ;;  %p3881_p11 = scmp.lt.u32.totalorder %s3877_s23, %s5281_s2 }
  0x3b   :  { %p3883_p12 = pnand %p3881_p11, %p3878_p10 }
  0x3d   :  { %3886 = shalt.err (!%p3883_p12)
}
  0x3e   :  { %s3887_s0 = scalar_lea.vmem %s45_s17, 4096  ;;  %p3892_p0 = scmp.lt.s32.totalorder %s45_s17, %s45_s17 }
  0x3f   :  { %p3888_p13 = scmp.ne.s32.totalorder %s45_s17, %s3887_s0  ;;  %p3893_p1 = scmp.lt.s32.totalorder %s3887_s0, %s3887_s0 }
  0x41   :  { %p3894_p2 = por %p3893_p1, %p3892_p0 }
  0x43   :  { %p3895_p3 = pnand %p3894_p2, %p3888_p13 }
  0x45   :  { %3898 = shalt.err (!%p3895_p3)
}
  0x46   :  { %50 = dma.hbm_to_vmem [thread:$0]  %s5281_s2, 4096, %s45_s17, [#allocation6], %s3980_s25, %s3980_s25, %s3981_s27  }
  0x47   :  { %s3899_s9 = scalar_lea.hbm %s5283_s4, 64 }
  0x48   :  { %p3900_p4 = scmp.ne.s32.totalorder %s5283_s4, %s3899_s9  ;;  %p3903_p5 = scmp.lt.u32.totalorder %s3899_s9, %s5283_s4 }
  0x4a   :  { %p3905_p6 = pnand %p3903_p5, %p3900_p4 }
  0x4c   :  { %3908 = shalt.err (!%p3905_p6)
}
  0x4d   :  { %s3909_s14 = scalar_lea.vmem %s70_s20, 64  ;;  %p3914_p8 = scmp.lt.s32.totalorder %s70_s20, %s70_s20 }
  0x4e   :  { %p3910_p7 = scmp.ne.s32.totalorder %s70_s20, %s3909_s14  ;;  %p3915_p9 = scmp.lt.s32.totalorder %s3909_s14, %s3909_s14 }
  0x50   :  { %p3916_p10 = por %p3915_p9, %p3914_p8 }
  0x52   :  { %p3917_p11 = pnand %p3916_p10, %p3910_p7 }
  0x54   :  { %3920 = shalt.err (!%p3917_p11)
}
  0x55   :  { %72 = dma.hbm_to_vmem [thread:$0]  %s5283_s4, 64, %s70_s20, [#allocation9]  }
  0x56   :  { %s3984_s27 = smov [#allocation11]   ;;  %s3921_s17 = scalar_lea.hbm %s5284_s5, 2048 }
  0x57   :  { %s78_s3 = sshll.u32 %s3984_s27, 4  ;;  %p3922_p12 = scmp.ne.s32.totalorder %s5284_s5, %s3921_s17  ;;  %s79_s3 = int_to_ptr.vmem [resolvable:$true] %s78_s3 }
  0x58   :  { %p3925_p13 = scmp.lt.u32.totalorder %s3921_s17, %s5284_s5 }
  0x5a   :  { %p3927_p0 = pnand %p3925_p13, %p3922_p12 }
  0x5c   :  { %3930 = shalt.err (!%p3927_p0)
}
  0x5d   :  { %s3931_s24 = scalar_lea.vmem %s79_s3, 2048  ;;  %p3936_p2 = scmp.lt.s32.totalorder %s79_s3, %s79_s3 }
  0x5e   :  { %p3932_p1 = scmp.ne.s32.totalorder %s79_s3, %s3931_s24  ;;  %p3937_p3 = scmp.lt.s32.totalorder %s3931_s24, %s3931_s24 }
  0x60   :  { %p3938_p4 = por %p3937_p3, %p3936_p2 }
  0x62   :  { %p3939_p5 = pnand %p3938_p4, %p3932_p1 }
  0x64   :  { %3942 = shalt.err (!%p3939_p5)
}
  0x65   :  { %s3985_s4 = smov 128   ;;  %s3986_s20 = smov 8  }
  0x66   :  { %84 = dma.hbm_to_vmem [thread:$0]  %s5284_s5, 2048, %s79_s3, [#allocation12], %s3985_s4, %s3985_s4, %s3986_s20  }
  0x67   :  { %3965 = dma.done.wait [#allocation3], 128  }
  0x68   :  { %3966 = vsyncadd [#allocation3], 4294967168 }
  0x69   :  { %3967 = dma.done.wait [#allocation6], 12288  }
  0x6a   :  { %3968 = vsyncadd [#allocation6], 4294955008 }
  0x6b   :  { %3969 = dma.done.wait [#allocation9], 4160  }
  0x6c   :  { %3970 = vsyncadd [#allocation9], 4294963136 }
  0x6d   :  { %3971 = dma.done.wait [#allocation12], 2048  }
  0x6e   :  { %3972 = vsyncadd [#allocation12], 4294965248  ;;  %v5287_v0 = vmov 0.0   ;;  %v108_v1 = vld [vmem:[#allocation5 + $0x8] sm:$0xff]  ;;  %v110_v3 = vld [vmem:[#allocation5 + $0x18] sm:$0xff]  ;;  %vm3990_vm0 = vmmov 0  }
  0x6f   :  { %257 = vmatprep.mubr.f32.mxu0 %v5287_v0  ;;  %328 = vmatprep.mubr.f32.mxu1 %v5287_v0  ;;  %v112_v2 = vld [vmem:[#allocation5 + $0x28] sm:$0xff]  ;;  %v114_v5 = vld [vmem:[#allocation5 + $0x38] sm:$0xff]  ;;  %v107_v6 = vld [vmem:[#allocation5] sm:$0xff]  ;;  %s3991_s0 = smov [#allocation13]  }
  0x70   :  { %v3299_v4 = vpack.c.bf16 %v112_v2, %v108_v1  ;;  %v111_v7 = vld [vmem:[#allocation5 + $0x20] sm:$0xff]  ;;  %v3331_v8 = vpack.c.bf16 %v114_v5, %v110_v3  ;;  %v109_v10 = vld [vmem:[#allocation5 + $0x10] sm:$0xff]  ;;  %v116_v12 = vld [vmem:[#allocation5 + $0x48] sm:$0xff]  ;;  %s3171_s18 = sshll.u32 %s3991_s0, 4  ;;  %s3172_s18 = int_to_ptr.vmem [resolvable:$true] %s3171_s18 }
  0x71   :  { %v3301_v9 = vpack.c.bf16 %v111_v7, %v107_v6  ;;  %v113_v11 = vld [vmem:[#allocation5 + $0x30] sm:$0xff]  ;;  %v120_v14 = vld [vmem:[#allocation5 + $0x68] sm:$0xff]  ;;  %v118_v15 = vld [vmem:[#allocation5 + $0x58] sm:$0xff]  ;;  %s3943_s29 = scalar_lea.vmem %s3172_s18, 16  ;;  %s3947_s30 = scalar_lea.vmem %s3172_s18, 32 }
  0x72   :  { %3300 = vmatprep.subr.bf16.mxu0 %v3299_v4  ;;  %v3333_v13 = vpack.c.bf16 %v113_v11, %v109_v10  ;;  %v122_v16 = vld [vmem:[#allocation5 + $0x78] sm:$0xff]  ;;  %3332 = vmatprep.subr.bf16.mxu1 %v3331_v8  ;;  %v3303_v17 = vpack.c.bf16 %v120_v14, %v116_v12  ;;  %v115_v19 = vld [vmem:[#allocation5 + $0x40] sm:$0xff]  ;;  %v117_v21 = vld [vmem:[#allocation5 + $0x50] sm:$0xff]  ;;  %p3944_p6 = scmp.ne.s32.totalorder %s3172_s18, %s3943_s29  ;;  %p3948_p7 = scmp.lt.s32.totalorder %s3172_s18, %s3172_s18 }
  0x73   :  { %3302 = vmatpush1.bf16.msra.mxu0 %v3301_v9  ;;  %v3335_v18 = vpack.c.bf16 %v122_v16, %v118_v15  ;;  %v119_v20 = vld [vmem:[#allocation5 + $0x60] sm:$0xff]  ;;  %v121_v23 = vld [vmem:[#allocation5 + $0x70] sm:$0xff]  ;;  %v124_v24 = vld [vmem:[#allocation5 + $0x88] sm:$0xff]  ;;  %p3949_p8 = scmp.lt.s32.totalorder %s3947_s30, %s3943_s29 }
  0x74   :  { %3334 = vmatpush1.bf16.msra.mxu1 %v3333_v13  ;;  %v3305_v22 = vpack.c.bf16 %v119_v20, %v115_v19  ;;  %v128_v25 = vld [vmem:[#allocation5 + $0xa8] sm:$0xff]  ;;  %3304 = vmatprep.subr.bf16.mxu0 %v3303_v17  ;;  %v3337_v26 = vpack.c.bf16 %v121_v23, %v117_v21  ;;  %v126_v28 = vld [vmem:[#allocation5 + $0x98] sm:$0xff]  ;;  %v123_v30 = vld [vmem:[#allocation5 + $0x80] sm:$0xff] }
  0x75   :  { %3336 = vmatprep.subr.bf16.mxu1 %v3335_v18  ;;  %v3307_v27 = vpack.c.bf16 %v128_v25, %v124_v24  ;;  %v130_v29 = vld [vmem:[#allocation5 + $0xb8] sm:$0xff]  ;;  %v127_v32 = vld [vmem:[#allocation5 + $0xa0] sm:$0xff]  ;;  %v125_v33 = vld [vmem:[#allocation5 + $0x90] sm:$0xff]  ;;  %p3950_p9 = por %p3949_p8, %p3948_p7 }
  0x76   :  { %v3339_v31 = vpack.c.bf16 %v130_v29, %v126_v28  ;;  %v129_v34 = vld [vmem:[#allocation5 + $0xb0] sm:$0xff]  ;;  %v3309_v35 = vpack.c.bf16 %v127_v32, %v123_v30  ;;  %v132_v36 = vld [vmem:[#allocation5 + $0xc8] sm:$0xff]  ;;  %v134_v38 = vld [vmem:[#allocation5 + $0xd8] sm:$0xff] }
  0x77   :  { %3306 = vmatpush1.bf16.msra.mxu0 %v3305_v22  ;;  %v136_v37 = vld [vmem:[#allocation5 + $0xe8] sm:$0xff]  ;;  %v3341_v39 = vpack.c.bf16 %v129_v34, %v125_v33  ;;  %v138_v41 = vld [vmem:[#allocation5 + $0xf8] sm:$0xff]  ;;  %v131_v42 = vld [vmem:[#allocation5 + $0xc0] sm:$0xff]  ;;  %p3951_p10 = pnand %p3950_p9, %p3944_p6 }
  0x78   :  { %3338 = vmatpush1.bf16.msra.mxu1 %v3337_v26  ;;  %3308 = vmatprep.subr.bf16.mxu0 %v3307_v27  ;;  %v3311_v40 = vpack.c.bf16 %v136_v37, %v132_v36  ;;  %v135_v43 = vld [vmem:[#allocation5 + $0xe0] sm:$0xff]  ;;  %v3343_v44 = vpack.c.bf16 %v138_v41, %v134_v38  ;;  %v133_v45 = vld [vmem:[#allocation5 + $0xd0] sm:$0xff]  ;;  %v140_v47 = vld [vmem:[#allocation5 + $0x108] sm:$0xff] }
  0x79   :  { %3340 = vmatprep.subr.bf16.mxu1 %v3339_v31  ;;  %v137_v46 = vld [vmem:[#allocation5 + $0xf0] sm:$0xff]  ;;  %v144_v48 = vld [vmem:[#allocation5 + $0x128] sm:$0xff]  ;;  %v142_v49 = vld [vmem:[#allocation5 + $0x118] sm:$0xff]  ;;  %v3313_v51 = vpack.c.bf16 %v135_v43, %v131_v42 }
  0x7a   :  { %v146_v50 = vld [vmem:[#allocation5 + $0x138] sm:$0xff]  ;;  %v3345_v52 = vpack.c.bf16 %v137_v46, %v133_v45  ;;  %v3315_v53 = vpack.c.bf16 %v144_v48, %v140_v47  ;;  %v139_v54 = vld [vmem:[#allocation5 + $0x100] sm:$0xff]  ;;  %v141_v56 = vld [vmem:[#allocation5 + $0x110] sm:$0xff]  ;;  %v5288_v45 = vmov 0  }
  0x7b   :  { %3310 = vmatpush1.bf16.msra.mxu0 %v3309_v35  ;;  %v143_v55 = vld [vmem:[#allocation5 + $0x120] sm:$0xff]  ;;  %v3347_v57 = vpack.c.bf16 %v146_v50, %v142_v49  ;;  %v145_v58 = vld [vmem:[#allocation5 + $0x130] sm:$0xff]  ;;  %v148_v59 = vld [vmem:[#allocation5 + $0x148] sm:$0xff] }
  0x7c   :  { %3342 = vmatpush1.bf16.msra.mxu1 %v3341_v39  ;;  %3312 = vmatprep.subr.bf16.mxu0 %v3311_v40  ;;  %v152_v60 = vld [vmem:[#allocation5 + $0x168] sm:$0xff]  ;;  %v150_v61 = vld [vmem:[#allocation5 + $0x158] sm:$0xff]  ;;  %v3317_v63 = vpack.c.bf16 %v143_v55, %v139_v54  ;;  %v3349_v1 = vpack.c.bf16 %v145_v58, %v141_v56  ;;  %v147_v3 = vld [vmem:[#allocation5 + $0x140] sm:$0xff] }
  0x7d   :  { %3344 = vmatprep.subr.bf16.mxu1 %v3343_v44  ;;  %v154_v62 = vld [vmem:[#allocation5 + $0x178] sm:$0xff]  ;;  %v3319_v2 = vpack.c.bf16 %v152_v60, %v148_v59  ;;  %v151_v4 = vld [vmem:[#allocation5 + $0x160] sm:$0xff]  ;;  %v149_v5 = vld [vmem:[#allocation5 + $0x150] sm:$0xff] }
  0x7e   :  { %v3351_v6 = vpack.c.bf16 %v154_v62, %v150_v61  ;;  %v153_v7 = vld [vmem:[#allocation5 + $0x170] sm:$0xff]  ;;  %v156_v8 = vld [vmem:[#allocation5 + $0x188] sm:$0xff]  ;;  %v158_v10 = vld [vmem:[#allocation5 + $0x198] sm:$0xff]  ;;  %v3321_v12 = vpack.c.bf16 %v151_v4, %v147_v3 }
  0x7f   :  { %3314 = vmatpush1.bf16.msra.mxu0 %v3313_v51  ;;  %v160_v9 = vld [vmem:[#allocation5 + $0x1a8] sm:$0xff]  ;;  %v162_v11 = vld [vmem:[#allocation5 + $0x1b8] sm:$0xff]  ;;  %v155_v13 = vld [vmem:[#allocation5 + $0x180] sm:$0xff]  ;;  %v3353_v16 = vpack.c.bf16 %v153_v7, %v149_v5 }
  0x80   :  { %3346 = vmatpush1.bf16.msra.mxu1 %v3345_v52  ;;  %3316 = vmatprep.subr.bf16.mxu0 %v3315_v53  ;;  %v159_v14 = vld [vmem:[#allocation5 + $0x1a0] sm:$0xff]  ;;  %v157_v15 = vld [vmem:[#allocation5 + $0x190] sm:$0xff]  ;;  %v3323_v17 = vpack.c.bf16 %v160_v9, %v156_v8  ;;  %v164_v19 = vld [vmem:[#allocation5 + $0x1c8] sm:$0xff]  ;;  %v3355_v20 = vpack.c.bf16 %v162_v11, %v158_v10 }
  0x81   :  { %3348 = vmatprep.subr.bf16.mxu1 %v3347_v57  ;;  %v161_v18 = vld [vmem:[#allocation5 + $0x1b0] sm:$0xff]  ;;  %v168_v21 = vld [vmem:[#allocation5 + $0x1e8] sm:$0xff]  ;;  %v166_v22 = vld [vmem:[#allocation5 + $0x1d8] sm:$0xff]  ;;  %v3325_v24 = vpack.c.bf16 %v159_v14, %v155_v13 }
  0x82   :  { %v170_v23 = vld [vmem:[#allocation5 + $0x1f8] sm:$0xff]  ;;  %v163_v25 = vld [vmem:[#allocation5 + $0x1c0] sm:$0xff]  ;;  %v3357_v26 = vpack.c.bf16 %v161_v18, %v157_v15  ;;  %v3327_v27 = vpack.c.bf16 %v168_v21, %v164_v19  ;;  %v165_v30 = vld [vmem:[#allocation5 + $0x1d0] sm:$0xff] }
  0x83   :  { %3318 = vmatpush1.bf16.msra.mxu0 %v3317_v63  ;;  %v167_v28 = vld [vmem:[#allocation5 + $0x1e0] sm:$0xff]  ;;  %v3359_v29 = vpack.c.bf16 %v170_v23, %v166_v22  ;;  %v169_v31 = vld [vmem:[#allocation5 + $0x1f0] sm:$0xff]  ;;  %v4114_v35 = vld [vmem:[#allocation8 + $0xc] ss:$16 sps:$4 sm:$0xff]  }
  0x84   :  { %3350 = vmatpush1.bf16.msra.mxu1 %v3349_v1  ;;  %3320 = vmatprep.subr.bf16.mxu0 %v3319_v2  ;;  %v3329_v32 = vpack.c.bf16 %v167_v28, %v163_v25  ;;  %v3361_v33 = vpack.c.bf16 %v169_v31, %v165_v30  ;;  %v4112_v34 = vld [vmem:[#allocation8 + $0x4] ss:$16 sps:$4 sm:$0xff]   ;;  %5378 = vst [vmem:[#allocation19_spill] sm:$0xff] %v4114_v35  ;;  %v106_v36 = vld [vmem:[#allocation2] sm:$0xff]  ;;  %v4116_v37 = vld [vmem:[#allocation8] ss:$16 sps:$4 sm:$0xff]  }
  0x85   :  { %3352 = vmatprep.subr.bf16.mxu1 %v3351_v6  ;;  %5379 = vst [vmem:[#allocation20_spill] sm:$0xff] %v4116_v37  ;;  %v4118_v38 = vld [vmem:[#allocation8 + $0x8] ss:$16 sps:$4 sm:$0xff]   ;;  %v4121_v39 = vld [vmem:[#allocation8 + $0x24] ss:$16 sps:$4 sm:$0xff]  }
  0x86   :  { %5380 = vst [vmem:[#allocation21_spill] sm:$0xff] %v4118_v38  ;;  %5381 = vst [vmem:[#allocation22_spill] sm:$0xff] %v4121_v39  ;;  %v4124_v40 = vld [vmem:[#allocation8 + $0x2c] ss:$16 sps:$4 sm:$0xff]   ;;  %v4127_v41 = vld [vmem:[#allocation8 + $0x20] ss:$16 sps:$4 sm:$0xff]  }
  0x87   :  { %3322 = vmatpush1.bf16.msra.mxu0 %v3321_v12  ;;  %5382 = vst [vmem:[#allocation23_spill] sm:$0xff] %v4124_v40  ;;  %5383 = vst [vmem:[#allocation24_spill] sm:$0xff] %v4127_v41  ;;  %v4131_v42 = vld [vmem:[#allocation8 + $0x28] ss:$16 sps:$4 sm:$0xff]   ;;  %v4133_v43 = vld [vmem:[#allocation8 + $0x44] ss:$16 sps:$4 sm:$0xff]  }
  0x88   :  { %3354 = vmatpush1.bf16.msra.mxu1 %v3353_v16  ;;  %3324 = vmatprep.subr.bf16.mxu0 %v3323_v17  ;;  %5384 = vst [vmem:[#allocation25_spill] sm:$0xff] %v4131_v42  ;;  %5385 = vst [vmem:[#allocation26_spill] sm:$0xff] %v4133_v43  ;;  %v4136_v44 = vld [vmem:[#allocation8 + $0x4c] ss:$16 sps:$4 sm:$0xff]   ;;  %v4139_v46 = vld [vmem:[#allocation8 + $0x40] ss:$16 sps:$4 sm:$0xff]  }
  0x89   :  { %3356 = vmatprep.subr.bf16.mxu1 %v3355_v20  ;;  %5386 = vst [vmem:[#allocation27_spill] sm:$0xff] %v4136_v44  ;;  %5387 = vst [vmem:[#allocation28_spill] sm:$0xff] %v4139_v46  ;;  %v4143_v47 = vld [vmem:[#allocation8 + $0x48] ss:$16 sps:$4 sm:$0xff]   ;;  %v4147_v48 = vld [vmem:[#allocation8 + $0x64] ss:$16 sps:$4 sm:$0xff]  }
  0x8a   :  { %5388 = vst [vmem:[#allocation29_spill] sm:$0xff] %v4143_v47  ;;  %5389 = vst [vmem:[#allocation30_spill] sm:$0xff] %v4147_v48  ;;  %v4150_v49 = vld [vmem:[#allocation8 + $0x6c] ss:$16 sps:$4 sm:$0xff]   ;;  %v4153_v50 = vld [vmem:[#allocation8 + $0x60] ss:$16 sps:$4 sm:$0xff]  }
  0x8b   :  { %3326 = vmatpush1.bf16.msra.mxu0 %v3325_v24  ;;  %5390 = vst [vmem:[#allocation31_spill] sm:$0xff] %v4150_v49  ;;  %5391 = vst [vmem:[#allocation32_spill] sm:$0xff] %v4153_v50  ;;  %v4157_v51 = vld [vmem:[#allocation8 + $0x68] ss:$16 sps:$4 sm:$0xff]   ;;  %v4159_v52 = vld [vmem:[#allocation8 + $0x84] ss:$16 sps:$4 sm:$0xff]  }
  0x8c   :  { %3358 = vmatpush1.bf16.msra.mxu1 %v3357_v26  ;;  %3328 = vmatprep.subr.bf16.mxu0 %v3327_v27  ;;  %5392 = vst [vmem:[#allocation33_spill] sm:$0xff] %v4157_v51  ;;  %5393 = vst [vmem:[#allocation34_spill] sm:$0xff] %v4159_v52  ;;  %v4162_v53 = vld [vmem:[#allocation8 + $0x8c] ss:$16 sps:$4 sm:$0xff]   ;;  %v4164_v54 = vld [vmem:[#allocation8 + $0x80] ss:$16 sps:$4 sm:$0xff]  }
  0x8d   :  { %3360 = vmatprep.subr.bf16.mxu1 %v3359_v29  ;;  %5394 = vst [vmem:[#allocation35_spill] sm:$0xff] %v4162_v53  ;;  %5395 = vst [vmem:[#allocation36_spill] sm:$0xff] %v4164_v54  ;;  %v4167_v55 = vld [vmem:[#allocation8 + $0x88] ss:$16 sps:$4 sm:$0xff]   ;;  %v4171_v56 = vld [vmem:[#allocation8 + $0xa4] ss:$16 sps:$4 sm:$0xff]  }
  0x8e   :  { %5396 = vst [vmem:[#allocation37_spill] sm:$0xff] %v4167_v55  ;;  %5397 = vst [vmem:[#allocation38_spill] sm:$0xff] %v4171_v56  ;;  %v4174_v57 = vld [vmem:[#allocation8 + $0xac] ss:$16 sps:$4 sm:$0xff]   ;;  %v4177_v58 = vld [vmem:[#allocation8 + $0xa0] ss:$16 sps:$4 sm:$0xff]  }
  0x8f   :  { %3330 = vmatpush1.bf16.msra.mxu0 %v3329_v32  ;;  %5398 = vst [vmem:[#allocation39_spill] sm:$0xff] %v4174_v57  ;;  %5399 = vst [vmem:[#allocation40_spill] sm:$0xff] %v4177_v58  ;;  %v4181_v59 = vld [vmem:[#allocation8 + $0xa8] ss:$16 sps:$4 sm:$0xff]   ;;  %v4183_v60 = vld [vmem:[#allocation8 + $0xc4] ss:$16 sps:$4 sm:$0xff]  }
  0x90   :  { %3362 = vmatpush1.bf16.msra.mxu1 %v3361_v33  ;;  %559 = vmatprep.subr.bf16.mxu0 %v4112_v34  ;;  %5400 = vst [vmem:[#allocation41_spill] sm:$0xff] %v4181_v59  ;;  %5401 = vst [vmem:[#allocation42_spill] sm:$0xff] %v4183_v60  ;;  %v4186_v61 = vld [vmem:[#allocation8 + $0xcc] ss:$16 sps:$4 sm:$0xff]   ;;  %v4188_v62 = vld [vmem:[#allocation8 + $0xc0] ss:$16 sps:$4 sm:$0xff]  }
  0x91   :  { %600 = vmatprep.subr.bf16.mxu1 %v4114_v35  ;;  %5402 = vst [vmem:[#allocation43_spill] sm:$0xff] %v4186_v61  ;;  %5403 = vst [vmem:[#allocation44_spill] sm:$0xff] %v4188_v62  ;;  %v4191_v63 = vld [vmem:[#allocation8 + $0xc8] ss:$16 sps:$4 sm:$0xff]   ;;  %v4195_v1 = vld [vmem:[#allocation8 + $0xe4] ss:$16 sps:$4 sm:$0xff]  }
  0x92   :  { %258 = vmatmul.mubr.f32.vlgmr.msra.gmra.mrb[0].mxu0 %v106_v36  ;;  %5404 = vst [vmem:[#allocation45_spill] sm:$0xff] %v4191_v63  ;;  %5405 = vst [vmem:[#allocation46_spill] sm:$0xff] %v4195_v1  ;;  %v4198_v2 = vld [vmem:[#allocation8 + $0xec] ss:$16 sps:$4 sm:$0xff]   ;;  %v4201_v3 = vld [vmem:[#allocation8 + $0xe0] ss:$16 sps:$4 sm:$0xff]  }
  0x93   :  { %329 = vmatmul.mubr.f32.vlgmr.msra.gmra.mrb[0].mxu1 %v106_v36  ;;  %560 = vmatpush1.bf16.msra.mxu0 %v4116_v37  ;;  %5406 = vst [vmem:[#allocation47_spill] sm:$0xff] %v4198_v2  ;;  %5407 = vst [vmem:[#allocation48_spill] sm:$0xff] %v4201_v3  ;;  %v4205_v4 = vld [vmem:[#allocation8 + $0xe8] ss:$16 sps:$4 sm:$0xff]   ;;  %v4207_v5 = vld [vmem:[#allocation7 + $0x4] ss:$16 sps:$4 sm:$0xff]  }
  0x94   :  { %601 = vmatpush1.bf16.msra.mxu1 %v4118_v38  ;;  %561 = vmatprep.subr.bf16.mxu0 %v4121_v39  ;;  %5408 = vst [vmem:[#allocation49_spill] sm:$0xff] %v4205_v4  ;;  %v4210_v6 = vld [vmem:[#allocation7 + $0xc] ss:$16 sps:$4 sm:$0xff]   ;;  %v4213_v7 = vld [vmem:[#allocation7] ss:$16 sps:$4 sm:$0xff]  }
  0x95   :  { %602 = vmatprep.subr.bf16.mxu1 %v4124_v40  ;;  %591 = vmatprep.mubr.bf16.mxu0 %v5288_v45  ;;  %v4217_v8 = vld [vmem:[#allocation7 + $0x8] ss:$16 sps:$4 sm:$0xff]   ;;  %v4219_v9 = vld [vmem:[#allocation7 + $0x24] ss:$16 sps:$4 sm:$0xff]   ;;  %v4222_v10 = vld [vmem:[#allocation7 + $0x2c] ss:$16 sps:$4 sm:$0xff]  }
  0x96   :  { %632 = vmatprep.mubr.bf16.mxu1 %v5288_v45  ;;  %v4227_v11 = vld [vmem:[#allocation7 + $0x20] ss:$16 sps:$4 sm:$0xff]   ;;  %v4231_v12 = vld [vmem:[#allocation7 + $0x28] ss:$16 sps:$4 sm:$0xff]   ;;  %v4233_v13 = vld [vmem:[#allocation7 + $0x44] ss:$16 sps:$4 sm:$0xff]  }
  0x97   :  { %562 = vmatpush1.bf16.msra.mxu0 %v4127_v41  ;;  %v4236_v14 = vld [vmem:[#allocation7 + $0x4c] ss:$16 sps:$4 sm:$0xff]   ;;  %v4241_v15 = vld [vmem:[#allocation7 + $0x40] ss:$16 sps:$4 sm:$0xff]   ;;  %v4245_v16 = vld [vmem:[#allocation7 + $0x48] ss:$16 sps:$4 sm:$0xff]  }
  0x98   :  { %603 = vmatpush1.bf16.msra.mxu1 %v4131_v42  ;;  %563 = vmatprep.subr.bf16.mxu0 %v4133_v43  ;;  %v4247_v17 = vld [vmem:[#allocation7 + $0x64] ss:$16 sps:$4 sm:$0xff]   ;;  %v4250_v18 = vld [vmem:[#allocation7 + $0x6c] ss:$16 sps:$4 sm:$0xff]   ;;  %v4253_v19 = vld [vmem:[#allocation7 + $0x60] ss:$16 sps:$4 sm:$0xff]  }
  0x99   :  { %604 = vmatprep.subr.bf16.mxu1 %v4136_v44  ;;  %v4257_v20 = vld [vmem:[#allocation7 + $0x68] ss:$16 sps:$4 sm:$0xff]   ;;  %v4259_v21 = vld [vmem:[#allocation7 + $0x84] ss:$16 sps:$4 sm:$0xff]   ;;  %v4262_v22 = vld [vmem:[#allocation7 + $0x8c] ss:$16 sps:$4 sm:$0xff]  }
  0x9a   :  { %v4265_v23 = vld [vmem:[#allocation7 + $0x80] ss:$16 sps:$4 sm:$0xff]   ;;  %v4269_v24 = vld [vmem:[#allocation7 + $0x88] ss:$16 sps:$4 sm:$0xff]   ;;  %v4271_v25 = vld [vmem:[#allocation7 + $0xa4] ss:$16 sps:$4 sm:$0xff]  }
  0x9b   :  { %564 = vmatpush1.bf16.msra.mxu0 %v4139_v46  ;;  %v4274_v26 = vld [vmem:[#allocation7 + $0xac] ss:$16 sps:$4 sm:$0xff]   ;;  %v4277_v27 = vld [vmem:[#allocation7 + $0xa0] ss:$16 sps:$4 sm:$0xff]   ;;  %v4281_v28 = vld [vmem:[#allocation7 + $0xa8] ss:$16 sps:$4 sm:$0xff]  }
  0x9c   :  { %605 = vmatpush1.bf16.msra.mxu1 %v4143_v47  ;;  %565 = vmatprep.subr.bf16.mxu0 %v4147_v48  ;;  %v4283_v29 = vld [vmem:[#allocation7 + $0xc4] ss:$16 sps:$4 sm:$0xff]   ;;  %v4286_v30 = vld [vmem:[#allocation7 + $0xcc] ss:$16 sps:$4 sm:$0xff]   ;;  %v4289_v31 = vld [vmem:[#allocation7 + $0xc0] ss:$16 sps:$4 sm:$0xff]  }
  0x9d   :  { %606 = vmatprep.subr.bf16.mxu1 %v4150_v49  ;;  %v4293_v32 = vld [vmem:[#allocation7 + $0xc8] ss:$16 sps:$4 sm:$0xff]   ;;  %v4295_v33 = vld [vmem:[#allocation7 + $0xe4] ss:$16 sps:$4 sm:$0xff]   ;;  %v4298_v36 = vld [vmem:[#allocation7 + $0xec] ss:$16 sps:$4 sm:$0xff]  }
  0x9e   :  { %v4301_v0 = vld [vmem:[#allocation7 + $0xe0] ss:$16 sps:$4 sm:$0xff]  }
  0x9f   :  { %566 = vmatpush1.bf16.msra.mxu0 %v4153_v50 }
  0xa0   :  { %607 = vmatpush1.bf16.msra.mxu1 %v4157_v51  ;;  %567 = vmatprep.subr.bf16.mxu0 %v4159_v52 }
  0xa1   :  { %608 = vmatprep.subr.bf16.mxu1 %v4162_v53 }
  0xa3   :  { %568 = vmatpush1.bf16.msra.mxu0 %v4164_v54 }
  0xa4   :  { %609 = vmatpush1.bf16.msra.mxu1 %v4167_v55  ;;  %569 = vmatprep.subr.bf16.mxu0 %v4171_v56 }
  0xa5   :  { %610 = vmatprep.subr.bf16.mxu1 %v4174_v57 }
  0xa7   :  { %570 = vmatpush1.bf16.msra.mxu0 %v4177_v58 }
  0xa8   :  { %611 = vmatpush1.bf16.msra.mxu1 %v4181_v59  ;;  %571 = vmatprep.subr.bf16.mxu0 %v4183_v60 }
  0xa9   :  { %612 = vmatprep.subr.bf16.mxu1 %v4186_v61 }
  0xab   :  { %572 = vmatpush1.bf16.msra.mxu0 %v4188_v62 }
  0xac   :  { %613 = vmatpush1.bf16.msra.mxu1 %v4191_v63  ;;  %573 = vmatprep.subr.bf16.mxu0 %v4195_v1 }
  0xad   :  { %614 = vmatprep.subr.bf16.mxu1 %v4198_v2 }
  0xaf   :  { %574 = vmatpush1.bf16.msra.mxu0 %v4201_v3 }
  0xb0   :  { %615 = vmatpush1.bf16.msra.mxu1 %v4205_v4  ;;  %801 = vmatprep.subr.bf16.mxu0 %v4207_v5  ;;  %v5409_v4 = vmov 0  }
  0xb1   :  { %842 = vmatprep.subr.bf16.mxu1 %v4210_v6 }
  0xb2   :  { %592 = vmatmul.mubr.bf16.vlgmr.msra.gmra.mrb[4].mxu0 %v5288_v45 }
  0xb3   :  { %633 = vmatmul.mubr.bf16.vlgmr.msra.gmra.mrb[4].mxu1 %v5288_v45  ;;  %802 = vmatpush1.bf16.msra.mxu0 %v4213_v7 }
  0xb4   :  { %843 = vmatpush1.bf16.msra.mxu1 %v4217_v8  ;;  %803 = vmatprep.subr.bf16.mxu0 %v4219_v9 }
  0xb5   :  { %844 = vmatprep.subr.bf16.mxu1 %v4222_v10  ;;  %833 = vmatprep.mubr.bf16.mxu0 %v5288_v45 }
  0xb6   :  { %874 = vmatprep.mubr.bf16.mxu1 %v5288_v45  ;;  %v4305_v45 = vld [vmem:[#allocation7 + $0xe8] ss:$16 sps:$4 sm:$0xff]  }
  0xb7   :  { %804 = vmatpush1.bf16.msra.mxu0 %v4227_v11 }
  0xb8   :  { %845 = vmatpush1.bf16.msra.mxu1 %v4231_v12  ;;  %805 = vmatprep.subr.bf16.mxu0 %v4233_v13 }
  0xb9   :  { %846 = vmatprep.subr.bf16.mxu1 %v4236_v14 }
  0xbb   :  { %806 = vmatpush1.bf16.msra.mxu0 %v4241_v15 }
  0xbc   :  { %847 = vmatpush1.bf16.msra.mxu1 %v4245_v16  ;;  %807 = vmatprep.subr.bf16.mxu0 %v4247_v17 }
  0xbd   :  { %848 = vmatprep.subr.bf16.mxu1 %v4250_v18 }
  0xbf   :  { %808 = vmatpush1.bf16.msra.mxu0 %v4253_v19 }
  0xc0   :  { %849 = vmatpush1.bf16.msra.mxu1 %v4257_v20  ;;  %809 = vmatprep.subr.bf16.mxu0 %v4259_v21 }
  0xc1   :  { %850 = vmatprep.subr.bf16.mxu1 %v4262_v22 }
  0xc3   :  { %810 = vmatpush1.bf16.msra.mxu0 %v4265_v23 }
  0xc4   :  { %851 = vmatpush1.bf16.msra.mxu1 %v4269_v24  ;;  %811 = vmatprep.subr.bf16.mxu0 %v4271_v25 }
  0xc5   :  { %852 = vmatprep.subr.bf16.mxu1 %v4274_v26 }
  0xc7   :  { %812 = vmatpush1.bf16.msra.mxu0 %v4277_v27 }
  0xc8   :  { %853 = vmatpush1.bf16.msra.mxu1 %v4281_v28  ;;  %813 = vmatprep.subr.bf16.mxu0 %v4283_v29 }
  0xc9   :  { %854 = vmatprep.subr.bf16.mxu1 %v4286_v30 }
  0xcb   :  { %814 = vmatpush1.bf16.msra.mxu0 %v4289_v31 }
  0xcc   :  { %855 = vmatpush1.bf16.msra.mxu1 %v4293_v32  ;;  %815 = vmatprep.subr.bf16.mxu0 %v4295_v33 }
  0xcd   :  { %856 = vmatprep.subr.bf16.mxu1 %v4298_v36 }
  0xcf   :  { %816 = vmatpush1.bf16.msra.mxu0 %v4301_v0 }
  0xd0   :  { %857 = vmatpush1.bf16.msra.mxu1 %v4305_v45  ;;  %883 = vmatprep.subr.bf16.mxu0 %v4207_v5 }
  0xd1   :  { %924 = vmatprep.subr.bf16.mxu1 %v4210_v6 }
  0xd2   :  { %834 = vmatmul.mubr.bf16.vlgmr.msra.gmra.mrb[8].mxu0 %v5409_v4 }
  0xd3   :  { %875 = vmatmul.mubr.bf16.vlgmr.msra.gmra.mrb[8].mxu1 %v5409_v4  ;;  %884 = vmatpush1.bf16.msra.mxu0 %v4213_v7 }
  0xd4   :  { %925 = vmatpush1.bf16.msra.mxu1 %v4217_v8  ;;  %885 = vmatprep.subr.bf16.mxu0 %v4219_v9 }
  0xd5   :  { %926 = vmatprep.subr.bf16.mxu1 %v4222_v10  ;;  %915 = vmatprep.mubr.bf16.mxu0 %v5409_v4 }
  0xd6   :  { %956 = vmatprep.mubr.bf16.mxu1 %v5409_v4 }
  0xd7   :  { %886 = vmatpush1.bf16.msra.mxu0 %v4227_v11 }
  0xd8   :  { %927 = vmatpush1.bf16.msra.mxu1 %v4231_v12  ;;  %887 = vmatprep.subr.bf16.mxu0 %v4233_v13 }
  0xd9   :  { %928 = vmatprep.subr.bf16.mxu1 %v4236_v14 }
  0xdb   :  { %888 = vmatpush1.bf16.msra.mxu0 %v4241_v15 }
  0xdc   :  { %929 = vmatpush1.bf16.msra.mxu1 %v4245_v16  ;;  %889 = vmatprep.subr.bf16.mxu0 %v4247_v17 }
  0xdd   :  { %930 = vmatprep.subr.bf16.mxu1 %v4250_v18 }
  0xdf   :  { %890 = vmatpush1.bf16.msra.mxu0 %v4253_v19 }
  0xe0   :  { %931 = vmatpush1.bf16.msra.mxu1 %v4257_v20  ;;  %891 = vmatprep.subr.bf16.mxu0 %v4259_v21 }
  0xe1   :  { %932 = vmatprep.subr.bf16.mxu1 %v4262_v22 }
  0xe3   :  { %892 = vmatpush1.bf16.msra.mxu0 %v4265_v23 }
  0xe4   :  { %933 = vmatpush1.bf16.msra.mxu1 %v4269_v24  ;;  %893 = vmatprep.subr.bf16.mxu0 %v4271_v25 }
  0xe5   :  { %934 = vmatprep.subr.bf16.mxu1 %v4274_v26 }
  0xe7   :  { %894 = vmatpush1.bf16.msra.mxu0 %v4277_v27 }
  0xe8   :  { %935 = vmatpush1.bf16.msra.mxu1 %v4281_v28  ;;  %895 = vmatprep.subr.bf16.mxu0 %v4283_v29 }
  0xe9   :  { %936 = vmatprep.subr.bf16.mxu1 %v4286_v30 }
  0xeb   :  { %896 = vmatpush1.bf16.msra.mxu0 %v4289_v31 }
  0xec   :  { %937 = vmatpush1.bf16.msra.mxu1 %v4293_v32  ;;  %897 = vmatprep.subr.bf16.mxu0 %v4295_v33 }
  0xed   :  { %938 = vmatprep.subr.bf16.mxu1 %v4298_v36 }
  0xef   :  { %898 = vmatpush1.bf16.msra.mxu0 %v4301_v0 }
  0xf0   :  { %939 = vmatpush1.bf16.msra.mxu1 %v4305_v45  ;;  %995 = vmatprep.subr.bf16.mxu0 %v4112_v34 }
  0xf1   :  { %1036 = vmatprep.subr.bf16.mxu1 %v4114_v35 }
  0xf2   :  { %916 = vmatmul.mubr.bf16.vlgmr.msra.gmra.mrb[12].mxu0 %v5409_v4 }
  0xf3   :  { %957 = vmatmul.mubr.bf16.vlgmr.msra.gmra.mrb[12].mxu1 %v5409_v4  ;;  %996 = vmatpush1.bf16.msra.mxu0 %v4116_v37 }
  0xf4   :  { %1037 = vmatpush1.bf16.msra.mxu1 %v4118_v38  ;;  %997 = vmatprep.subr.bf16.mxu0 %v4121_v39 }
  0xf5   :  { %1038 = vmatprep.subr.bf16.mxu1 %v4124_v40  ;;  %1027 = vmatprep.mubr.bf16.mxu0 %v5409_v4 }
  0xf6   :  { %1068 = vmatprep.mubr.bf16.mxu1 %v5409_v4 }
  0xf7   :  { %998 = vmatpush1.bf16.msra.mxu0 %v4127_v41  ;;  %v173_v41 = vlaneseq }
  0xf8   :  { %1039 = vmatpush1.bf16.msra.mxu1 %v4131_v42  ;;  %999 = vmatprep.subr.bf16.mxu0 %v4133_v43 }
  0xf9   :  { %1040 = vmatprep.subr.bf16.mxu1 %v4136_v44  ;;  %v174_v40 = vshrl.u32 %v173_v41, 7 }
  0xfb   :  { %1000 = vmatpush1.bf16.msra.mxu0 %v4139_v46  ;;  %v175_v39 = vsub.s32 0, %v174_v40  ;;  %v179_v38 = vsub.s32 1, %v174_v40 }
  0xfc   :  { %1041 = vmatpush1.bf16.msra.mxu1 %v4143_v47  ;;  %1001 = vmatprep.subr.bf16.mxu0 %v4147_v48 }
  0xfd   :  { %1042 = vmatprep.subr.bf16.mxu1 %v4150_v49 }
  0xff   :  { %1002 = vmatpush1.bf16.msra.mxu0 %v4153_v50 }
 0x100   :  { %1043 = vmatpush1.bf16.msra.mxu1 %v4157_v51  ;;  %1003 = vmatprep.subr.bf16.mxu0 %v4159_v52 }
 0x101   :  { %1044 = vmatprep.subr.bf16.mxu1 %v4162_v53 }
 0x103   :  { %1004 = vmatpush1.bf16.msra.mxu0 %v4164_v54 }
 0x104   :  { %1045 = vmatpush1.bf16.msra.mxu1 %v4167_v55  ;;  %1005 = vmatprep.subr.bf16.mxu0 %v4171_v56  ;;  %v5410_v56 = vld [vmem:[#allocation49_spill] sm:$0xff] }
 0x105   :  { %1046 = vmatprep.subr.bf16.mxu1 %v4174_v57 }
 0x107   :  { %1006 = vmatpush1.bf16.msra.mxu0 %v4177_v58 }
 0x108   :  { %1047 = vmatpush1.bf16.msra.mxu1 %v4181_v59  ;;  %1007 = vmatprep.subr.bf16.mxu0 %v4183_v60 }
 0x109   :  { %1048 = vmatprep.subr.bf16.mxu1 %v4186_v61 }
 0x10b   :  { %1008 = vmatpush1.bf16.msra.mxu0 %v4188_v62 }
 0x10c   :  { %1049 = vmatpush1.bf16.msra.mxu1 %v4191_v63  ;;  %1009 = vmatprep.subr.bf16.mxu0 %v4195_v1 }
 0x10d   :  { %1050 = vmatprep.subr.bf16.mxu1 %v4198_v2 }
 0x10f   :  { %1010 = vmatpush1.bf16.msra.mxu0 %v4201_v3 }
 0x110   :  { %1051 = vmatpush1.bf16.msra.mxu1 %v5410_v56  ;;  %1077 = vmatprep.subr.bf16.mxu0 %v4207_v5 }
 0x111   :  { %1118 = vmatprep.subr.bf16.mxu1 %v4210_v6 }
 0x165   :  { %v259_v59 = vpop.f32.mrb[0].mxu0 }
 0x166   :  { %v261_v60 = vpop.f32.mrb[1].mxu0  ;;  %v330_v58 = vpop.f32.mrb[0].mxu1 }
 0x167   :  { %v332_v61 = vpop.f32.mrb[1].mxu1 }
 0x185   :  { %v593_v57 = vpop.f32.mrb[4].mxu0 }
 0x186   :  { %v595_v62 = vpop.f32.mrb[5].mxu0  ;;  %v634_v55 = vpop.f32.mrb[4].mxu1 }
 0x187   :  { %v597_v63 = vpop.f32.mrb[6].mxu0  ;;  %v636_v54 = vpop.f32.mrb[5].mxu1 }
 0x188   :  { %v598_v1 = vpop.f32.mrb[7].mxu0  ;;  %v638_v53 = vpop.f32.mrb[6].mxu1  ;;  %v171_v63 = vld [vmem:[#allocation10] sm:$0xf] }
 0x189   :  { %v639_v2 = vpop.f32.mrb[7].mxu1  ;;  %v176_v1 = vrot.slane %v171_v63, %v175_v39  ;;  %v187_v53 = vsub.s32 3, %v174_v40 }
 0x18a   :  { %v180_v2 = vrot.slane %v171_v63, %v179_v38 }
 0x1a5   :  { %v835_v52 = vpop.f32.mrb[8].mxu0 }
 0x1a6   :  { %v836_v3 = vadd.f32 %v835_v52, %v593_v57  ;;  %v876_v51 = vpop.f32.mrb[8].mxu1  ;;  %v837_v56 = vpop.f32.mrb[9].mxu0  ;;  %v4384_v52 = vadd.f32 %v259_v59, %v176_v1  ;;  %v188_v57 = vrot.slane %v171_v63, %v187_v53 }
 0x1a7   :  { %v877_v50 = vadd.f32 %v876_v51, %v634_v55  ;;  %v838_v49 = vadd.f32 %v837_v56, %v595_v62  ;;  %v878_v48 = vpop.f32.mrb[9].mxu1  ;;  %v839_v47 = vpop.f32.mrb[10].mxu0 }
 0x1a8   :  { %v879_v46 = vadd.f32 %v878_v48, %v636_v54  ;;  %v840_v44 = vpop.f32.mrb[11].mxu0  ;;  %v880_v43 = vpop.f32.mrb[10].mxu1  ;;  %v4386_v47 = vadd.f32 %v261_v60, %v180_v2  ;;  %v4390_v1 = vadd.f32 %v332_v61, %v188_v57 }
 0x1a9   :  { %v881_v42 = vpop.f32.mrb[11].mxu1  ;;  %v183_v44 = vsub.s32 2, %v174_v40 }
 0x1c5   :  { %v917_v37 = vpop.f32.mrb[12].mxu0 }
 0x1c6   :  { %v965_v51 = vadd.f32 %v917_v37, %v836_v3  ;;  %v958_v55 = vpop.f32.mrb[12].mxu1  ;;  %v919_v56 = vpop.f32.mrb[13].mxu0  ;;  %v184_v3 = vrot.slane %v171_v63, %v183_v44 }
 0x1c7   :  { %v967_v43 = vadd.f32 %v958_v55, %v877_v50  ;;  %v966_v42 = vadd.f32 %v919_v56, %v838_v49  ;;  %v960_v48 = vpop.f32.mrb[13].mxu1  ;;  %v921_v41 = vpop.f32.mrb[14].mxu0 }
 0x1c8   :  { %v969_v54 = vadd.f32 %v965_v51, %v4384_v52  ;;  %v968_v62 = vadd.f32 %v960_v48, %v879_v46  ;;  %v922_v39 = vpop.f32.mrb[15].mxu0  ;;  %v962_v35 = vpop.f32.mrb[14].mxu1  ;;  %v4393_v49 = vadd.f32 %v330_v58, %v184_v3  ;;  %v5413_v3 = vld [vmem:[#allocation21_spill] sm:$0xff] }
 0x1c9   :  { %v970_v38 = vadd.f32 %v966_v42, %v4386_v47  ;;  %v963_v59 = vpop.f32.mrb[15].mxu1 }
 0x1ca   :  { %v973_v37 = vmul.f32 0.5, %v969_v54  ;;  %v972_v40 = vadd.f32 %v968_v62, %v4390_v1  ;;  %v971_v50 = vadd.f32 %v967_v43, %v4393_v49  ;;  %v5411_v59 = vld [vmem:[#allocation19_spill] sm:$0xff] }
 0x1cb   :  { %v974_v53 = vmul.f32 0.5, %v970_v38 }
 0x1cc   :  { %3612 = vtanh.f32 %v973_v37  ;;  %v975_v46 = vmul.f32 0.5, %v971_v50  ;;  %v5412_v37 = vld [vmem:[#allocation20_spill] sm:$0xff] }
 0x1cd   :  { %3614 = vtanh.f32 %v974_v53  ;;  %v5414_v53 = vld [vmem:[#allocation22_spill] sm:$0xff]  ;;  %v5416_v50 = vld [vmem:[#allocation24_spill] sm:$0xff] }
 0x1ce   :  { %3616 = vtanh.f32 %v972_v40  ;;  %v5415_v40 = vld [vmem:[#allocation23_spill] sm:$0xff] }
 0x1cf   :  { %3618 = vtanh.f32 %v975_v46  ;;  %v5417_v46 = vld [vmem:[#allocation25_spill] sm:$0xff] }
 0x1d6   :  { %v3613_v60 = vpop.eup %3612 }
 0x1d7   :  { %v979_v35 = vmul.f32 0.5, %v3613_v60  ;;  %v3615_v2 = vpop.eup %3614  ;;  %v5419_v60 = vld [vmem:[#allocation27_spill] sm:$0xff] }
 0x1d8   :  { %v980_v61 = vmul.f32 0.5, %v3615_v2  ;;  %v3617_v57 = vpop.eup %3616  ;;  %v5421_v2 = vld [vmem:[#allocation29_spill] sm:$0xff] }
 0x1d9   :  { %v982_v51 = vadd.f32 0.5, %v979_v35  ;;  %v3619_v58 = vpop.eup %3618  ;;  %v5420_v35 = vld [vmem:[#allocation28_spill] sm:$0xff] }
 0x1da   :  { %v983_v55 = vadd.f32 0.5, %v980_v61  ;;  %v981_v42 = vmul.f32 0.5, %v3619_v58  ;;  %v5423_v61 = vld [vmem:[#allocation31_spill] sm:$0xff]  ;;  %v5428_v58 = vld [vmem:[#allocation36_spill] sm:$0xff] }
 0x1db   :  { %v987_v63 = vmul.f32 %v3617_v57, %v982_v51  ;;  %v5422_v51 = vld [vmem:[#allocation30_spill] sm:$0xff]  ;;  %v5424_v57 = vld [vmem:[#allocation32_spill] sm:$0xff] }
 0x1dc   :  { %v986_v56 = vmul.f32 0.0, %v983_v55  ;;  %v984_v48 = vadd.f32 0.5, %v981_v42  ;;  %v5425_v55 = vld [vmem:[#allocation33_spill] sm:$0xff] }
 0x1dd   :  { %v5429_v42 = vld [vmem:[#allocation37_spill] sm:$0xff] }
 0x1de   :  { %v4396_v44 = vadd.f32 %v987_v63, %v986_v56  ;;  %v5426_v63 = vld [vmem:[#allocation34_spill] sm:$0xff]  ;;  %v5427_v56 = vld [vmem:[#allocation35_spill] sm:$0xff] }
 0x1e0   :  { %3620 = vtanh.f32 %v4396_v44 }
 0x1ea   :  { %v3621_v41 = vpop.eup %3620 }
 0x1eb   :  { %v4399_v43 = vmul.f32 %v3621_v41, %v984_v48  ;;  %v5430_v48 = vld [vmem:[#allocation38_spill] sm:$0xff]  ;;  %v5431_v41 = vld [vmem:[#allocation39_spill] sm:$0xff] }
 0x1ed   :  { %v4403_v54 = vpack.c.bf16 %v4399_v43, %v4399_v43 }
 0x1ef   :  { %1028 = vmatmul.mubr.bf16.vlgmr.msra.gmra.mrb[16].mxu0 %v4403_v54  ;;  %1069 = vmatmul.mubr.bf16.vlgmr.msra.gmra.mrb[16].mxu1 %v4403_v54  ;;  %v992_v62 = vunpack.c.l.bf16 %v4403_v54 }
 0x1f0   :  { %1078 = vmatpush1.bf16.msra.mxu0 %v4213_v7  ;;  %1119 = vmatpush1.bf16.msra.mxu1 %v4217_v8 }
 0x1f1   :  { %1079 = vmatprep.subr.bf16.mxu0 %v4219_v9  ;;  %1120 = vmatprep.subr.bf16.mxu1 %v4222_v10  ;;  %v993_v39 = vsub.f32 %v4399_v43, %v992_v62  ;;  %v5432_v43 = vld [vmem:[#allocation40_spill] sm:$0xff]  ;;  %v5434_v62 = vld [vmem:[#allocation42_spill] sm:$0xff] }
 0x1f2   :  { %1109 = vmatprep.mubr.bf16.mxu0 %v5409_v4  ;;  %1150 = vmatprep.mubr.bf16.mxu1 %v5409_v4 }
 0x1f3   :  { %v994_v38 = vpack.c.bf16 %v993_v39, %v993_v39  ;;  %v5435_v39 = vld [vmem:[#allocation43_spill] sm:$0xff] }
 0x1f4   :  { %1080 = vmatpush1.bf16.msra.mxu0 %v4227_v11  ;;  %1121 = vmatpush1.bf16.msra.mxu1 %v4231_v12 }
 0x1f5   :  { %1081 = vmatprep.subr.bf16.mxu0 %v4233_v13  ;;  %1122 = vmatprep.subr.bf16.mxu1 %v4236_v14 }
 0x1f8   :  { %1082 = vmatpush1.bf16.msra.mxu0 %v4241_v15  ;;  %1123 = vmatpush1.bf16.msra.mxu1 %v4245_v16 }
 0x1f9   :  { %1083 = vmatprep.subr.bf16.mxu0 %v4247_v17  ;;  %1124 = vmatprep.subr.bf16.mxu1 %v4250_v18 }
 0x1fc   :  { %1084 = vmatpush1.bf16.msra.mxu0 %v4253_v19  ;;  %1125 = vmatpush1.bf16.msra.mxu1 %v4257_v20 }
 0x1fd   :  { %1085 = vmatprep.subr.bf16.mxu0 %v4259_v21  ;;  %1126 = vmatprep.subr.bf16.mxu1 %v4262_v22 }
 0x200   :  { %1086 = vmatpush1.bf16.msra.mxu0 %v4265_v23  ;;  %1127 = vmatpush1.bf16.msra.mxu1 %v4269_v24 }
 0x201   :  { %1087 = vmatprep.subr.bf16.mxu0 %v4271_v25  ;;  %1128 = vmatprep.subr.bf16.mxu1 %v4274_v26 }
 0x204   :  { %1088 = vmatpush1.bf16.msra.mxu0 %v4277_v27  ;;  %1129 = vmatpush1.bf16.msra.mxu1 %v4281_v28 }
 0x205   :  { %1089 = vmatprep.subr.bf16.mxu0 %v4283_v29  ;;  %1130 = vmatprep.subr.bf16.mxu1 %v4286_v30 }
 0x208   :  { %1090 = vmatpush1.bf16.msra.mxu0 %v4289_v31  ;;  %1131 = vmatpush1.bf16.msra.mxu1 %v4293_v32 }
 0x209   :  { %1091 = vmatprep.subr.bf16.mxu0 %v4295_v33  ;;  %1132 = vmatprep.subr.bf16.mxu1 %v4298_v36 }
 0x20c   :  { %1092 = vmatpush1.bf16.msra.mxu0 %v4301_v0  ;;  %1133 = vmatpush1.bf16.msra.mxu1 %v4305_v45 }
 0x20d   :  { %1159 = vmatprep.subr.bf16.mxu0 %v4207_v5  ;;  %1200 = vmatprep.subr.bf16.mxu1 %v4210_v6 }
 0x20f   :  { %1110 = vmatmul.mubr.bf16.vlgmr.msra.gmra.mrb[16].mxu0 %v4403_v54  ;;  %1151 = vmatmul.mubr.bf16.vlgmr.msra.gmra.mrb[16].mxu1 %v4403_v54  ;;  %v5433_v54 = vld [vmem:[#allocation41_spill] sm:$0xff] }
 0x210   :  { %1160 = vmatpush1.bf16.msra.mxu0 %v4213_v7  ;;  %1201 = vmatpush1.bf16.msra.mxu1 %v4217_v8 }
 0x211   :  { %1161 = vmatprep.subr.bf16.mxu0 %v4219_v9  ;;  %1202 = vmatprep.subr.bf16.mxu1 %v4222_v10 }
 0x212   :  { %1191 = vmatprep.mubr.bf16.mxu0 %v5409_v4  ;;  %1232 = vmatprep.mubr.bf16.mxu1 %v5409_v4 }
 0x214   :  { %1162 = vmatpush1.bf16.msra.mxu0 %v4227_v11  ;;  %1203 = vmatpush1.bf16.msra.mxu1 %v4231_v12 }
 0x215   :  { %1163 = vmatprep.subr.bf16.mxu0 %v4233_v13  ;;  %1204 = vmatprep.subr.bf16.mxu1 %v4236_v14 }
 0x218   :  { %1164 = vmatpush1.bf16.msra.mxu0 %v4241_v15  ;;  %1205 = vmatpush1.bf16.msra.mxu1 %v4245_v16 }
 0x219   :  { %1165 = vmatprep.subr.bf16.mxu0 %v4247_v17  ;;  %1206 = vmatprep.subr.bf16.mxu1 %v4250_v18 }
 0x21c   :  { %1166 = vmatpush1.bf16.msra.mxu0 %v4253_v19  ;;  %1207 = vmatpush1.bf16.msra.mxu1 %v4257_v20 }
 0x21d   :  { %1167 = vmatprep.subr.bf16.mxu0 %v4259_v21  ;;  %1208 = vmatprep.subr.bf16.mxu1 %v4262_v22 }
 0x220   :  { %1168 = vmatpush1.bf16.msra.mxu0 %v4265_v23  ;;  %1209 = vmatpush1.bf16.msra.mxu1 %v4269_v24 }
 0x221   :  { %1169 = vmatprep.subr.bf16.mxu0 %v4271_v25  ;;  %1210 = vmatprep.subr.bf16.mxu1 %v4274_v26 }
 0x224   :  { %1170 = vmatpush1.bf16.msra.mxu0 %v4277_v27  ;;  %1211 = vmatpush1.bf16.msra.mxu1 %v4281_v28 }
 0x225   :  { %1171 = vmatprep.subr.bf16.mxu0 %v4283_v29  ;;  %1212 = vmatprep.subr.bf16.mxu1 %v4286_v30 }
 0x228   :  { %1172 = vmatpush1.bf16.msra.mxu0 %v4289_v31  ;;  %1213 = vmatpush1.bf16.msra.mxu1 %v4293_v32 }
 0x229   :  { %1173 = vmatprep.subr.bf16.mxu0 %v4295_v33  ;;  %1214 = vmatprep.subr.bf16.mxu1 %v4298_v36 }
 0x22c   :  { %1174 = vmatpush1.bf16.msra.mxu0 %v4301_v0  ;;  %1215 = vmatpush1.bf16.msra.mxu1 %v4305_v45 }
 0x22d   :  { %1290 = vmatprep.subr.bf16.mxu0 %v4112_v34  ;;  %1331 = vmatprep.subr.bf16.mxu1 %v5411_v59  ;;  %v5418_v34 = vld [vmem:[#allocation26_spill] sm:$0xff]  ;;  %v5437_v59 = vld [vmem:[#allocation45_spill] sm:$0xff] }
 0x22f   :  { %1192 = vmatmul.mubr.bf16.vlgmr.msra.gmra.mrb[16].mxu0 %v994_v38  ;;  %1233 = vmatmul.mubr.bf16.vlgmr.msra.gmra.mrb[16].mxu1 %v994_v38  ;;  %v5436_v38 = vld [vmem:[#allocation44_spill] sm:$0xff] }
 0x230   :  { %1291 = vmatpush1.bf16.msra.mxu0 %v5412_v37  ;;  %1332 = vmatpush1.bf16.msra.mxu1 %v5413_v3  ;;  %v5438_v37 = vld [vmem:[#allocation46_spill] sm:$0xff]  ;;  %v5439_v3 = vld [vmem:[#allocation47_spill] sm:$0xff] }
 0x231   :  { %1292 = vmatprep.subr.bf16.mxu0 %v5414_v53  ;;  %1333 = vmatprep.subr.bf16.mxu1 %v5415_v40  ;;  %v5440_v53 = vld [vmem:[#allocation48_spill] sm:$0xff]  ;;  %v5441_v40 = vld [vmem:[#allocation49_spill] sm:$0xff] }
 0x232   :  { %1322 = vmatprep.mubr.bf16.mxu0 %v5409_v4  ;;  %1363 = vmatprep.mubr.bf16.mxu1 %v5409_v4 }
 0x234   :  { %1293 = vmatpush1.bf16.msra.mxu0 %v5416_v50  ;;  %1334 = vmatpush1.bf16.msra.mxu1 %v5417_v46 }
 0x235   :  { %1294 = vmatprep.subr.bf16.mxu0 %v5418_v34  ;;  %1335 = vmatprep.subr.bf16.mxu1 %v5419_v60 }
 0x238   :  { %1295 = vmatpush1.bf16.msra.mxu0 %v5420_v35  ;;  %1336 = vmatpush1.bf16.msra.mxu1 %v5421_v2 }
 0x239   :  { %1296 = vmatprep.subr.bf16.mxu0 %v5422_v51  ;;  %1337 = vmatprep.subr.bf16.mxu1 %v5423_v61 }
 0x23c   :  { %1297 = vmatpush1.bf16.msra.mxu0 %v5424_v57  ;;  %1338 = vmatpush1.bf16.msra.mxu1 %v5425_v55 }
 0x23d   :  { %1298 = vmatprep.subr.bf16.mxu0 %v5426_v63  ;;  %1339 = vmatprep.subr.bf16.mxu1 %v5427_v56 }
 0x240   :  { %1299 = vmatpush1.bf16.msra.mxu0 %v5428_v58  ;;  %1340 = vmatpush1.bf16.msra.mxu1 %v5429_v42 }
 0x241   :  { %1300 = vmatprep.subr.bf16.mxu0 %v5430_v48  ;;  %1341 = vmatprep.subr.bf16.mxu1 %v5431_v41 }
 0x244   :  { %1301 = vmatpush1.bf16.msra.mxu0 %v5432_v43  ;;  %1342 = vmatpush1.bf16.msra.mxu1 %v5433_v54 }
 0x245   :  { %1302 = vmatprep.subr.bf16.mxu0 %v5434_v62  ;;  %1343 = vmatprep.subr.bf16.mxu1 %v5435_v39 }
 0x248   :  { %1303 = vmatpush1.bf16.msra.mxu0 %v5436_v38  ;;  %1344 = vmatpush1.bf16.msra.mxu1 %v5437_v59 }
 0x249   :  { %1304 = vmatprep.subr.bf16.mxu0 %v5438_v37  ;;  %1345 = vmatprep.subr.bf16.mxu1 %v5439_v3 }
 0x24c   :  { %1305 = vmatpush1.bf16.msra.mxu0 %v5440_v53  ;;  %1346 = vmatpush1.bf16.msra.mxu1 %v5441_v40 }
 0x24d   :  { %1372 = vmatprep.subr.bf16.mxu0 %v4207_v5  ;;  %1413 = vmatprep.subr.bf16.mxu1 %v4210_v6 }
 0x302   :  { %v1193_v50 = vpop.f32.mrb[16].mxu0  ;;  %v1234_v46 = vpop.f32.mrb[16].mxu1 }
 0x303   :  { %v1249_v34 = vrot.slane %v1193_v50, 7  ;;  %v1195_v60 = vpop.f32.mrb[17].mxu0  ;;  %v1236_v35 = vpop.f32.mrb[17].mxu1  ;;  %v1251_v43 = vrot.slane %v1234_v46, 7 }
 0x304   :  { %v1250_v2 = vrot.slane %v1195_v60, 7  ;;  %v1197_v51 = vpop.f32.mrb[18].mxu0  ;;  %v1238_v61 = vpop.f32.mrb[18].mxu1  ;;  %v1252_v55 = vrot.slane %v1236_v35, 7 }
 0x305   :  { %v1257_v57 = vadd.f32 %v1249_v34, %v4384_v52  ;;  %v1198_v63 = vpop.f32.mrb[19].mxu0  ;;  %v1239_v56 = vpop.f32.mrb[19].mxu1  ;;  %v1259_v50 = vadd.f32 %v1251_v43, %v4393_v49 }
 0x306   :  { %v1258_v58 = vadd.f32 %v1250_v2, %v4386_v47  ;;  %v1260_v41 = vadd.f32 %v1252_v55, %v4390_v1  ;;  %v1275_v2 = vrot.slane %v4396_v44, 7  ;;  %v4634_v44 = vld [vmem:[#allocation8 + $0x64] ss:$16 sps:$4 sm:$0xff]  }
 0x307   :  { %v1261_v42 = vmul.f32 0.5, %v1257_v57  ;;  %v1263_v60 = vmul.f32 0.5, %v1259_v50  ;;  %5446 = vst [vmem:[#allocation23_spill] sm:$0xff] %v4634_v44 }
 0x308   :  { %v1262_v48 = vmul.f32 0.5, %v1258_v58 }
 0x309   :  { %3622 = vtanh.f32 %v1261_v42 }
 0x30a   :  { %3624 = vtanh.f32 %v1262_v48 }
 0x30b   :  { %3626 = vtanh.f32 %v1260_v41 }
 0x30c   :  { %3628 = vtanh.f32 %v1263_v60  ;;  %v4637_v60 = vld [vmem:[#allocation8 + $0x6c] ss:$16 sps:$4 sm:$0xff]  }
 0x30d   :  { %5447 = vst [vmem:[#allocation24_spill] sm:$0xff] %v4637_v60 }
 0x313   :  { %v3623_v51 = vpop.eup %3622 }
 0x314   :  { %v1267_v61 = vmul.f32 0.5, %v3623_v51  ;;  %v3625_v40 = vpop.eup %3624  ;;  %v4640_v51 = vld [vmem:[#allocation8 + $0x60] ss:$16 sps:$4 sm:$0xff]  }
 0x315   :  { %v1268_v35 = vmul.f32 0.5, %v3625_v40  ;;  %v3627_v63 = vpop.eup %3626  ;;  %5448 = vst [vmem:[#allocation25_spill] sm:$0xff] %v4640_v51 }
 0x316   :  { %v1270_v34 = vadd.f32 0.5, %v1267_v61  ;;  %v3629_v46 = vpop.eup %3628  ;;  %v4643_v61 = vld [vmem:[#allocation8 + $0x68] ss:$16 sps:$4 sm:$0xff]  }
 0x317   :  { %v1271_v56 = vadd.f32 0.5, %v1268_v35  ;;  %v1269_v55 = vmul.f32 0.5, %v3629_v46  ;;  %5449 = vst [vmem:[#allocation26_spill] sm:$0xff] %v4643_v61  ;;  %v4649_v35 = vld [vmem:[#allocation8 + $0x8c] ss:$16 sps:$4 sm:$0xff]  }
 0x318   :  { %v1278_v57 = vmul.f32 %v3627_v63, %v1270_v34  ;;  %v4646_v34 = vld [vmem:[#allocation8 + $0x84] ss:$16 sps:$4 sm:$0xff]   ;;  %5451 = vst [vmem:[#allocation28_spill] sm:$0xff] %v4649_v35  ;;  %v4652_v63 = vld [vmem:[#allocation8 + $0x80] ss:$16 sps:$4 sm:$0xff]  }
 0x319   :  { %v1277_v58 = vmul.f32 %v1275_v2, %v1271_v56  ;;  %v1272_v48 = vadd.f32 0.5, %v1269_v55  ;;  %5450 = vst [vmem:[#allocation27_spill] sm:$0xff] %v4646_v34  ;;  %5452 = vst [vmem:[#allocation29_spill] sm:$0xff] %v4652_v63  ;;  %v4655_v56 = vld [vmem:[#allocation8 + $0x88] ss:$16 sps:$4 sm:$0xff]  }
 0x31a   :  { %5453 = vst [vmem:[#allocation30_spill] sm:$0xff] %v4655_v56  ;;  %v4658_v2 = vld [vmem:[#allocation8 + $0xa4] ss:$16 sps:$4 sm:$0xff]  }
 0x31b   :  { %v4518_v42 = vadd.f32 %v1278_v57, %v1277_v58  ;;  %5454 = vst [vmem:[#allocation31_spill] sm:$0xff] %v4658_v2  ;;  %v4661_v57 = vld [vmem:[#allocation8 + $0xac] ss:$16 sps:$4 sm:$0xff]   ;;  %v4664_v58 = vld [vmem:[#allocation8 + $0xa0] ss:$16 sps:$4 sm:$0xff]  }
 0x31c   :  { %5455 = vst [vmem:[#allocation32_spill] sm:$0xff] %v4661_v57  ;;  %5456 = vst [vmem:[#allocation33_spill] sm:$0xff] %v4664_v58  ;;  %v5457_v46 = vld [vmem:[#allocation49_spill] sm:$0xff] }
 0x31d   :  { %3630 = vtanh.f32 %v4518_v42 }
 0x327   :  { %v3631_v41 = vpop.eup %3630 }
 0x328   :  { %v4521_v43 = vmul.f32 %v3631_v41, %v1272_v48 }
 0x32a   :  { %v4525_v50 = vpack.c.bf16 %v4521_v43, %v4521_v43 }
 0x32c   :  { %v1287_v40 = vshrl.u32 %v4525_v50, 16 }
 0x32e   :  { %1323 = vmatmul.mubr.bf16.vlgmr.msra.gmra.mrb[20].mxu0 %v1287_v40  ;;  %1364 = vmatmul.mubr.bf16.vlgmr.msra.gmra.mrb[20].mxu1 %v1287_v40 }
 0x32f   :  { %1373 = vmatpush1.bf16.msra.mxu0 %v4213_v7  ;;  %1414 = vmatpush1.bf16.msra.mxu1 %v4217_v8 }
 0x330   :  { %1374 = vmatprep.subr.bf16.mxu0 %v4219_v9  ;;  %1415 = vmatprep.subr.bf16.mxu1 %v4222_v10 }
 0x331   :  { %1404 = vmatprep.mubr.bf16.mxu0 %v5409_v4  ;;  %1445 = vmatprep.mubr.bf16.mxu1 %v5409_v4 }
 0x333   :  { %1375 = vmatpush1.bf16.msra.mxu0 %v4227_v11  ;;  %1416 = vmatpush1.bf16.msra.mxu1 %v4231_v12 }
 0x334   :  { %1376 = vmatprep.subr.bf16.mxu0 %v4233_v13  ;;  %1417 = vmatprep.subr.bf16.mxu1 %v4236_v14 }
 0x337   :  { %1377 = vmatpush1.bf16.msra.mxu0 %v4241_v15  ;;  %1418 = vmatpush1.bf16.msra.mxu1 %v4245_v16 }
 0x338   :  { %1378 = vmatprep.subr.bf16.mxu0 %v4247_v17  ;;  %1419 = vmatprep.subr.bf16.mxu1 %v4250_v18 }
 0x33b   :  { %1379 = vmatpush1.bf16.msra.mxu0 %v4253_v19  ;;  %1420 = vmatpush1.bf16.msra.mxu1 %v4257_v20 }
 0x33c   :  { %1380 = vmatprep.subr.bf16.mxu0 %v4259_v21  ;;  %1421 = vmatprep.subr.bf16.mxu1 %v4262_v22 }
 0x33f   :  { %1381 = vmatpush1.bf16.msra.mxu0 %v4265_v23  ;;  %1422 = vmatpush1.bf16.msra.mxu1 %v4269_v24 }
 0x340   :  { %1382 = vmatprep.subr.bf16.mxu0 %v4271_v25  ;;  %1423 = vmatprep.subr.bf16.mxu1 %v4274_v26 }
 0x343   :  { %1383 = vmatpush1.bf16.msra.mxu0 %v4277_v27  ;;  %1424 = vmatpush1.bf16.msra.mxu1 %v4281_v28 }
 0x344   :  { %1384 = vmatprep.subr.bf16.mxu0 %v4283_v29  ;;  %1425 = vmatprep.subr.bf16.mxu1 %v4286_v30 }
 0x347   :  { %1385 = vmatpush1.bf16.msra.mxu0 %v4289_v31  ;;  %1426 = vmatpush1.bf16.msra.mxu1 %v4293_v32 }
 0x348   :  { %1386 = vmatprep.subr.bf16.mxu0 %v4295_v33  ;;  %1427 = vmatprep.subr.bf16.mxu1 %v4298_v36 }
 0x34b   :  { %1387 = vmatpush1.bf16.msra.mxu0 %v4301_v0  ;;  %1428 = vmatpush1.bf16.msra.mxu1 %v4305_v45 }
 0x34c   :  { %1458 = vmatprep.subr.bf16.mxu0 %v4207_v5  ;;  %1499 = vmatprep.subr.bf16.mxu1 %v4210_v6 }
 0x34e   :  { %1405 = vmatmul.mubr.bf16.vlgmr.msra.gmra.mrb[20].mxu0 %v1287_v40  ;;  %1446 = vmatmul.mubr.bf16.vlgmr.msra.gmra.mrb[20].mxu1 %v1287_v40 }
 0x34f   :  { %1459 = vmatpush1.bf16.msra.mxu0 %v4213_v7  ;;  %1500 = vmatpush1.bf16.msra.mxu1 %v4217_v8  ;;  %v1283_v7 = vunpack.c.l.bf16 %v4525_v50 }
 0x350   :  { %1460 = vmatprep.subr.bf16.mxu0 %v4219_v9  ;;  %1501 = vmatprep.subr.bf16.mxu1 %v4222_v10 }
 0x351   :  { %1490 = vmatprep.mubr.bf16.mxu0 %v5409_v4  ;;  %1531 = vmatprep.mubr.bf16.mxu1 %v5409_v4  ;;  %v1284_v8 = vsub.f32 %v4521_v43, %v1283_v7 }
 0x353   :  { %1461 = vmatpush1.bf16.msra.mxu0 %v4227_v11  ;;  %1502 = vmatpush1.bf16.msra.mxu1 %v4231_v12  ;;  %v1285_v9 = vpack.c.bf16 %v1284_v8, %v1284_v8  ;;  %v4596_v11 = vld [vmem:[#allocation8 + $0x4] ss:$16 sps:$4 sm:$0xff]   ;;  %v4599_v12 = vld [vmem:[#allocation8 + $0xc] ss:$16 sps:$4 sm:$0xff]  }
 0x354   :  { %1462 = vmatprep.subr.bf16.mxu0 %v4233_v13  ;;  %1503 = vmatprep.subr.bf16.mxu1 %v4236_v14  ;;  %v4602_v13 = vld [vmem:[#allocation8] ss:$16 sps:$4 sm:$0xff]   ;;  %v4605_v14 = vld [vmem:[#allocation8 + $0x8] ss:$16 sps:$4 sm:$0xff]  }
 0x355   :  { %v1455_v10 = vshrl.u32 %v1285_v9, 16 }
 0x357   :  { %1463 = vmatpush1.bf16.msra.mxu0 %v4241_v15  ;;  %1504 = vmatpush1.bf16.msra.mxu1 %v4245_v16  ;;  %v4608_v15 = vld [vmem:[#allocation8 + $0x24] ss:$16 sps:$4 sm:$0xff]   ;;  %v4611_v16 = vld [vmem:[#allocation8 + $0x2c] ss:$16 sps:$4 sm:$0xff]  }
 0x358   :  { %1464 = vmatprep.subr.bf16.mxu0 %v4247_v17  ;;  %1505 = vmatprep.subr.bf16.mxu1 %v4250_v18  ;;  %v4616_v17 = vld [vmem:[#allocation8 + $0x20] ss:$16 sps:$4 sm:$0xff]   ;;  %v4619_v18 = vld [vmem:[#allocation8 + $0x28] ss:$16 sps:$4 sm:$0xff]  }
 0x35b   :  { %1465 = vmatpush1.bf16.msra.mxu0 %v4253_v19  ;;  %1506 = vmatpush1.bf16.msra.mxu1 %v4257_v20  ;;  %v4622_v19 = vld [vmem:[#allocation8 + $0x44] ss:$16 sps:$4 sm:$0xff]   ;;  %v4625_v20 = vld [vmem:[#allocation8 + $0x4c] ss:$16 sps:$4 sm:$0xff]  }
 0x35c   :  { %1466 = vmatprep.subr.bf16.mxu0 %v4259_v21  ;;  %1507 = vmatprep.subr.bf16.mxu1 %v4262_v22  ;;  %5442 = vst [vmem:[#allocation19_spill] sm:$0xff] %v4622_v19  ;;  %5443 = vst [vmem:[#allocation20_spill] sm:$0xff] %v4625_v20  ;;  %v4628_v21 = vld [vmem:[#allocation8 + $0x40] ss:$16 sps:$4 sm:$0xff]   ;;  %v4631_v22 = vld [vmem:[#allocation8 + $0x48] ss:$16 sps:$4 sm:$0xff]  }
 0x35d   :  { %5444 = vst [vmem:[#allocation21_spill] sm:$0xff] %v4628_v21  ;;  %5445 = vst [vmem:[#allocation22_spill] sm:$0xff] %v4631_v22 }
 0x35f   :  { %1467 = vmatpush1.bf16.msra.mxu0 %v4265_v23  ;;  %1508 = vmatpush1.bf16.msra.mxu1 %v4269_v24 }
 0x360   :  { %1468 = vmatprep.subr.bf16.mxu0 %v4271_v25  ;;  %1509 = vmatprep.subr.bf16.mxu1 %v4274_v26 }
 0x363   :  { %1469 = vmatpush1.bf16.msra.mxu0 %v4277_v27  ;;  %1510 = vmatpush1.bf16.msra.mxu1 %v4281_v28 }
 0x364   :  { %1470 = vmatprep.subr.bf16.mxu0 %v4283_v29  ;;  %1511 = vmatprep.subr.bf16.mxu1 %v4286_v30 }
 0x367   :  { %1471 = vmatpush1.bf16.msra.mxu0 %v4289_v31  ;;  %1512 = vmatpush1.bf16.msra.mxu1 %v4293_v32 }
 0x368   :  { %1472 = vmatprep.subr.bf16.mxu0 %v4295_v33  ;;  %1513 = vmatprep.subr.bf16.mxu1 %v4298_v36 }
 0x36b   :  { %1473 = vmatpush1.bf16.msra.mxu0 %v4301_v0  ;;  %1514 = vmatpush1.bf16.msra.mxu1 %v4305_v45 }
 0x36c   :  { %1588 = vmatprep.subr.bf16.mxu0 %v4596_v11  ;;  %1629 = vmatprep.subr.bf16.mxu1 %v4599_v12 }
 0x36e   :  { %1491 = vmatmul.mubr.bf16.vlgmr.msra.gmra.mrb[20].mxu0 %v1455_v10  ;;  %1532 = vmatmul.mubr.bf16.vlgmr.msra.gmra.mrb[20].mxu1 %v1455_v10 }
 0x36f   :  { %1589 = vmatpush1.bf16.msra.mxu0 %v4602_v13  ;;  %1630 = vmatpush1.bf16.msra.mxu1 %v4605_v14 }
 0x370   :  { %1590 = vmatprep.subr.bf16.mxu0 %v4608_v15  ;;  %1631 = vmatprep.subr.bf16.mxu1 %v4611_v16 }
 0x371   :  { %1620 = vmatprep.mubr.bf16.mxu0 %v5409_v4  ;;  %1661 = vmatprep.mubr.bf16.mxu1 %v5409_v4 }
 0x373   :  { %1591 = vmatpush1.bf16.msra.mxu0 %v4616_v17  ;;  %1632 = vmatpush1.bf16.msra.mxu1 %v4619_v18 }
 0x374   :  { %1592 = vmatprep.subr.bf16.mxu0 %v4622_v19  ;;  %1633 = vmatprep.subr.bf16.mxu1 %v4625_v20 }
 0x377   :  { %1593 = vmatpush1.bf16.msra.mxu0 %v4628_v21  ;;  %1634 = vmatpush1.bf16.msra.mxu1 %v4631_v22 }
 0x378   :  { %1594 = vmatprep.subr.bf16.mxu0 %v4634_v44  ;;  %1635 = vmatprep.subr.bf16.mxu1 %v4637_v60 }
 0x37b   :  { %1595 = vmatpush1.bf16.msra.mxu0 %v4640_v51  ;;  %1636 = vmatpush1.bf16.msra.mxu1 %v4643_v61 }
 0x37c   :  { %1596 = vmatprep.subr.bf16.mxu0 %v4646_v34  ;;  %1637 = vmatprep.subr.bf16.mxu1 %v4649_v35 }
 0x37f   :  { %1597 = vmatpush1.bf16.msra.mxu0 %v4652_v63  ;;  %1638 = vmatpush1.bf16.msra.mxu1 %v4655_v56 }
 0x380   :  { %1598 = vmatprep.subr.bf16.mxu0 %v4658_v2  ;;  %1639 = vmatprep.subr.bf16.mxu1 %v4661_v57 }
 0x383   :  { %1599 = vmatpush1.bf16.msra.mxu0 %v4664_v58  ;;  %1640 = vmatpush1.bf16.msra.mxu1 %v5433_v54 }
 0x384   :  { %1600 = vmatprep.subr.bf16.mxu0 %v5434_v62  ;;  %1641 = vmatprep.subr.bf16.mxu1 %v5435_v39 }
 0x387   :  { %1601 = vmatpush1.bf16.msra.mxu0 %v5436_v38  ;;  %1642 = vmatpush1.bf16.msra.mxu1 %v5437_v59 }
 0x388   :  { %1602 = vmatprep.subr.bf16.mxu0 %v5438_v37  ;;  %1643 = vmatprep.subr.bf16.mxu1 %v5439_v3 }
 0x38b   :  { %1603 = vmatpush1.bf16.msra.mxu0 %v5440_v53  ;;  %1644 = vmatpush1.bf16.msra.mxu1 %v5457_v46 }
 0x38c   :  { %1670 = vmatprep.subr.bf16.mxu0 %v4207_v5  ;;  %1711 = vmatprep.subr.bf16.mxu1 %v4210_v6 }
 0x441   :  { %v1492_v54 = vpop.f32.mrb[20].mxu0  ;;  %v1533_v62 = vpop.f32.mrb[20].mxu1 }
 0x442   :  { %v1548_v55 = vrot.slane %v1492_v54, 6  ;;  %v1494_v39 = vpop.f32.mrb[21].mxu0  ;;  %v1535_v48 = vpop.f32.mrb[21].mxu1  ;;  %v1550_v6 = vrot.slane %v1533_v62, 6 }
 0x443   :  { %v1549_v38 = vrot.slane %v1494_v39, 6  ;;  %v1496_v41 = vpop.f32.mrb[22].mxu0  ;;  %v1537_v59 = vpop.f32.mrb[22].mxu1  ;;  %v1551_v43 = vrot.slane %v1535_v48, 6 }
 0x444   :  { %v1556_v37 = vadd.f32 %v1548_v55, %v4384_v52  ;;  %v1497_v3 = vpop.f32.mrb[23].mxu0  ;;  %v1538_v50 = vpop.f32.mrb[23].mxu1  ;;  %v1558_v8 = vadd.f32 %v1550_v6, %v4393_v49  ;;  %v4696_v6 = vld [vmem:[#allocation7 + $0x8] ss:$16 sps:$4 sm:$0xff]  }
 0x445   :  { %v1557_v53 = vadd.f32 %v1549_v38, %v4386_v47  ;;  %v1559_v5 = vadd.f32 %v1551_v43, %v4390_v1  ;;  %v1574_v38 = vrot.slane %v4518_v42, 7  ;;  %v4693_v42 = vld [vmem:[#allocation7] ss:$16 sps:$4 sm:$0xff]  }
 0x446   :  { %v1560_v40 = vmul.f32 0.5, %v1556_v37  ;;  %v1562_v9 = vmul.f32 0.5, %v1558_v8  ;;  %v4699_v8 = vld [vmem:[#allocation7 + $0x24] ss:$16 sps:$4 sm:$0xff]  }
 0x447   :  { %v1561_v7 = vmul.f32 0.5, %v1557_v53 }
 0x448   :  { %3632 = vtanh.f32 %v1560_v40 }
 0x449   :  { %3634 = vtanh.f32 %v1561_v7 }
 0x44a   :  { %3636 = vtanh.f32 %v1559_v5 }
 0x44b   :  { %3638 = vtanh.f32 %v1562_v9  ;;  %v4702_v9 = vld [vmem:[#allocation7 + $0x2c] ss:$16 sps:$4 sm:$0xff]  }
 0x452   :  { %v3633_v10 = vpop.eup %3632 }
 0x453   :  { %v1566_v46 = vmul.f32 0.5, %v3633_v10  ;;  %v3635_v54 = vpop.eup %3634  ;;  %v4707_v10 = vld [vmem:[#allocation7 + $0x20] ss:$16 sps:$4 sm:$0xff]  }
 0x454   :  { %v1567_v39 = vmul.f32 0.5, %v3635_v54  ;;  %v3637_v48 = vpop.eup %3636  ;;  %v4713_v54 = vld [vmem:[#allocation7 + $0x44] ss:$16 sps:$4 sm:$0xff]  }
 0x455   :  { %v1569_v55 = vadd.f32 0.5, %v1566_v46  ;;  %v3639_v62 = vpop.eup %3638  ;;  %v4710_v46 = vld [vmem:[#allocation7 + $0x28] ss:$16 sps:$4 sm:$0xff]  }
 0x456   :  { %v1570_v41 = vadd.f32 0.5, %v1567_v39  ;;  %v1568_v43 = vmul.f32 0.5, %v3639_v62  ;;  %v4719_v39 = vld [vmem:[#allocation7 + $0x40] ss:$16 sps:$4 sm:$0xff]   ;;  %v4737_v62 = vld [vmem:[#allocation7 + $0x84] ss:$16 sps:$4 sm:$0xff]  }
 0x457   :  { %v1577_v59 = vmul.f32 %v3637_v48, %v1569_v55  ;;  %v4716_v55 = vld [vmem:[#allocation7 + $0x4c] ss:$16 sps:$4 sm:$0xff]   ;;  %v4722_v48 = vld [vmem:[#allocation7 + $0x48] ss:$16 sps:$4 sm:$0xff]  }
 0x458   :  { %v1576_v37 = vmul.f32 %v1574_v38, %v1570_v41  ;;  %v1571_v50 = vadd.f32 0.5, %v1568_v43  ;;  %v4725_v41 = vld [vmem:[#allocation7 + $0x64] ss:$16 sps:$4 sm:$0xff]   ;;  %v4728_v38 = vld [vmem:[#allocation7 + $0x6c] ss:$16 sps:$4 sm:$0xff]  }
 0x459   :  { %v4740_v43 = vld [vmem:[#allocation7 + $0x8c] ss:$16 sps:$4 sm:$0xff]  }
 0x45a   :  { %v4683_v3 = vadd.f32 %v1577_v59, %v1576_v37  ;;  %v4731_v59 = vld [vmem:[#allocation7 + $0x60] ss:$16 sps:$4 sm:$0xff]   ;;  %v4734_v37 = vld [vmem:[#allocation7 + $0x68] ss:$16 sps:$4 sm:$0xff]  }
 0x45c   :  { %3640 = vtanh.f32 %v4683_v3 }
 0x466   :  { %v3641_v53 = vpop.eup %3640 }
 0x467   :  { %v4686_v40 = vmul.f32 %v3641_v53, %v1571_v50  ;;  %v4813_v50 = vld [vmem:[#allocation7 + $0xe4] ss:$16 sps:$4 sm:$0xff]   ;;  %v4816_v53 = vld [vmem:[#allocation7 + $0xec] ss:$16 sps:$4 sm:$0xff]  }
 0x469   :  { %v4690_v7 = vpack.c.bf16 %v4686_v40, %v4686_v40 }
 0x46b   :  { %v1586_v5 = vrot.slane %v4690_v7, 1 }
 0x46d   :  { %1621 = vmatmul.mubr.bf16.vlgmr.msra.gmra.mrb[24].mxu0 %v1586_v5  ;;  %1662 = vmatmul.mubr.bf16.vlgmr.msra.gmra.mrb[24].mxu1 %v1586_v5 }
 0x46e   :  { %1671 = vmatpush1.bf16.msra.mxu0 %v4693_v42  ;;  %1712 = vmatpush1.bf16.msra.mxu1 %v4696_v6 }
 0x46f   :  { %1672 = vmatprep.subr.bf16.mxu0 %v4699_v8  ;;  %1713 = vmatprep.subr.bf16.mxu1 %v4702_v9 }
 0x470   :  { %1702 = vmatprep.mubr.bf16.mxu0 %v5409_v4  ;;  %1743 = vmatprep.mubr.bf16.mxu1 %v5409_v4 }
 0x472   :  { %1673 = vmatpush1.bf16.msra.mxu0 %v4707_v10  ;;  %1714 = vmatpush1.bf16.msra.mxu1 %v4710_v46 }
 0x473   :  { %1674 = vmatprep.subr.bf16.mxu0 %v4713_v54  ;;  %1715 = vmatprep.subr.bf16.mxu1 %v4716_v55 }
 0x476   :  { %1675 = vmatpush1.bf16.msra.mxu0 %v4719_v39  ;;  %1716 = vmatpush1.bf16.msra.mxu1 %v4722_v48 }
 0x477   :  { %1676 = vmatprep.subr.bf16.mxu0 %v4725_v41  ;;  %1717 = vmatprep.subr.bf16.mxu1 %v4728_v38 }
 0x47a   :  { %1677 = vmatpush1.bf16.msra.mxu0 %v4731_v59  ;;  %1718 = vmatpush1.bf16.msra.mxu1 %v4734_v37 }
 0x47b   :  { %1678 = vmatprep.subr.bf16.mxu0 %v4737_v62  ;;  %1719 = vmatprep.subr.bf16.mxu1 %v4740_v43 }
 0x47e   :  { %1679 = vmatpush1.bf16.msra.mxu0 %v4265_v23  ;;  %1720 = vmatpush1.bf16.msra.mxu1 %v4269_v24  ;;  %v4757_v23 = vld [vmem:[#allocation7 + $0x4] ss:$16 sps:$4 sm:$0xff]   ;;  %v4760_v24 = vld [vmem:[#allocation7 + $0xc] ss:$16 sps:$4 sm:$0xff]  }
 0x47f   :  { %1680 = vmatprep.subr.bf16.mxu0 %v4271_v25  ;;  %1721 = vmatprep.subr.bf16.mxu1 %v4274_v26  ;;  %v4787_v25 = vld [vmem:[#allocation7 + $0xa4] ss:$16 sps:$4 sm:$0xff]   ;;  %v4790_v26 = vld [vmem:[#allocation7 + $0xac] ss:$16 sps:$4 sm:$0xff]  }
 0x482   :  { %1681 = vmatpush1.bf16.msra.mxu0 %v4277_v27  ;;  %1722 = vmatpush1.bf16.msra.mxu1 %v4281_v28  ;;  %v1582_v27 = vunpack.c.l.bf16 %v4690_v7  ;;  %v4794_v28 = vld [vmem:[#allocation7 + $0xa0] ss:$16 sps:$4 sm:$0xff]  }
 0x483   :  { %1682 = vmatprep.subr.bf16.mxu0 %v4283_v29  ;;  %1723 = vmatprep.subr.bf16.mxu1 %v4286_v30  ;;  %v4797_v29 = vld [vmem:[#allocation7 + $0xa8] ss:$16 sps:$4 sm:$0xff]   ;;  %v4800_v30 = vld [vmem:[#allocation7 + $0xc4] ss:$16 sps:$4 sm:$0xff]  }
 0x486   :  { %1683 = vmatpush1.bf16.msra.mxu0 %v4289_v31  ;;  %1724 = vmatpush1.bf16.msra.mxu1 %v4293_v32  ;;  %v4803_v31 = vld [vmem:[#allocation7 + $0xcc] ss:$16 sps:$4 sm:$0xff]   ;;  %v1583_v32 = vsub.f32 %v4686_v40, %v1582_v27  ;;  %v4822_v40 = vld [vmem:[#allocation7 + $0xe8] ss:$16 sps:$4 sm:$0xff]  }
 0x487   :  { %1684 = vmatprep.subr.bf16.mxu0 %v4295_v33  ;;  %1725 = vmatprep.subr.bf16.mxu1 %v4298_v36  ;;  %v4807_v33 = vld [vmem:[#allocation7 + $0xc0] ss:$16 sps:$4 sm:$0xff]   ;;  %v4810_v36 = vld [vmem:[#allocation7 + $0xc8] ss:$16 sps:$4 sm:$0xff]  }
 0x488   :  { %v1584_v7 = vpack.c.bf16 %v1583_v32, %v1583_v32  ;;  %v4850_v32 = vld [vmem:[#allocation8 + $0xa8] ss:$16 sps:$4 sm:$0xff]  }
 0x489   :  { %5458 = vst [vmem:[#allocation34_spill] sm:$0xff] %v4850_v32 }
 0x48a   :  { %1685 = vmatpush1.bf16.msra.mxu0 %v4301_v0  ;;  %1726 = vmatpush1.bf16.msra.mxu1 %v4305_v45  ;;  %v4781_v0 = vld [vmem:[#allocation7 + $0x80] ss:$16 sps:$4 sm:$0xff]   ;;  %v4784_v45 = vld [vmem:[#allocation7 + $0x88] ss:$16 sps:$4 sm:$0xff]   ;;  %v1753_v27 = vrot.slane %v1584_v7, 1 }
 0x48b   :  { %1755 = vmatprep.subr.bf16.mxu0 %v4757_v23  ;;  %1796 = vmatprep.subr.bf16.mxu1 %v4760_v24  ;;  %v4853_v7 = vld [vmem:[#allocation8 + $0xc4] ss:$16 sps:$4 sm:$0xff]  }
 0x48c   :  { %5459 = vst [vmem:[#allocation35_spill] sm:$0xff] %v4853_v7 }
 0x48d   :  { %1703 = vmatmul.mubr.bf16.vlgmr.msra.gmra.mrb[24].mxu0 %v1586_v5  ;;  %1744 = vmatmul.mubr.bf16.vlgmr.msra.gmra.mrb[24].mxu1 %v1586_v5  ;;  %v4819_v5 = vld [vmem:[#allocation7 + $0xe0] ss:$16 sps:$4 sm:$0xff]  }
 0x48e   :  { %1756 = vmatpush1.bf16.msra.mxu0 %v4693_v42  ;;  %1797 = vmatpush1.bf16.msra.mxu1 %v4696_v6 }
 0x48f   :  { %1757 = vmatprep.subr.bf16.mxu0 %v4699_v8  ;;  %1798 = vmatprep.subr.bf16.mxu1 %v4702_v9 }
 0x490   :  { %1787 = vmatprep.mubr.bf16.mxu0 %v5409_v4  ;;  %1828 = vmatprep.mubr.bf16.mxu1 %v5409_v4 }
 0x492   :  { %1758 = vmatpush1.bf16.msra.mxu0 %v4707_v10  ;;  %1799 = vmatpush1.bf16.msra.mxu1 %v4710_v46 }
 0x493   :  { %1759 = vmatprep.subr.bf16.mxu0 %v4713_v54  ;;  %1800 = vmatprep.subr.bf16.mxu1 %v4716_v55 }
 0x496   :  { %1760 = vmatpush1.bf16.msra.mxu0 %v4719_v39  ;;  %1801 = vmatpush1.bf16.msra.mxu1 %v4722_v48 }
 0x497   :  { %1761 = vmatprep.subr.bf16.mxu0 %v4725_v41  ;;  %1802 = vmatprep.subr.bf16.mxu1 %v4728_v38 }
 0x49a   :  { %1762 = vmatpush1.bf16.msra.mxu0 %v4731_v59  ;;  %1803 = vmatpush1.bf16.msra.mxu1 %v4734_v37 }
 0x49b   :  { %1763 = vmatprep.subr.bf16.mxu0 %v4737_v62  ;;  %1804 = vmatprep.subr.bf16.mxu1 %v4740_v43 }
 0x49e   :  { %1764 = vmatpush1.bf16.msra.mxu0 %v4781_v0  ;;  %1805 = vmatpush1.bf16.msra.mxu1 %v4784_v45 }
 0x49f   :  { %1765 = vmatprep.subr.bf16.mxu0 %v4787_v25  ;;  %1806 = vmatprep.subr.bf16.mxu1 %v4790_v26 }
 0x4a2   :  { %1766 = vmatpush1.bf16.msra.mxu0 %v4794_v28  ;;  %1807 = vmatpush1.bf16.msra.mxu1 %v4797_v29 }
 0x4a3   :  { %1767 = vmatprep.subr.bf16.mxu0 %v4800_v30  ;;  %1808 = vmatprep.subr.bf16.mxu1 %v4803_v31 }
 0x4a6   :  { %1768 = vmatpush1.bf16.msra.mxu0 %v4807_v33  ;;  %1809 = vmatpush1.bf16.msra.mxu1 %v4810_v36 }
 0x4a7   :  { %1769 = vmatprep.subr.bf16.mxu0 %v4813_v50  ;;  %1810 = vmatprep.subr.bf16.mxu1 %v4816_v53 }
 0x4aa   :  { %1770 = vmatpush1.bf16.msra.mxu0 %v4819_v5  ;;  %1811 = vmatpush1.bf16.msra.mxu1 %v4822_v40 }
 0x4ab   :  { %1887 = vmatprep.subr.bf16.mxu0 %v4596_v11  ;;  %1928 = vmatprep.subr.bf16.mxu1 %v4599_v12 }
 0x4ad   :  { %1788 = vmatmul.mubr.bf16.vlgmr.msra.gmra.mrb[24].mxu0 %v1753_v27  ;;  %1829 = vmatmul.mubr.bf16.vlgmr.msra.gmra.mrb[24].mxu1 %v1753_v27  ;;  %v4856_v27 = vld [vmem:[#allocation8 + $0xcc] ss:$16 sps:$4 sm:$0xff]  }
 0x4ae   :  { %1888 = vmatpush1.bf16.msra.mxu0 %v4602_v13  ;;  %1929 = vmatpush1.bf16.msra.mxu1 %v4605_v14  ;;  %5460 = vst [vmem:[#allocation36_spill] sm:$0xff] %v4856_v27 }
 0x4af   :  { %1889 = vmatprep.subr.bf16.mxu0 %v4608_v15  ;;  %1930 = vmatprep.subr.bf16.mxu1 %v4611_v16 }
 0x4b0   :  { %1919 = vmatprep.mubr.bf16.mxu0 %v5409_v4  ;;  %1960 = vmatprep.mubr.bf16.mxu1 %v5409_v4 }
 0x4b2   :  { %1890 = vmatpush1.bf16.msra.mxu0 %v4616_v17  ;;  %1931 = vmatpush1.bf16.msra.mxu1 %v4619_v18 }
 0x4b3   :  { %1891 = vmatprep.subr.bf16.mxu0 %v4622_v19  ;;  %1932 = vmatprep.subr.bf16.mxu1 %v4625_v20 }
 0x4b6   :  { %1892 = vmatpush1.bf16.msra.mxu0 %v4628_v21  ;;  %1933 = vmatpush1.bf16.msra.mxu1 %v4631_v22 }
 0x4b7   :  { %1893 = vmatprep.subr.bf16.mxu0 %v4634_v44  ;;  %1934 = vmatprep.subr.bf16.mxu1 %v4637_v60 }
 0x4ba   :  { %1894 = vmatpush1.bf16.msra.mxu0 %v4640_v51  ;;  %1935 = vmatpush1.bf16.msra.mxu1 %v4643_v61 }
 0x4bb   :  { %1895 = vmatprep.subr.bf16.mxu0 %v4646_v34  ;;  %1936 = vmatprep.subr.bf16.mxu1 %v4649_v35 }
 0x4be   :  { %1896 = vmatpush1.bf16.msra.mxu0 %v4652_v63  ;;  %1937 = vmatpush1.bf16.msra.mxu1 %v4655_v56  ;;  %v4859_v63 = vld [vmem:[#allocation8 + $0xc0] ss:$16 sps:$4 sm:$0xff]  }
 0x4bf   :  { %1897 = vmatprep.subr.bf16.mxu0 %v4658_v2  ;;  %1938 = vmatprep.subr.bf16.mxu1 %v4661_v57  ;;  %5461 = vst [vmem:[#allocation37_spill] sm:$0xff] %v4859_v63  ;;  %v4862_v2 = vld [vmem:[#allocation8 + $0xc8] ss:$16 sps:$4 sm:$0xff]  }
 0x4c0   :  { %5462 = vst [vmem:[#allocation38_spill] sm:$0xff] %v4862_v2 }
 0x4c2   :  { %1898 = vmatpush1.bf16.msra.mxu0 %v4664_v58  ;;  %1939 = vmatpush1.bf16.msra.mxu1 %v4850_v32  ;;  %v4865_v58 = vld [vmem:[#allocation8 + $0xe4] ss:$16 sps:$4 sm:$0xff]   ;;  %v4868_v32 = vld [vmem:[#allocation8 + $0xec] ss:$16 sps:$4 sm:$0xff]  }
 0x4c3   :  { %1899 = vmatprep.subr.bf16.mxu0 %v4853_v7  ;;  %1940 = vmatprep.subr.bf16.mxu1 %v4856_v27  ;;  %5463 = vst [vmem:[#allocation39_spill] sm:$0xff] %v4865_v58  ;;  %5464 = vst [vmem:[#allocation40_spill] sm:$0xff] %v4868_v32  ;;  %v4871_v7 = vld [vmem:[#allocation8 + $0xe0] ss:$16 sps:$4 sm:$0xff]   ;;  %v4874_v27 = vld [vmem:[#allocation8 + $0xe8] ss:$16 sps:$4 sm:$0xff]  }
 0x4c4   :  { %5465 = vst [vmem:[#allocation41_spill] sm:$0xff] %v4871_v7  ;;  %5466 = vst [vmem:[#allocation42_spill] sm:$0xff] %v4874_v27 }
 0x4c6   :  { %1900 = vmatpush1.bf16.msra.mxu0 %v4859_v63  ;;  %1941 = vmatpush1.bf16.msra.mxu1 %v4862_v2 }
 0x4c7   :  { %1901 = vmatprep.subr.bf16.mxu0 %v4865_v58  ;;  %1942 = vmatprep.subr.bf16.mxu1 %v4868_v32 }
 0x4ca   :  { %1902 = vmatpush1.bf16.msra.mxu0 %v4871_v7  ;;  %1943 = vmatpush1.bf16.msra.mxu1 %v4874_v27 }
 0x4cb   :  { %1969 = vmatprep.subr.bf16.mxu0 %v4757_v23  ;;  %2010 = vmatprep.subr.bf16.mxu1 %v4760_v24 }
 0x580   :  { %v1789_v2 = vpop.f32.mrb[24].mxu0  ;;  %v1830_v63 = vpop.f32.mrb[24].mxu1 }
 0x581   :  { %v1845_v57 = vrot.slane %v1789_v2, 5  ;;  %v1791_v58 = vpop.f32.mrb[25].mxu0  ;;  %v1832_v56 = vpop.f32.mrb[25].mxu1  ;;  %v1847_v20 = vrot.slane %v1830_v63, 5 }
 0x582   :  { %v1846_v35 = vrot.slane %v1791_v58, 5  ;;  %v1793_v34 = vpop.f32.mrb[26].mxu0  ;;  %v1834_v32 = vpop.f32.mrb[26].mxu1  ;;  %v1848_v51 = vrot.slane %v1832_v56, 5 }
 0x583   :  { %v1853_v61 = vadd.f32 %v1845_v57, %v4384_v52  ;;  %v1794_v7 = vpop.f32.mrb[27].mxu0  ;;  %v1835_v60 = vpop.f32.mrb[27].mxu1  ;;  %v1855_v2 = vadd.f32 %v1847_v20, %v4393_v49 }
 0x584   :  { %v1854_v44 = vadd.f32 %v1846_v35, %v4386_v47  ;;  %v1856_v21 = vadd.f32 %v1848_v51, %v4390_v1 }
 0x585   :  { %v1857_v27 = vmul.f32 0.5, %v1853_v61  ;;  %v1859_v58 = vmul.f32 0.5, %v1855_v2  ;;  %v1871_v61 = vrot.slane %v4683_v3, 7 }
 0x586   :  { %v1858_v22 = vmul.f32 0.5, %v1854_v44 }
 0x587   :  { %3642 = vtanh.f32 %v1857_v27 }
 0x588   :  { %3644 = vtanh.f32 %v1858_v22 }
 0x589   :  { %3646 = vtanh.f32 %v1856_v21 }
 0x58a   :  { %3648 = vtanh.f32 %v1859_v58 }
 0x591   :  { %v3643_v34 = vpop.eup %3642 }
 0x592   :  { %v1863_v32 = vmul.f32 0.5, %v3643_v34  ;;  %v3645_v19 = vpop.eup %3644 }
 0x593   :  { %v1864_v56 = vmul.f32 0.5, %v3645_v19  ;;  %v3647_v60 = vpop.eup %3646 }
 0x594   :  { %v1866_v57 = vadd.f32 0.5, %v1863_v32  ;;  %v3649_v21 = vpop.eup %3648 }
 0x595   :  { %v1867_v7 = vadd.f32 0.5, %v1864_v56  ;;  %v1865_v22 = vmul.f32 0.5, %v3649_v21  ;;  %v5472_v21 = vld [vmem:[#allocation24_spill] sm:$0xff] }
 0x596   :  { %v1874_v44 = vmul.f32 %v3647_v60, %v1866_v57  ;;  %v5467_v60 = vld [vmem:[#allocation19_spill] sm:$0xff] }
 0x597   :  { %v1873_v35 = vmul.f32 %v1871_v61, %v1867_v7  ;;  %v1868_v20 = vadd.f32 0.5, %v1865_v22  ;;  %v5468_v7 = vld [vmem:[#allocation20_spill] sm:$0xff]  ;;  %v5469_v61 = vld [vmem:[#allocation21_spill] sm:$0xff] }
 0x598   :  { %v5473_v22 = vld [vmem:[#allocation25_spill] sm:$0xff] }
 0x599   :  { %v4884_v27 = vadd.f32 %v1874_v44, %v1873_v35  ;;  %v5470_v44 = vld [vmem:[#allocation22_spill] sm:$0xff]  ;;  %v5471_v35 = vld [vmem:[#allocation23_spill] sm:$0xff] }
 0x59b   :  { %3650 = vtanh.f32 %v4884_v27 }
 0x5a5   :  { %v3651_v51 = vpop.eup %3650 }
 0x5a6   :  { %v4887_v63 = vmul.f32 %v3651_v51, %v1868_v20  ;;  %v5474_v20 = vld [vmem:[#allocation26_spill] sm:$0xff]  ;;  %v5475_v51 = vld [vmem:[#allocation27_spill] sm:$0xff] }
 0x5a8   :  { %v4891_v2 = vpack.c.bf16 %v4887_v63, %v4887_v63 }
 0x5aa   :  { %v1883_v19 = vshrl.u32 %v4891_v2, 16  ;;  %v1879_v3 = vunpack.c.l.bf16 %v4891_v2  ;;  %v5477_v2 = vld [vmem:[#allocation29_spill] sm:$0xff] }
 0x5ac   :  { %v1885_v58 = vrot.slane %v1883_v19, 1  ;;  %v1880_v34 = vsub.f32 %v4887_v63, %v1879_v3  ;;  %v5476_v63 = vld [vmem:[#allocation28_spill] sm:$0xff]  ;;  %v5478_v19 = vld [vmem:[#allocation30_spill] sm:$0xff] }
 0x5ad   :  { %v5480_v3 = vld [vmem:[#allocation32_spill] sm:$0xff] }
 0x5ae   :  { %1920 = vmatmul.mubr.bf16.vlgmr.msra.gmra.mrb[28].mxu0 %v1885_v58  ;;  %1961 = vmatmul.mubr.bf16.vlgmr.msra.gmra.mrb[28].mxu1 %v1885_v58  ;;  %v1881_v32 = vpack.c.bf16 %v1880_v34, %v1880_v34  ;;  %v5481_v34 = vld [vmem:[#allocation33_spill] sm:$0xff] }
 0x5af   :  { %1970 = vmatpush1.bf16.msra.mxu0 %v4693_v42  ;;  %2011 = vmatpush1.bf16.msra.mxu1 %v4696_v6 }
 0x5b0   :  { %1971 = vmatprep.subr.bf16.mxu0 %v4699_v8  ;;  %2012 = vmatprep.subr.bf16.mxu1 %v4702_v9  ;;  %v2052_v57 = vshrl.u32 %v1881_v32, 16  ;;  %v5482_v32 = vld [vmem:[#allocation34_spill] sm:$0xff] }
 0x5b1   :  { %2001 = vmatprep.mubr.bf16.mxu0 %v5409_v4  ;;  %2042 = vmatprep.mubr.bf16.mxu1 %v5409_v4 }
 0x5b2   :  { %v2054_v56 = vrot.slane %v2052_v57, 1  ;;  %v5483_v57 = vld [vmem:[#allocation35_spill] sm:$0xff] }
 0x5b3   :  { %1972 = vmatpush1.bf16.msra.mxu0 %v4707_v10  ;;  %2013 = vmatpush1.bf16.msra.mxu1 %v4710_v46 }
 0x5b4   :  { %1973 = vmatprep.subr.bf16.mxu0 %v4713_v54  ;;  %2014 = vmatprep.subr.bf16.mxu1 %v4716_v55 }
 0x5b7   :  { %1974 = vmatpush1.bf16.msra.mxu0 %v4719_v39  ;;  %2015 = vmatpush1.bf16.msra.mxu1 %v4722_v48 }
 0x5b8   :  { %1975 = vmatprep.subr.bf16.mxu0 %v4725_v41  ;;  %2016 = vmatprep.subr.bf16.mxu1 %v4728_v38 }
 0x5bb   :  { %1976 = vmatpush1.bf16.msra.mxu0 %v4731_v59  ;;  %2017 = vmatpush1.bf16.msra.mxu1 %v4734_v37 }
 0x5bc   :  { %1977 = vmatprep.subr.bf16.mxu0 %v4737_v62  ;;  %2018 = vmatprep.subr.bf16.mxu1 %v4740_v43 }
 0x5bf   :  { %1978 = vmatpush1.bf16.msra.mxu0 %v4781_v0  ;;  %2019 = vmatpush1.bf16.msra.mxu1 %v4784_v45 }
 0x5c0   :  { %1979 = vmatprep.subr.bf16.mxu0 %v4787_v25  ;;  %2020 = vmatprep.subr.bf16.mxu1 %v4790_v26 }
 0x5c3   :  { %1980 = vmatpush1.bf16.msra.mxu0 %v4794_v28  ;;  %2021 = vmatpush1.bf16.msra.mxu1 %v4797_v29 }
 0x5c4   :  { %1981 = vmatprep.subr.bf16.mxu0 %v4800_v30  ;;  %2022 = vmatprep.subr.bf16.mxu1 %v4803_v31 }
 0x5c7   :  { %1982 = vmatpush1.bf16.msra.mxu0 %v4807_v33  ;;  %2023 = vmatpush1.bf16.msra.mxu1 %v4810_v36 }
 0x5c8   :  { %1983 = vmatprep.subr.bf16.mxu0 %v4813_v50  ;;  %2024 = vmatprep.subr.bf16.mxu1 %v4816_v53 }
 0x5cb   :  { %1984 = vmatpush1.bf16.msra.mxu0 %v4819_v5  ;;  %2025 = vmatpush1.bf16.msra.mxu1 %v4822_v40 }
 0x5cc   :  { %2056 = vmatprep.subr.bf16.mxu0 %v4757_v23  ;;  %2097 = vmatprep.subr.bf16.mxu1 %v4760_v24 }
 0x5ce   :  { %2002 = vmatmul.mubr.bf16.vlgmr.msra.gmra.mrb[28].mxu0 %v1885_v58  ;;  %2043 = vmatmul.mubr.bf16.vlgmr.msra.gmra.mrb[28].mxu1 %v1885_v58  ;;  %v5479_v58 = vld [vmem:[#allocation31_spill] sm:$0xff] }
 0x5cf   :  { %2057 = vmatpush1.bf16.msra.mxu0 %v4693_v42  ;;  %2098 = vmatpush1.bf16.msra.mxu1 %v4696_v6 }
 0x5d0   :  { %2058 = vmatprep.subr.bf16.mxu0 %v4699_v8  ;;  %2099 = vmatprep.subr.bf16.mxu1 %v4702_v9 }
 0x5d1   :  { %2088 = vmatprep.mubr.bf16.mxu0 %v5409_v4  ;;  %2129 = vmatprep.mubr.bf16.mxu1 %v5409_v4 }
 0x5d3   :  { %2059 = vmatpush1.bf16.msra.mxu0 %v4707_v10  ;;  %2100 = vmatpush1.bf16.msra.mxu1 %v4710_v46 }
 0x5d4   :  { %2060 = vmatprep.subr.bf16.mxu0 %v4713_v54  ;;  %2101 = vmatprep.subr.bf16.mxu1 %v4716_v55 }
 0x5d7   :  { %2061 = vmatpush1.bf16.msra.mxu0 %v4719_v39  ;;  %2102 = vmatpush1.bf16.msra.mxu1 %v4722_v48 }
 0x5d8   :  { %2062 = vmatprep.subr.bf16.mxu0 %v4725_v41  ;;  %2103 = vmatprep.subr.bf16.mxu1 %v4728_v38 }
 0x5db   :  { %2063 = vmatpush1.bf16.msra.mxu0 %v4731_v59  ;;  %2104 = vmatpush1.bf16.msra.mxu1 %v4734_v37 }
 0x5dc   :  { %2064 = vmatprep.subr.bf16.mxu0 %v4737_v62  ;;  %2105 = vmatprep.subr.bf16.mxu1 %v4740_v43 }
 0x5df   :  { %2065 = vmatpush1.bf16.msra.mxu0 %v4781_v0  ;;  %2106 = vmatpush1.bf16.msra.mxu1 %v4784_v45 }
 0x5e0   :  { %2066 = vmatprep.subr.bf16.mxu0 %v4787_v25  ;;  %2107 = vmatprep.subr.bf16.mxu1 %v4790_v26 }
 0x5e3   :  { %2067 = vmatpush1.bf16.msra.mxu0 %v4794_v28  ;;  %2108 = vmatpush1.bf16.msra.mxu1 %v4797_v29 }
 0x5e4   :  { %2068 = vmatprep.subr.bf16.mxu0 %v4800_v30  ;;  %2109 = vmatprep.subr.bf16.mxu1 %v4803_v31 }
 0x5e7   :  { %2069 = vmatpush1.bf16.msra.mxu0 %v4807_v33  ;;  %2110 = vmatpush1.bf16.msra.mxu1 %v4810_v36 }
 0x5e8   :  { %2070 = vmatprep.subr.bf16.mxu0 %v4813_v50  ;;  %2111 = vmatprep.subr.bf16.mxu1 %v4816_v53 }
 0x5eb   :  { %2071 = vmatpush1.bf16.msra.mxu0 %v4819_v5  ;;  %2112 = vmatpush1.bf16.msra.mxu1 %v4822_v40 }
 0x5ec   :  { %2186 = vmatprep.subr.bf16.mxu0 %v4596_v11  ;;  %2227 = vmatprep.subr.bf16.mxu1 %v4599_v12 }
 0x5ee   :  { %2089 = vmatmul.mubr.bf16.vlgmr.msra.gmra.mrb[28].mxu0 %v2054_v56  ;;  %2130 = vmatmul.mubr.bf16.vlgmr.msra.gmra.mrb[28].mxu1 %v2054_v56  ;;  %v5484_v56 = vld [vmem:[#allocation36_spill] sm:$0xff] }
 0x5ef   :  { %2187 = vmatpush1.bf16.msra.mxu0 %v4602_v13  ;;  %2228 = vmatpush1.bf16.msra.mxu1 %v4605_v14 }
 0x5f0   :  { %2188 = vmatprep.subr.bf16.mxu0 %v4608_v15  ;;  %2229 = vmatprep.subr.bf16.mxu1 %v4611_v16 }
 0x5f1   :  { %2218 = vmatprep.mubr.bf16.mxu0 %v5409_v4  ;;  %2259 = vmatprep.mubr.bf16.mxu1 %v5409_v4 }
 0x5f3   :  { %2189 = vmatpush1.bf16.msra.mxu0 %v4616_v17  ;;  %2230 = vmatpush1.bf16.msra.mxu1 %v4619_v18 }
 0x5f4   :  { %2190 = vmatprep.subr.bf16.mxu0 %v5467_v60  ;;  %2231 = vmatprep.subr.bf16.mxu1 %v5468_v7 }
 0x5f7   :  { %2191 = vmatpush1.bf16.msra.mxu0 %v5469_v61  ;;  %2232 = vmatpush1.bf16.msra.mxu1 %v5470_v44 }
 0x5f8   :  { %2192 = vmatprep.subr.bf16.mxu0 %v5471_v35  ;;  %2233 = vmatprep.subr.bf16.mxu1 %v5472_v21 }
 0x5fb   :  { %2193 = vmatpush1.bf16.msra.mxu0 %v5473_v22  ;;  %2234 = vmatpush1.bf16.msra.mxu1 %v5474_v20  ;;  %v5485_v20 = vld [vmem:[#allocation37_spill] sm:$0xff] }
 0x5fc   :  { %2194 = vmatprep.subr.bf16.mxu0 %v5475_v51  ;;  %2235 = vmatprep.subr.bf16.mxu1 %v5476_v63  ;;  %v5486_v51 = vld [vmem:[#allocation38_spill] sm:$0xff]  ;;  %v5487_v63 = vld [vmem:[#allocation39_spill] sm:$0xff] }
 0x5ff   :  { %2195 = vmatpush1.bf16.msra.mxu0 %v5477_v2  ;;  %2236 = vmatpush1.bf16.msra.mxu1 %v5478_v19  ;;  %v5488_v2 = vld [vmem:[#allocation40_spill] sm:$0xff]  ;;  %v5489_v19 = vld [vmem:[#allocation41_spill] sm:$0xff] }
 0x600   :  { %2196 = vmatprep.subr.bf16.mxu0 %v5479_v58  ;;  %2237 = vmatprep.subr.bf16.mxu1 %v5480_v3  ;;  %v5490_v58 = vld [vmem:[#allocation42_spill] sm:$0xff] }
 0x603   :  { %2197 = vmatpush1.bf16.msra.mxu0 %v5481_v34  ;;  %2238 = vmatpush1.bf16.msra.mxu1 %v5482_v32 }
 0x604   :  { %2198 = vmatprep.subr.bf16.mxu0 %v5483_v57  ;;  %2239 = vmatprep.subr.bf16.mxu1 %v5484_v56 }
 0x607   :  { %2199 = vmatpush1.bf16.msra.mxu0 %v5485_v20  ;;  %2240 = vmatpush1.bf16.msra.mxu1 %v5486_v51 }
 0x608   :  { %2200 = vmatprep.subr.bf16.mxu0 %v5487_v63  ;;  %2241 = vmatprep.subr.bf16.mxu1 %v5488_v2 }
 0x60b   :  { %2201 = vmatpush1.bf16.msra.mxu0 %v5489_v19  ;;  %2242 = vmatpush1.bf16.msra.mxu1 %v5490_v58 }
 0x60c   :  { %2268 = vmatprep.subr.bf16.mxu0 %v4757_v23  ;;  %2309 = vmatprep.subr.bf16.mxu1 %v4760_v24 }
 0x6c1   :  { %v2090_v32 = vpop.f32.mrb[28].mxu0  ;;  %v2131_v57 = vpop.f32.mrb[28].mxu1 }
 0x6c2   :  { %v2146_v34 = vrot.slane %v2090_v32, 4  ;;  %v2092_v56 = vpop.f32.mrb[29].mxu0  ;;  %v2133_v3 = vpop.f32.mrb[29].mxu1  ;;  %v2148_v7 = vrot.slane %v2131_v57, 4 }
 0x6c3   :  { %v2147_v20 = vrot.slane %v2092_v56, 4  ;;  %v2094_v22 = vpop.f32.mrb[30].mxu0  ;;  %v2135_v51 = vpop.f32.mrb[30].mxu1  ;;  %v2149_v21 = vrot.slane %v2133_v3, 4 }
 0x6c4   :  { %v2154_v63 = vadd.f32 %v2146_v34, %v4384_v52  ;;  %v2095_v2 = vpop.f32.mrb[31].mxu0  ;;  %v2136_v35 = vpop.f32.mrb[31].mxu1  ;;  %v2156_v32 = vadd.f32 %v2148_v7, %v4393_v49 }
 0x6c5   :  { %v2155_v19 = vadd.f32 %v2147_v20, %v4386_v47  ;;  %v2157_v61 = vadd.f32 %v2149_v21, %v4390_v1  ;;  %v2172_v20 = vrot.slane %v4884_v27, 7 }
 0x6c6   :  { %v2158_v58 = vmul.f32 0.5, %v2154_v63  ;;  %v2160_v56 = vmul.f32 0.5, %v2156_v32 }
 0x6c7   :  { %v2159_v44 = vmul.f32 0.5, %v2155_v19 }
 0x6c8   :  { %3652 = vtanh.f32 %v2158_v58 }
 0x6c9   :  { %3654 = vtanh.f32 %v2159_v44 }
 0x6ca   :  { %3656 = vtanh.f32 %v2157_v61 }
 0x6cb   :  { %3658 = vtanh.f32 %v2160_v56 }
 0x6d2   :  { %v3653_v22 = vpop.eup %3652 }
 0x6d3   :  { %v2164_v51 = vmul.f32 0.5, %v3653_v22  ;;  %v3655_v60 = vpop.eup %3654 }
 0x6d4   :  { %v2165_v2 = vmul.f32 0.5, %v3655_v60  ;;  %v3657_v35 = vpop.eup %3656 }
 0x6d5   :  { %v2167_v34 = vadd.f32 0.5, %v2164_v51  ;;  %v3659_v61 = vpop.eup %3658 }
 0x6d6   :  { %v2168_v3 = vadd.f32 0.5, %v2165_v2  ;;  %v2166_v44 = vmul.f32 0.5, %v3659_v61  ;;  %v5498_v2 = vld [vmem:[#allocation26_spill] sm:$0xff] }
 0x6d7   :  { %v2175_v63 = vmul.f32 %v3657_v35, %v2167_v34  ;;  %v5493_v34 = vld [vmem:[#allocation21_spill] sm:$0xff]  ;;  %v5499_v35 = vld [vmem:[#allocation27_spill] sm:$0xff]  ;;  %v5506_v61 = vld [vmem:[#allocation34_spill] sm:$0xff] }
 0x6d8   :  { %v2174_v19 = vmul.f32 %v2172_v20, %v2168_v3  ;;  %v2169_v7 = vadd.f32 0.5, %v2166_v44  ;;  %v5502_v3 = vld [vmem:[#allocation30_spill] sm:$0xff]  ;;  %v5503_v20 = vld [vmem:[#allocation31_spill] sm:$0xff] }
 0x6d9   :  { %v5507_v44 = vld [vmem:[#allocation35_spill] sm:$0xff] }
 0x6da   :  { %v5003_v58 = vadd.f32 %v2175_v63, %v2174_v19  ;;  %v5504_v63 = vld [vmem:[#allocation32_spill] sm:$0xff]  ;;  %v5505_v19 = vld [vmem:[#allocation33_spill] sm:$0xff] }
 0x6dc   :  { %3660 = vtanh.f32 %v5003_v58 }
 0x6e6   :  { %v3661_v21 = vpop.eup %3660 }
 0x6e7   :  { %v5006_v57 = vmul.f32 %v3661_v21, %v2169_v7  ;;  %v5508_v7 = vld [vmem:[#allocation36_spill] sm:$0xff]  ;;  %v5509_v21 = vld [vmem:[#allocation37_spill] sm:$0xff] }
 0x6e9   :  { %v5010_v32 = vpack.c.bf16 %v5006_v57, %v5006_v57 }
 0x6eb   :  { %v2184_v60 = vrot.slane %v5010_v32, 2  ;;  %v2180_v27 = vunpack.c.l.bf16 %v5010_v32  ;;  %v5511_v32 = vld [vmem:[#allocation39_spill] sm:$0xff] }
 0x6ed   :  { %2219 = vmatmul.mubr.bf16.vlgmr.msra.gmra.mrb[32].mxu0 %v2184_v60  ;;  %2260 = vmatmul.mubr.bf16.vlgmr.msra.gmra.mrb[32].mxu1 %v2184_v60  ;;  %v2181_v56 = vsub.f32 %v5006_v57, %v2180_v27  ;;  %v5510_v57 = vld [vmem:[#allocation38_spill] sm:$0xff]  ;;  %v5513_v27 = vld [vmem:[#allocation41_spill] sm:$0xff] }
 0x6ee   :  { %2269 = vmatpush1.bf16.msra.mxu0 %v4693_v42  ;;  %2310 = vmatpush1.bf16.msra.mxu1 %v4696_v6 }
 0x6ef   :  { %2270 = vmatprep.subr.bf16.mxu0 %v4699_v8  ;;  %2311 = vmatprep.subr.bf16.mxu1 %v4702_v9  ;;  %v2182_v22 = vpack.c.bf16 %v2181_v56, %v2181_v56  ;;  %v5514_v56 = vld [vmem:[#allocation42_spill] sm:$0xff] }
 0x6f0   :  { %2300 = vmatprep.mubr.bf16.mxu0 %v5409_v4  ;;  %2341 = vmatprep.mubr.bf16.mxu1 %v5409_v4 }
 0x6f1   :  { %v2351_v51 = vrot.slane %v2182_v22, 2 }
 0x6f2   :  { %2271 = vmatpush1.bf16.msra.mxu0 %v4707_v10  ;;  %2312 = vmatpush1.bf16.msra.mxu1 %v4710_v46 }
 0x6f3   :  { %2272 = vmatprep.subr.bf16.mxu0 %v4713_v54  ;;  %2313 = vmatprep.subr.bf16.mxu1 %v4716_v55 }
 0x6f6   :  { %2273 = vmatpush1.bf16.msra.mxu0 %v4719_v39  ;;  %2314 = vmatpush1.bf16.msra.mxu1 %v4722_v48 }
 0x6f7   :  { %2274 = vmatprep.subr.bf16.mxu0 %v4725_v41  ;;  %2315 = vmatprep.subr.bf16.mxu1 %v4728_v38 }
 0x6fa   :  { %2275 = vmatpush1.bf16.msra.mxu0 %v4731_v59  ;;  %2316 = vmatpush1.bf16.msra.mxu1 %v4734_v37 }
 0x6fb   :  { %2276 = vmatprep.subr.bf16.mxu0 %v4737_v62  ;;  %2317 = vmatprep.subr.bf16.mxu1 %v4740_v43 }
 0x6fe   :  { %2277 = vmatpush1.bf16.msra.mxu0 %v4781_v0  ;;  %2318 = vmatpush1.bf16.msra.mxu1 %v4784_v45 }
 0x6ff   :  { %2278 = vmatprep.subr.bf16.mxu0 %v4787_v25  ;;  %2319 = vmatprep.subr.bf16.mxu1 %v4790_v26 }
 0x702   :  { %2279 = vmatpush1.bf16.msra.mxu0 %v4794_v28  ;;  %2320 = vmatpush1.bf16.msra.mxu1 %v4797_v29 }
 0x703   :  { %2280 = vmatprep.subr.bf16.mxu0 %v4800_v30  ;;  %2321 = vmatprep.subr.bf16.mxu1 %v4803_v31 }
 0x706   :  { %2281 = vmatpush1.bf16.msra.mxu0 %v4807_v33  ;;  %2322 = vmatpush1.bf16.msra.mxu1 %v4810_v36 }
 0x707   :  { %2282 = vmatprep.subr.bf16.mxu0 %v4813_v50  ;;  %2323 = vmatprep.subr.bf16.mxu1 %v4816_v53 }
 0x70a   :  { %2283 = vmatpush1.bf16.msra.mxu0 %v4819_v5  ;;  %2324 = vmatpush1.bf16.msra.mxu1 %v4822_v40 }
 0x70b   :  { %2353 = vmatprep.subr.bf16.mxu0 %v4757_v23  ;;  %2394 = vmatprep.subr.bf16.mxu1 %v4760_v24 }
 0x70d   :  { %2301 = vmatmul.mubr.bf16.vlgmr.msra.gmra.mrb[32].mxu0 %v2184_v60  ;;  %2342 = vmatmul.mubr.bf16.vlgmr.msra.gmra.mrb[32].mxu1 %v2184_v60  ;;  %v5512_v60 = vld [vmem:[#allocation40_spill] sm:$0xff] }
 0x70e   :  { %2354 = vmatpush1.bf16.msra.mxu0 %v4693_v42  ;;  %2395 = vmatpush1.bf16.msra.mxu1 %v4696_v6 }
 0x70f   :  { %2355 = vmatprep.subr.bf16.mxu0 %v4699_v8  ;;  %2396 = vmatprep.subr.bf16.mxu1 %v4702_v9 }
 0x710   :  { %2385 = vmatprep.mubr.bf16.mxu0 %v5409_v4  ;;  %2426 = vmatprep.mubr.bf16.mxu1 %v5409_v4 }
 0x712   :  { %2356 = vmatpush1.bf16.msra.mxu0 %v4707_v10  ;;  %2397 = vmatpush1.bf16.msra.mxu1 %v4710_v46 }
 0x713   :  { %2357 = vmatprep.subr.bf16.mxu0 %v4713_v54  ;;  %2398 = vmatprep.subr.bf16.mxu1 %v4716_v55 }
 0x716   :  { %2358 = vmatpush1.bf16.msra.mxu0 %v4719_v39  ;;  %2399 = vmatpush1.bf16.msra.mxu1 %v4722_v48 }
 0x717   :  { %2359 = vmatprep.subr.bf16.mxu0 %v4725_v41  ;;  %2400 = vmatprep.subr.bf16.mxu1 %v4728_v38 }
 0x71a   :  { %2360 = vmatpush1.bf16.msra.mxu0 %v4731_v59  ;;  %2401 = vmatpush1.bf16.msra.mxu1 %v4734_v37 }
 0x71b   :  { %2361 = vmatprep.subr.bf16.mxu0 %v4737_v62  ;;  %2402 = vmatprep.subr.bf16.mxu1 %v4740_v43 }
 0x71e   :  { %2362 = vmatpush1.bf16.msra.mxu0 %v4781_v0  ;;  %2403 = vmatpush1.bf16.msra.mxu1 %v4784_v45 }
 0x71f   :  { %2363 = vmatprep.subr.bf16.mxu0 %v4787_v25  ;;  %2404 = vmatprep.subr.bf16.mxu1 %v4790_v26 }
 0x722   :  { %2364 = vmatpush1.bf16.msra.mxu0 %v4794_v28  ;;  %2405 = vmatpush1.bf16.msra.mxu1 %v4797_v29 }
 0x723   :  { %2365 = vmatprep.subr.bf16.mxu0 %v4800_v30  ;;  %2406 = vmatprep.subr.bf16.mxu1 %v4803_v31 }
 0x726   :  { %2366 = vmatpush1.bf16.msra.mxu0 %v4807_v33  ;;  %2407 = vmatpush1.bf16.msra.mxu1 %v4810_v36 }
 0x727   :  { %2367 = vmatprep.subr.bf16.mxu0 %v4813_v50  ;;  %2408 = vmatprep.subr.bf16.mxu1 %v4816_v53 }
 0x72a   :  { %2368 = vmatpush1.bf16.msra.mxu0 %v4819_v5  ;;  %2409 = vmatpush1.bf16.msra.mxu1 %v4822_v40 }
 0x72b   :  { %2485 = vmatprep.subr.bf16.mxu0 %v4596_v11  ;;  %2526 = vmatprep.subr.bf16.mxu1 %v4599_v12  ;;  %v5491_v11 = vld [vmem:[#allocation19_spill] sm:$0xff]  ;;  %v5492_v12 = vld [vmem:[#allocation20_spill] sm:$0xff] }
 0x72d   :  { %2386 = vmatmul.mubr.bf16.vlgmr.msra.gmra.mrb[32].mxu0 %v2351_v51  ;;  %2427 = vmatmul.mubr.bf16.vlgmr.msra.gmra.mrb[32].mxu1 %v2351_v51 }
 0x72e   :  { %2486 = vmatpush1.bf16.msra.mxu0 %v4602_v13  ;;  %2527 = vmatpush1.bf16.msra.mxu1 %v4605_v14  ;;  %v5494_v13 = vld [vmem:[#allocation22_spill] sm:$0xff]  ;;  %v5495_v14 = vld [vmem:[#allocation23_spill] sm:$0xff] }
 0x72f   :  { %2487 = vmatprep.subr.bf16.mxu0 %v4608_v15  ;;  %2528 = vmatprep.subr.bf16.mxu1 %v4611_v16  ;;  %v5496_v15 = vld [vmem:[#allocation24_spill] sm:$0xff]  ;;  %v5497_v16 = vld [vmem:[#allocation25_spill] sm:$0xff] }
 0x730   :  { %2517 = vmatprep.mubr.bf16.mxu0 %v5409_v4  ;;  %2558 = vmatprep.mubr.bf16.mxu1 %v5409_v4 }
 0x732   :  { %2488 = vmatpush1.bf16.msra.mxu0 %v4616_v17  ;;  %2529 = vmatpush1.bf16.msra.mxu1 %v4619_v18  ;;  %v5500_v17 = vld [vmem:[#allocation28_spill] sm:$0xff]  ;;  %v5501_v18 = vld [vmem:[#allocation29_spill] sm:$0xff] }
 0x733   :  { %2489 = vmatprep.subr.bf16.mxu0 %v5491_v11  ;;  %2530 = vmatprep.subr.bf16.mxu1 %v5492_v12 }
 0x736   :  { %2490 = vmatpush1.bf16.msra.mxu0 %v5493_v34  ;;  %2531 = vmatpush1.bf16.msra.mxu1 %v5494_v13 }
 0x737   :  { %2491 = vmatprep.subr.bf16.mxu0 %v5495_v14  ;;  %2532 = vmatprep.subr.bf16.mxu1 %v5496_v15 }
 0x73a   :  { %2492 = vmatpush1.bf16.msra.mxu0 %v5497_v16  ;;  %2533 = vmatpush1.bf16.msra.mxu1 %v5498_v2 }
 0x73b   :  { %2493 = vmatprep.subr.bf16.mxu0 %v5499_v35  ;;  %2534 = vmatprep.subr.bf16.mxu1 %v5500_v17 }
 0x73e   :  { %2494 = vmatpush1.bf16.msra.mxu0 %v5501_v18  ;;  %2535 = vmatpush1.bf16.msra.mxu1 %v5502_v3 }
 0x73f   :  { %2495 = vmatprep.subr.bf16.mxu0 %v5503_v20  ;;  %2536 = vmatprep.subr.bf16.mxu1 %v5504_v63 }
 0x742   :  { %2496 = vmatpush1.bf16.msra.mxu0 %v5505_v19  ;;  %2537 = vmatpush1.bf16.msra.mxu1 %v5506_v61 }
 0x743   :  { %2497 = vmatprep.subr.bf16.mxu0 %v5507_v44  ;;  %2538 = vmatprep.subr.bf16.mxu1 %v5508_v7 }
 0x746   :  { %2498 = vmatpush1.bf16.msra.mxu0 %v5509_v21  ;;  %2539 = vmatpush1.bf16.msra.mxu1 %v5510_v57 }
 0x747   :  { %2499 = vmatprep.subr.bf16.mxu0 %v5511_v32  ;;  %2540 = vmatprep.subr.bf16.mxu1 %v5512_v60 }
 0x74a   :  { %2500 = vmatpush1.bf16.msra.mxu0 %v5513_v27  ;;  %2541 = vmatpush1.bf16.msra.mxu1 %v5514_v56 }
 0x74b   :  { %2567 = vmatprep.subr.bf16.mxu0 %v4757_v23  ;;  %2608 = vmatprep.subr.bf16.mxu1 %v4760_v24 }
 0x800   :  { %v2387_v22 = vpop.f32.mrb[32].mxu0  ;;  %v2428_v51 = vpop.f32.mrb[32].mxu1 }
 0x801   :  { %v2443_v11 = vrot.slane %v2387_v22, 3  ;;  %v2389_v12 = vpop.f32.mrb[33].mxu0  ;;  %v2430_v34 = vpop.f32.mrb[33].mxu1  ;;  %v2445_v19 = vrot.slane %v2428_v51, 3 }
 0x802   :  { %v2444_v13 = vrot.slane %v2389_v12, 3  ;;  %v2391_v14 = vpop.f32.mrb[34].mxu0  ;;  %v2432_v15 = vpop.f32.mrb[34].mxu1  ;;  %v2446_v2 = vrot.slane %v2430_v34, 3 }
 0x803   :  { %v2451_v16 = vadd.f32 %v2443_v11, %v4384_v52  ;;  %v2392_v35 = vpop.f32.mrb[35].mxu0  ;;  %v2433_v17 = vpop.f32.mrb[35].mxu1  ;;  %v2453_v22 = vadd.f32 %v2445_v19, %v4393_v49 }
 0x804   :  { %v2452_v18 = vadd.f32 %v2444_v13, %v4386_v47  ;;  %v2454_v63 = vadd.f32 %v2446_v2, %v4390_v1  ;;  %v2469_v13 = vrot.slane %v5003_v58, 7 }
 0x805   :  { %v2455_v3 = vmul.f32 0.5, %v2451_v16  ;;  %v2457_v12 = vmul.f32 0.5, %v2453_v22 }
 0x806   :  { %v2456_v20 = vmul.f32 0.5, %v2452_v18 }
 0x807   :  { %3662 = vtanh.f32 %v2455_v3 }
 0x808   :  { %3664 = vtanh.f32 %v2456_v20 }
 0x809   :  { %3666 = vtanh.f32 %v2454_v63 }
 0x80a   :  { %3668 = vtanh.f32 %v2457_v12 }
 0x811   :  { %v3663_v14 = vpop.eup %3662 }
 0x812   :  { %v2461_v15 = vmul.f32 0.5, %v3663_v14  ;;  %v3665_v56 = vpop.eup %3664 }
 0x813   :  { %v2462_v34 = vmul.f32 0.5, %v3665_v56  ;;  %v3667_v35 = vpop.eup %3666 }
 0x814   :  { %v2464_v11 = vadd.f32 0.5, %v2461_v15  ;;  %v3669_v51 = vpop.eup %3668 }
 0x815   :  { %v2465_v17 = vadd.f32 0.5, %v2462_v34  ;;  %v2463_v2 = vmul.f32 0.5, %v3669_v51 }
 0x816   :  { %v2472_v16 = vmul.f32 %v3667_v35, %v2464_v11 }
 0x817   :  { %v2471_v18 = vmul.f32 %v2469_v13, %v2465_v17  ;;  %v2466_v20 = vadd.f32 0.5, %v2463_v2 }
 0x819   :  { %v5122_v3 = vadd.f32 %v2472_v16, %v2471_v18 }
 0x81b   :  { %3670 = vtanh.f32 %v5122_v3 }
 0x825   :  { %v3671_v63 = vpop.eup %3670 }
 0x826   :  { %v5125_v19 = vmul.f32 %v3671_v63, %v2466_v20 }
 0x828   :  { %v5129_v22 = vpack.c.bf16 %v5125_v19, %v5125_v19 }
 0x82a   :  { %v2481_v56 = vshrl.u32 %v5129_v22, 16 }
 0x82c   :  { %v2483_v12 = vrot.slane %v2481_v56, 2 }
 0x82e   :  { %2518 = vmatmul.mubr.bf16.vlgmr.msra.gmra.mrb[36].mxu0 %v2483_v12  ;;  %2559 = vmatmul.mubr.bf16.vlgmr.msra.gmra.mrb[36].mxu1 %v2483_v12 }
 0x82f   :  { %2568 = vmatpush1.bf16.msra.mxu0 %v4693_v42  ;;  %2609 = vmatpush1.bf16.msra.mxu1 %v4696_v6 }
 0x830   :  { %2569 = vmatprep.subr.bf16.mxu0 %v4699_v8  ;;  %2610 = vmatprep.subr.bf16.mxu1 %v4702_v9 }
 0x831   :  { %2599 = vmatprep.mubr.bf16.mxu0 %v5409_v4  ;;  %2640 = vmatprep.mubr.bf16.mxu1 %v5409_v4 }
 0x833   :  { %2570 = vmatpush1.bf16.msra.mxu0 %v4707_v10  ;;  %2611 = vmatpush1.bf16.msra.mxu1 %v4710_v46 }
 0x834   :  { %2571 = vmatprep.subr.bf16.mxu0 %v4713_v54  ;;  %2612 = vmatprep.subr.bf16.mxu1 %v4716_v55 }
 0x837   :  { %2572 = vmatpush1.bf16.msra.mxu0 %v4719_v39  ;;  %2613 = vmatpush1.bf16.msra.mxu1 %v4722_v48 }
 0x838   :  { %2573 = vmatprep.subr.bf16.mxu0 %v4725_v41  ;;  %2614 = vmatprep.subr.bf16.mxu1 %v4728_v38 }
 0x83b   :  { %2574 = vmatpush1.bf16.msra.mxu0 %v4731_v59  ;;  %2615 = vmatpush1.bf16.msra.mxu1 %v4734_v37 }
 0x83c   :  { %2575 = vmatprep.subr.bf16.mxu0 %v4737_v62  ;;  %2616 = vmatprep.subr.bf16.mxu1 %v4740_v43 }
 0x83f   :  { %2576 = vmatpush1.bf16.msra.mxu0 %v4781_v0  ;;  %2617 = vmatpush1.bf16.msra.mxu1 %v4784_v45 }
 0x840   :  { %2577 = vmatprep.subr.bf16.mxu0 %v4787_v25  ;;  %2618 = vmatprep.subr.bf16.mxu1 %v4790_v26 }
 0x843   :  { %2578 = vmatpush1.bf16.msra.mxu0 %v4794_v28  ;;  %2619 = vmatpush1.bf16.msra.mxu1 %v4797_v29 }
 0x844   :  { %2579 = vmatprep.subr.bf16.mxu0 %v4800_v30  ;;  %2620 = vmatprep.subr.bf16.mxu1 %v4803_v31 }
 0x847   :  { %2580 = vmatpush1.bf16.msra.mxu0 %v4807_v33  ;;  %2621 = vmatpush1.bf16.msra.mxu1 %v4810_v36 }
 0x848   :  { %2581 = vmatprep.subr.bf16.mxu0 %v4813_v50  ;;  %2622 = vmatprep.subr.bf16.mxu1 %v4816_v53 }
 0x84b   :  { %2582 = vmatpush1.bf16.msra.mxu0 %v4819_v5  ;;  %2623 = vmatpush1.bf16.msra.mxu1 %v4822_v40 }
 0x84c   :  { %2654 = vmatprep.subr.bf16.mxu0 %v4757_v23  ;;  %2695 = vmatprep.subr.bf16.mxu1 %v4760_v24  ;;  %v3767_v23 = vld [vmem:[#allocation8 + $0x48] ss:$16 sps:$4 sm:$0xff]   ;;  %v3768_v24 = vld [vmem:[#allocation8 + $0x64] ss:$16 sps:$4 sm:$0xff]  }
 0x84e   :  { %2600 = vmatmul.mubr.bf16.vlgmr.msra.gmra.mrb[36].mxu0 %v2483_v12  ;;  %2641 = vmatmul.mubr.bf16.vlgmr.msra.gmra.mrb[36].mxu1 %v2483_v12  ;;  %v2770_v12 = vrot.slane %v5122_v3, 7  ;;  %v5236_v3 = vld [vmem:[#allocation7] ss:$16 sps:$4 sm:$0xff]  }
 0x84f   :  { %2655 = vmatpush1.bf16.msra.mxu0 %v4693_v42  ;;  %2696 = vmatpush1.bf16.msra.mxu1 %v4696_v6  ;;  %v2477_v42 = vunpack.c.l.bf16 %v5129_v22 }
 0x850   :  { %2656 = vmatprep.subr.bf16.mxu0 %v4699_v8  ;;  %2697 = vmatprep.subr.bf16.mxu1 %v4702_v9 }
 0x851   :  { %2686 = vmatprep.mubr.bf16.mxu0 %v5409_v4  ;;  %2727 = vmatprep.mubr.bf16.mxu1 %v5409_v4  ;;  %v2478_v6 = vsub.f32 %v5125_v19, %v2477_v42 }
 0x853   :  { %2657 = vmatpush1.bf16.msra.mxu0 %v4707_v10  ;;  %2698 = vmatpush1.bf16.msra.mxu1 %v4710_v46  ;;  %v2479_v8 = vpack.c.bf16 %v2478_v6, %v2478_v6  ;;  %v3756_v46 = vld [vmem:[#allocation8 + $0x4] ss:$16 sps:$4 sm:$0xff]  }
 0x854   :  { %2658 = vmatprep.subr.bf16.mxu0 %v4713_v54  ;;  %2699 = vmatprep.subr.bf16.mxu1 %v4716_v55  ;;  %v3757_v54 = vld [vmem:[#allocation8 + $0xc] ss:$16 sps:$4 sm:$0xff]   ;;  %v3758_v55 = vld [vmem:[#allocation8] ss:$16 sps:$4 sm:$0xff]  }
 0x855   :  { %v2650_v9 = vshrl.u32 %v2479_v8, 16 }
 0x857   :  { %2659 = vmatpush1.bf16.msra.mxu0 %v4719_v39  ;;  %2700 = vmatpush1.bf16.msra.mxu1 %v4722_v48  ;;  %v2652_v10 = vrot.slane %v2650_v9, 2  ;;  %v3759_v39 = vld [vmem:[#allocation8 + $0x8] ss:$16 sps:$4 sm:$0xff]   ;;  %v3760_v48 = vld [vmem:[#allocation8 + $0x24] ss:$16 sps:$4 sm:$0xff]  }
 0x858   :  { %2660 = vmatprep.subr.bf16.mxu0 %v4725_v41  ;;  %2701 = vmatprep.subr.bf16.mxu1 %v4728_v38  ;;  %v3761_v41 = vld [vmem:[#allocation8 + $0x2c] ss:$16 sps:$4 sm:$0xff]   ;;  %v3762_v38 = vld [vmem:[#allocation8 + $0x20] ss:$16 sps:$4 sm:$0xff]  }
 0x85b   :  { %2661 = vmatpush1.bf16.msra.mxu0 %v4731_v59  ;;  %2702 = vmatpush1.bf16.msra.mxu1 %v4734_v37  ;;  %v3763_v59 = vld [vmem:[#allocation8 + $0x28] ss:$16 sps:$4 sm:$0xff]   ;;  %v3764_v37 = vld [vmem:[#allocation8 + $0x44] ss:$16 sps:$4 sm:$0xff]  }
 0x85c   :  { %2662 = vmatprep.subr.bf16.mxu0 %v4737_v62  ;;  %2703 = vmatprep.subr.bf16.mxu1 %v4740_v43  ;;  %v3765_v62 = vld [vmem:[#allocation8 + $0x4c] ss:$16 sps:$4 sm:$0xff]   ;;  %v3766_v43 = vld [vmem:[#allocation8 + $0x40] ss:$16 sps:$4 sm:$0xff]  }
 0x85f   :  { %2663 = vmatpush1.bf16.msra.mxu0 %v4781_v0  ;;  %2704 = vmatpush1.bf16.msra.mxu1 %v4784_v45  ;;  %v3769_v0 = vld [vmem:[#allocation8 + $0x6c] ss:$16 sps:$4 sm:$0xff]   ;;  %v3770_v45 = vld [vmem:[#allocation8 + $0x60] ss:$16 sps:$4 sm:$0xff]  }
 0x860   :  { %2664 = vmatprep.subr.bf16.mxu0 %v4787_v25  ;;  %2705 = vmatprep.subr.bf16.mxu1 %v4790_v26  ;;  %v3771_v25 = vld [vmem:[#allocation8 + $0x68] ss:$16 sps:$4 sm:$0xff]   ;;  %v3772_v26 = vld [vmem:[#allocation8 + $0x84] ss:$16 sps:$4 sm:$0xff]  }
 0x863   :  { %2665 = vmatpush1.bf16.msra.mxu0 %v4794_v28  ;;  %2706 = vmatpush1.bf16.msra.mxu1 %v4797_v29  ;;  %v3773_v28 = vld [vmem:[#allocation8 + $0x8c] ss:$16 sps:$4 sm:$0xff]   ;;  %v3774_v29 = vld [vmem:[#allocation8 + $0x80] ss:$16 sps:$4 sm:$0xff]  }
 0x864   :  { %2666 = vmatprep.subr.bf16.mxu0 %v4800_v30  ;;  %2707 = vmatprep.subr.bf16.mxu1 %v4803_v31  ;;  %v3775_v30 = vld [vmem:[#allocation8 + $0x88] ss:$16 sps:$4 sm:$0xff]   ;;  %v3776_v31 = vld [vmem:[#allocation8 + $0xa4] ss:$16 sps:$4 sm:$0xff]  }
 0x867   :  { %2667 = vmatpush1.bf16.msra.mxu0 %v4807_v33  ;;  %2708 = vmatpush1.bf16.msra.mxu1 %v4810_v36  ;;  %v3777_v33 = vld [vmem:[#allocation8 + $0xac] ss:$16 sps:$4 sm:$0xff]   ;;  %v3778_v36 = vld [vmem:[#allocation8 + $0xa0] ss:$16 sps:$4 sm:$0xff]  }
 0x868   :  { %2668 = vmatprep.subr.bf16.mxu0 %v4813_v50  ;;  %2709 = vmatprep.subr.bf16.mxu1 %v4816_v53  ;;  %v5515_v50 = vld [vmem:[#allocation42_spill] sm:$0xff] }
 0x869   :  { %v5211_v53 = vld [vmem:[#allocation7 + $0x4] ss:$16 sps:$4 sm:$0xff]  }
 0x86b   :  { %2669 = vmatpush1.bf16.msra.mxu0 %v4819_v5  ;;  %2710 = vmatpush1.bf16.msra.mxu1 %v4822_v40  ;;  %v5214_v5 = vld [vmem:[#allocation7 + $0xc] ss:$16 sps:$4 sm:$0xff]  }
 0x86c   :  { %2784 = vmatprep.subr.bf16.mxu0 %v3756_v46  ;;  %2825 = vmatprep.subr.bf16.mxu1 %v3757_v54 }
 0x86e   :  { %2687 = vmatmul.mubr.bf16.vlgmr.msra.gmra.mrb[36].mxu0 %v2652_v10  ;;  %2728 = vmatmul.mubr.bf16.vlgmr.msra.gmra.mrb[36].mxu1 %v2652_v10 }
 0x86f   :  { %2785 = vmatpush1.bf16.msra.mxu0 %v3758_v55  ;;  %2826 = vmatpush1.bf16.msra.mxu1 %v3759_v39 }
 0x870   :  { %2786 = vmatprep.subr.bf16.mxu0 %v3760_v48  ;;  %2827 = vmatprep.subr.bf16.mxu1 %v3761_v41  ;;  %v5239_v41 = vld [vmem:[#allocation7 + $0x8] ss:$16 sps:$4 sm:$0xff]  }
 0x871   :  { %2816 = vmatprep.mubr.bf16.mxu0 %v5409_v4  ;;  %2857 = vmatprep.mubr.bf16.mxu1 %v5409_v4 }
 0x873   :  { %2787 = vmatpush1.bf16.msra.mxu0 %v3762_v38  ;;  %2828 = vmatpush1.bf16.msra.mxu1 %v3763_v59  ;;  %v5242_v38 = vld [vmem:[#allocation7 + $0x24] ss:$16 sps:$4 sm:$0xff]   ;;  %v3784_v59 = vld [vmem:[#allocation7 + $0x2c] ss:$16 sps:$4 sm:$0xff]  }
 0x874   :  { %2788 = vmatprep.subr.bf16.mxu0 %v3764_v37  ;;  %2829 = vmatprep.subr.bf16.mxu1 %v3765_v62  ;;  %v3785_v37 = vld [vmem:[#allocation7 + $0x20] ss:$16 sps:$4 sm:$0xff]   ;;  %v3786_v62 = vld [vmem:[#allocation7 + $0x28] ss:$16 sps:$4 sm:$0xff]  }
 0x877   :  { %2789 = vmatpush1.bf16.msra.mxu0 %v3766_v43  ;;  %2830 = vmatpush1.bf16.msra.mxu1 %v3767_v23  ;;  %v3787_v43 = vld [vmem:[#allocation7 + $0x44] ss:$16 sps:$4 sm:$0xff]   ;;  %v3788_v23 = vld [vmem:[#allocation7 + $0x4c] ss:$16 sps:$4 sm:$0xff]  }
 0x878   :  { %2790 = vmatprep.subr.bf16.mxu0 %v3768_v24  ;;  %2831 = vmatprep.subr.bf16.mxu1 %v3769_v0  ;;  %v3789_v24 = vld [vmem:[#allocation7 + $0x40] ss:$16 sps:$4 sm:$0xff]   ;;  %v3790_v0 = vld [vmem:[#allocation7 + $0x48] ss:$16 sps:$4 sm:$0xff]  }
 0x87b   :  { %2791 = vmatpush1.bf16.msra.mxu0 %v3770_v45  ;;  %2832 = vmatpush1.bf16.msra.mxu1 %v3771_v25  ;;  %v3791_v45 = vld [vmem:[#allocation7 + $0x64] ss:$16 sps:$4 sm:$0xff]   ;;  %v3792_v25 = vld [vmem:[#allocation7 + $0x6c] ss:$16 sps:$4 sm:$0xff]  }
 0x87c   :  { %2792 = vmatprep.subr.bf16.mxu0 %v3772_v26  ;;  %2833 = vmatprep.subr.bf16.mxu1 %v3773_v28  ;;  %v3793_v26 = vld [vmem:[#allocation7 + $0x60] ss:$16 sps:$4 sm:$0xff]   ;;  %v3794_v28 = vld [vmem:[#allocation7 + $0x68] ss:$16 sps:$4 sm:$0xff]  }
 0x87f   :  { %2793 = vmatpush1.bf16.msra.mxu0 %v3774_v29  ;;  %2834 = vmatpush1.bf16.msra.mxu1 %v3775_v30  ;;  %v3795_v29 = vld [vmem:[#allocation7 + $0x84] ss:$16 sps:$4 sm:$0xff]   ;;  %v3796_v30 = vld [vmem:[#allocation7 + $0x8c] ss:$16 sps:$4 sm:$0xff]  }
 0x880   :  { %2794 = vmatprep.subr.bf16.mxu0 %v3776_v31  ;;  %2835 = vmatprep.subr.bf16.mxu1 %v3777_v33  ;;  %v3797_v31 = vld [vmem:[#allocation7 + $0x80] ss:$16 sps:$4 sm:$0xff]   ;;  %v3798_v33 = vld [vmem:[#allocation7 + $0x88] ss:$16 sps:$4 sm:$0xff]  }
 0x883   :  { %2795 = vmatpush1.bf16.msra.mxu0 %v3778_v36  ;;  %2836 = vmatpush1.bf16.msra.mxu1 %v5506_v61  ;;  %v3799_v36 = vld [vmem:[#allocation7 + $0xa4] ss:$16 sps:$4 sm:$0xff]  }
 0x884   :  { %2796 = vmatprep.subr.bf16.mxu0 %v5507_v44  ;;  %2837 = vmatprep.subr.bf16.mxu1 %v5508_v7 }
 0x887   :  { %2797 = vmatpush1.bf16.msra.mxu0 %v5509_v21  ;;  %2838 = vmatpush1.bf16.msra.mxu1 %v5510_v57 }
 0x888   :  { %2798 = vmatprep.subr.bf16.mxu0 %v5511_v32  ;;  %2839 = vmatprep.subr.bf16.mxu1 %v5512_v60 }
 0x88b   :  { %2799 = vmatpush1.bf16.msra.mxu0 %v5513_v27  ;;  %2840 = vmatpush1.bf16.msra.mxu1 %v5515_v50  ;;  %v3800_v50 = vld [vmem:[#allocation7 + $0xac] ss:$16 sps:$4 sm:$0xff]  }
 0x88c   :  { %2866 = vmatprep.subr.bf16.mxu0 %v5211_v53  ;;  %2907 = vmatprep.subr.bf16.mxu1 %v5214_v5 }
 0x941   :  { %v2688_v40 = vpop.f32.mrb[36].mxu0  ;;  %v2729_v58 = vpop.f32.mrb[36].mxu1 }
 0x942   :  { %v2744_v61 = vrot.slane %v2688_v40, 2  ;;  %v2690_v44 = vpop.f32.mrb[37].mxu0  ;;  %v2731_v7 = vpop.f32.mrb[37].mxu1  ;;  %v2746_v13 = vrot.slane %v2729_v58, 2  ;;  %v3801_v40 = vld [vmem:[#allocation7 + $0xa0] ss:$16 sps:$4 sm:$0xff]  }
 0x943   :  { %v2745_v21 = vrot.slane %v2690_v44, 2  ;;  %v2692_v57 = vpop.f32.mrb[38].mxu0  ;;  %v2733_v32 = vpop.f32.mrb[38].mxu1  ;;  %v2747_v27 = vrot.slane %v2731_v7, 2  ;;  %v3802_v58 = vld [vmem:[#allocation7 + $0xa8] ss:$16 sps:$4 sm:$0xff]  }
 0x944   :  { %v2752_v60 = vadd.f32 %v2744_v61, %v4384_v52  ;;  %v2693_v14 = vpop.f32.mrb[39].mxu0  ;;  %v2734_v15 = vpop.f32.mrb[39].mxu1  ;;  %v2754_v16 = vadd.f32 %v2746_v13, %v4393_v49  ;;  %v3803_v61 = vld [vmem:[#allocation7 + $0xc4] ss:$16 sps:$4 sm:$0xff]   ;;  %v3804_v44 = vld [vmem:[#allocation7 + $0xcc] ss:$16 sps:$4 sm:$0xff]  }
 0x945   :  { %v2753_v11 = vadd.f32 %v2745_v21, %v4386_v47  ;;  %v2755_v17 = vadd.f32 %v2747_v27, %v4390_v1  ;;  %v3805_v7 = vld [vmem:[#allocation7 + $0xc0] ss:$16 sps:$4 sm:$0xff]   ;;  %v3806_v21 = vld [vmem:[#allocation7 + $0xc8] ss:$16 sps:$4 sm:$0xff]   ;;  %v3807_v57 = vld [vmem:[#allocation7 + $0xe4] ss:$16 sps:$4 sm:$0xff]  }
 0x946   :  { %v2756_v34 = vmul.f32 0.5, %v2752_v60  ;;  %v2758_v18 = vmul.f32 0.5, %v2754_v16  ;;  %v3808_v32 = vld [vmem:[#allocation7 + $0xec] ss:$16 sps:$4 sm:$0xff]   ;;  %v3809_v60 = vld [vmem:[#allocation7 + $0xe0] ss:$16 sps:$4 sm:$0xff]  }
 0x947   :  { %v2757_v35 = vmul.f32 0.5, %v2753_v11  ;;  %v3810_v27 = vld [vmem:[#allocation7 + $0xe8] ss:$16 sps:$4 sm:$0xff]   ;;  %v3075_v11 = vld [vmem:[#allocation11 + $0x8] sm:$0xff]  ;;  %v3077_v13 = vld [vmem:[#allocation11 + $0x18] sm:$0xff] }
 0x948   :  { %3672 = vtanh.f32 %v2756_v34  ;;  %v3074_v15 = vld [vmem:[#allocation11] sm:$0xff] }
 0x949   :  { %3674 = vtanh.f32 %v2757_v35  ;;  %v3364_v34 = vpack.c.bf16 %v3075_v11, %v3074_v15  ;;  %v3989_v35 = vmov 0.0|0.0  }
 0x94a   :  { %3676 = vtanh.f32 %v2755_v17  ;;  %v3076_v17 = vld [vmem:[#allocation11 + $0x10] sm:$0xff] }
 0x94b   :  { %3678 = vtanh.f32 %v2758_v18  ;;  %v3367_v16 = vpack.c.bf16 %v3077_v13, %v3076_v17  ;;  %v3078_v18 = vld [vmem:[#allocation11 + $0x20] sm:$0xff] }
 0x952   :  { %v3673_v51 = vpop.eup %3672 }
 0x953   :  { %v2762_v2 = vmul.f32 0.5, %v3673_v51  ;;  %v3675_v20 = vpop.eup %3674  ;;  %v3079_v51 = vld [vmem:[#allocation11 + $0x28] sm:$0xff] }
 0x954   :  { %v2763_v19 = vmul.f32 0.5, %v3675_v20  ;;  %v3677_v22 = vpop.eup %3676  ;;  %v3080_v20 = vld [vmem:[#allocation11 + $0x30] sm:$0xff] }
 0x955   :  { %v2765_v63 = vadd.f32 0.5, %v2762_v2  ;;  %v3679_v9 = vpop.eup %3678  ;;  %v3370_v2 = vpack.c.bf16 %v3079_v51, %v3078_v18 }
 0x956   :  { %v2766_v56 = vadd.f32 0.5, %v2763_v19  ;;  %v2764_v10 = vmul.f32 0.5, %v3679_v9 }
 0x957   :  { %v2773_v42 = vmul.f32 %v3677_v22, %v2765_v63  ;;  %v3081_v63 = vld [vmem:[#allocation11 + $0x38] sm:$0xff]  ;;  %v3082_v22 = vld [vmem:[#allocation11 + $0x40] sm:$0xff] }
 0x958   :  { %v2772_v6 = vmul.f32 %v2770_v12, %v2766_v56  ;;  %v2767_v46 = vadd.f32 0.5, %v2764_v10  ;;  %v3373_v19 = vpack.c.bf16 %v3081_v63, %v3080_v20  ;;  %v3083_v56 = vld [vmem:[#allocation11 + $0x48] sm:$0xff]  ;;  %v3086_v10 = vld [vmem:[#allocation11 + $0x60] sm:$0xff] }
 0x959   :  { %v3376_v12 = vpack.c.bf16 %v3083_v56, %v3082_v22 }
 0x95a   :  { %v5222_v8 = vadd.f32 %v2773_v42, %v2772_v6  ;;  %v3084_v42 = vld [vmem:[#allocation11 + $0x50] sm:$0xff]  ;;  %v3085_v6 = vld [vmem:[#allocation11 + $0x58] sm:$0xff] }
 0x95b   :  { %v3379_v9 = vpack.c.bf16 %v3085_v6, %v3084_v42 }
 0x95c   :  { %3680 = vtanh.f32 %v5222_v8 }
 0x966   :  { %v3681_v54 = vpop.eup %3680 }
 0x967   :  { %v5225_v55 = vmul.f32 %v3681_v54, %v2767_v46  ;;  %v3087_v46 = vld [vmem:[#allocation11 + $0x68] sm:$0xff]  ;;  %v5516_v54 = vmov 0.0  }
 0x969   :  { %v5229_v39 = vpack.c.bf16 %v5225_v55, %v5225_v55 }
 0x96b   :  { %v5232_v48 = vrot.slane %v5229_v39, 3 }
 0x96d   :  { %2817 = vmatmul.mubr.bf16.vlgmr.msra.gmra.mrb[40].mxu0 %v5232_v48  ;;  %2858 = vmatmul.mubr.bf16.vlgmr.msra.gmra.mrb[40].mxu1 %v5232_v48 }
 0x96e   :  { %2867 = vmatpush1.bf16.msra.mxu0 %v5236_v3  ;;  %2908 = vmatpush1.bf16.msra.mxu1 %v5239_v41 }
 0x96f   :  { %2868 = vmatprep.subr.bf16.mxu0 %v5242_v38  ;;  %2909 = vmatprep.subr.bf16.mxu1 %v3784_v59 }
 0x970   :  { %2898 = vmatprep.mubr.bf16.mxu0 %v5409_v4  ;;  %2939 = vmatprep.mubr.bf16.mxu1 %v5409_v4 }
 0x972   :  { %2869 = vmatpush1.bf16.msra.mxu0 %v3785_v37  ;;  %2910 = vmatpush1.bf16.msra.mxu1 %v3786_v62 }
 0x973   :  { %2870 = vmatprep.subr.bf16.mxu0 %v3787_v43  ;;  %2911 = vmatprep.subr.bf16.mxu1 %v3788_v23 }
 0x976   :  { %2871 = vmatpush1.bf16.msra.mxu0 %v3789_v24  ;;  %2912 = vmatpush1.bf16.msra.mxu1 %v3790_v0 }
 0x977   :  { %2872 = vmatprep.subr.bf16.mxu0 %v3791_v45  ;;  %2913 = vmatprep.subr.bf16.mxu1 %v3792_v25 }
 0x97a   :  { %2873 = vmatpush1.bf16.msra.mxu0 %v3793_v26  ;;  %2914 = vmatpush1.bf16.msra.mxu1 %v3794_v28 }
 0x97b   :  { %2874 = vmatprep.subr.bf16.mxu0 %v3795_v29  ;;  %2915 = vmatprep.subr.bf16.mxu1 %v3796_v30 }
 0x97e   :  { %2875 = vmatpush1.bf16.msra.mxu0 %v3797_v31  ;;  %2916 = vmatpush1.bf16.msra.mxu1 %v3798_v33 }
 0x97f   :  { %2876 = vmatprep.subr.bf16.mxu0 %v3799_v36  ;;  %2917 = vmatprep.subr.bf16.mxu1 %v3800_v50 }
 0x982   :  { %2877 = vmatpush1.bf16.msra.mxu0 %v3801_v40  ;;  %2918 = vmatpush1.bf16.msra.mxu1 %v3802_v58 }
 0x983   :  { %2878 = vmatprep.subr.bf16.mxu0 %v3803_v61  ;;  %2919 = vmatprep.subr.bf16.mxu1 %v3804_v44 }
 0x986   :  { %2879 = vmatpush1.bf16.msra.mxu0 %v3805_v7  ;;  %2920 = vmatpush1.bf16.msra.mxu1 %v3806_v21 }
 0x987   :  { %2880 = vmatprep.subr.bf16.mxu0 %v3807_v57  ;;  %2921 = vmatprep.subr.bf16.mxu1 %v3808_v32 }
 0x98a   :  { %2881 = vmatpush1.bf16.msra.mxu0 %v3809_v60  ;;  %2922 = vmatpush1.bf16.msra.mxu1 %v3810_v27 }
 0x98b   :  { %2951 = vmatprep.subr.bf16.mxu0 %v5211_v53  ;;  %2992 = vmatprep.subr.bf16.mxu1 %v5214_v5  ;;  %v2778_v53 = vunpack.c.l.bf16 %v5229_v39  ;;  %v3088_v39 = vld [vmem:[#allocation11 + $0x70] sm:$0xff] }
 0x98d   :  { %2899 = vmatmul.mubr.bf16.vlgmr.msra.gmra.mrb[40].mxu0 %v5232_v48  ;;  %2940 = vmatmul.mubr.bf16.vlgmr.msra.gmra.mrb[40].mxu1 %v5232_v48  ;;  %v3089_v48 = vld [vmem:[#allocation11 + $0x78] sm:$0xff] }
 0x98e   :  { %2952 = vmatpush1.bf16.msra.mxu0 %v5236_v3  ;;  %2993 = vmatpush1.bf16.msra.mxu1 %v5239_v41  ;;  %v3385_v3 = vpack.c.bf16 %v3089_v48, %v3088_v39 }
 0x98f   :  { %2953 = vmatprep.subr.bf16.mxu0 %v5242_v38  ;;  %2994 = vmatprep.subr.bf16.mxu1 %v3784_v59 }
 0x990   :  { %2983 = vmatprep.mubr.bf16.mxu0 %v5409_v4  ;;  %3024 = vmatprep.mubr.bf16.mxu1 %v5409_v4  ;;  %v2779_v4 = vsub.f32 %v5225_v55, %v2778_v53  ;;  %v3382_v55 = vpack.c.bf16 %v3087_v46, %v3086_v10 }
 0x992   :  { %2954 = vmatpush1.bf16.msra.mxu0 %v3785_v37  ;;  %2995 = vmatpush1.bf16.msra.mxu1 %v3786_v62  ;;  %v2780_v5 = vpack.c.bf16 %v2779_v4, %v2779_v4 }
 0x993   :  { %2955 = vmatprep.subr.bf16.mxu0 %v3787_v43  ;;  %2996 = vmatprep.subr.bf16.mxu1 %v3788_v23 }
 0x994   :  { %v2949_v14 = vrot.slane %v2780_v5, 3 }
 0x996   :  { %2956 = vmatpush1.bf16.msra.mxu0 %v3789_v24  ;;  %2997 = vmatpush1.bf16.msra.mxu1 %v3790_v0 }
 0x997   :  { %2957 = vmatprep.subr.bf16.mxu0 %v3791_v45  ;;  %2998 = vmatprep.subr.bf16.mxu1 %v3792_v25 }
 0x99a   :  { %2958 = vmatpush1.bf16.msra.mxu0 %v3793_v26  ;;  %2999 = vmatpush1.bf16.msra.mxu1 %v3794_v28 }
 0x99b   :  { %2959 = vmatprep.subr.bf16.mxu0 %v3795_v29  ;;  %3000 = vmatprep.subr.bf16.mxu1 %v3796_v30 }
 0x99e   :  { %2960 = vmatpush1.bf16.msra.mxu0 %v3797_v31  ;;  %3001 = vmatpush1.bf16.msra.mxu1 %v3798_v33 }
 0x99f   :  { %2961 = vmatprep.subr.bf16.mxu0 %v3799_v36  ;;  %3002 = vmatprep.subr.bf16.mxu1 %v3800_v50 }
 0x9a2   :  { %2962 = vmatpush1.bf16.msra.mxu0 %v3801_v40  ;;  %3003 = vmatpush1.bf16.msra.mxu1 %v3802_v58 }
 0x9a3   :  { %2963 = vmatprep.subr.bf16.mxu0 %v3803_v61  ;;  %3004 = vmatprep.subr.bf16.mxu1 %v3804_v44 }
 0x9a6   :  { %2964 = vmatpush1.bf16.msra.mxu0 %v3805_v7  ;;  %3005 = vmatpush1.bf16.msra.mxu1 %v3806_v21 }
 0x9a7   :  { %2965 = vmatprep.subr.bf16.mxu0 %v3807_v57  ;;  %3006 = vmatprep.subr.bf16.mxu1 %v3808_v32 }
 0x9aa   :  { %2966 = vmatpush1.bf16.msra.mxu0 %v3809_v60  ;;  %3007 = vmatpush1.bf16.msra.mxu1 %v3810_v27 }
 0x9ab   :  { %3363 = vmatprep.subr.bf16.mxu0 %v3989_v35 }
 0x9ad   :  { %2984 = vmatmul.mubr.bf16.vlgmr.msra.gmra.mrb[40].mxu0 %v2949_v14  ;;  %3025 = vmatmul.mubr.bf16.vlgmr.msra.gmra.mrb[40].mxu1 %v2949_v14  ;;  %v3090_v14 = vld [vmem:[%s5285_s6] sm:$0x1] }
 0x9ae   :  { %3365 = vmatpush3.bf16.msra.mxu0 %v3364_v34  ;;  %3296 = vmatprep.mubr.msk.f32.mxu0 %vm3990_vm0, %v5516_v54 }
 0x9af   :  { %3366 = vmatprep.subr.bf16.mxu0 %v3989_v35 }
 0x9b2   :  { %3368 = vmatpush3.bf16.msra.mxu0 %v3367_v16 }
 0x9b3   :  { %3369 = vmatprep.subr.bf16.mxu0 %v3989_v35 }
 0x9b6   :  { %3371 = vmatpush3.bf16.msra.mxu0 %v3370_v2 }
 0x9b7   :  { %3372 = vmatprep.subr.bf16.mxu0 %v3989_v35 }
 0x9ba   :  { %3374 = vmatpush3.bf16.msra.mxu0 %v3373_v19 }
 0x9bb   :  { %3375 = vmatprep.subr.bf16.mxu0 %v3989_v35 }
 0x9be   :  { %3377 = vmatpush3.bf16.msra.mxu0 %v3376_v12 }
 0x9bf   :  { %3378 = vmatprep.subr.bf16.mxu0 %v3989_v35 }
 0x9c2   :  { %3380 = vmatpush3.bf16.msra.mxu0 %v3379_v9 }
 0x9c3   :  { %3381 = vmatprep.subr.bf16.mxu0 %v3989_v35 }
 0x9c6   :  { %3383 = vmatpush3.bf16.msra.mxu0 %v3382_v55 }
 0x9c7   :  { %3384 = vmatprep.subr.bf16.mxu0 %v3989_v35 }
 0x9ca   :  { %3386 = vmatpush3.bf16.msra.mxu0 %v3385_v3 }
 0xa80   :  { %v2985_v41 = vpop.f32.mrb[40].mxu0  ;;  %v3026_v38 = vpop.f32.mrb[40].mxu1 }
 0xa81   :  { %v3041_v59 = vrot.slane %v2985_v41, 1  ;;  %v2987_v37 = vpop.f32.mrb[41].mxu0  ;;  %v3028_v62 = vpop.f32.mrb[41].mxu1  ;;  %v3043_v33 = vrot.slane %v3026_v38, 1 }
 0xa82   :  { %v3042_v43 = vrot.slane %v2987_v37, 1  ;;  %v2989_v23 = vpop.f32.mrb[42].mxu0  ;;  %v3030_v24 = vpop.f32.mrb[42].mxu1  ;;  %v3044_v45 = vrot.slane %v3028_v62, 1 }
 0xa83   :  { %v3049_v0 = vadd.f32 %v3041_v59, %v4384_v52  ;;  %v2990_v25 = vpop.f32.mrb[43].mxu0  ;;  %v3031_v26 = vpop.f32.mrb[43].mxu1  ;;  %v3051_v36 = vadd.f32 %v3043_v33, %v4393_v49 }
 0xa84   :  { %v3050_v28 = vadd.f32 %v3042_v43, %v4386_v47  ;;  %v3052_v31 = vadd.f32 %v3044_v45, %v4390_v1  ;;  %v3067_v47 = vrot.slane %v5222_v8, 7 }
 0xa85   :  { %v3053_v29 = vmul.f32 0.5, %v3049_v0  ;;  %v3055_v50 = vmul.f32 0.5, %v3051_v36 }
 0xa86   :  { %v3054_v30 = vmul.f32 0.5, %v3050_v28 }
 0xa87   :  { %3682 = vtanh.f32 %v3053_v29 }
 0xa88   :  { %3684 = vtanh.f32 %v3054_v30 }
 0xa89   :  { %3686 = vtanh.f32 %v3052_v31 }
 0xa8a   :  { %3688 = vtanh.f32 %v3055_v50 }
 0xa91   :  { %v3683_v40 = vpop.eup %3682 }
 0xa92   :  { %v3059_v58 = vmul.f32 0.5, %v3683_v40  ;;  %v3685_v61 = vpop.eup %3684 }
 0xa93   :  { %v3060_v44 = vmul.f32 0.5, %v3685_v61  ;;  %v3687_v7 = vpop.eup %3686 }
 0xa94   :  { %v3062_v52 = vadd.f32 0.5, %v3059_v58  ;;  %v3689_v1 = vpop.eup %3688 }
 0xa95   :  { %v3063_v21 = vadd.f32 0.5, %v3060_v44  ;;  %v3061_v27 = vmul.f32 0.5, %v3689_v1 }
 0xa96   :  { %v3070_v57 = vmul.f32 %v3687_v7, %v3062_v52 }
 0xa97   :  { %v3069_v32 = vmul.f32 %v3067_v47, %v3063_v21  ;;  %v3064_v53 = vadd.f32 0.5, %v3061_v27 }
 0xa99   :  { %v3071_v60 = vadd.f32 %v3070_v57, %v3069_v32 }
 0xa9b   :  { %3690 = vtanh.f32 %v3071_v60 }
 0xaa5   :  { %v3691_v4 = vpop.eup %3690 }
 0xaa6   :  { %v3073_v49 = vmul.f32 %v3691_v4, %v3064_v53 }
 0xaa8   :  { %v3092_v5 = vrot.slane %v3073_v49, 7 }
 0xaaa   :  { %3297 = vmatmul.mubr.f32.vlgmr.msra.gmra.mrb[2].mxu0 %v3092_v5 }
 0xb7d   :  { %v3160_v15 = vpop.f32.mrb[2].mxu0 }
 0xb7e   :  { %v3161_v11 = vadd.f32 %v3160_v15, %v3090_v14  ;;  %v3298_v8 = vpop.f32.mrb[3].mxu0 }
 0xb80   :  { %3164 = vst [vmem:[#allocation13] sm:$0x1] %v3161_v11 }
 0xb81   :  { %3954 = shalt.err (!%p3951_p10)
}
 0xb82   :  { %s3955_s10 = scalar_lea.hbm %s5286_s7, 16 }
 0xb83   :  { %p3956_p11 = scmp.ne.s32.totalorder %s5286_s7, %s3955_s10  ;;  %p3959_p12 = scmp.lt.u32.totalorder %s3955_s10, %s5286_s7 }
 0xb85   :  { %p3961_p13 = pnand %p3959_p12, %p3956_p11 }
 0xb87   :  { %3964 = shalt.err (!%p3961_p13)
}
 0xb88   :  { %3174 = dma.vmem_to_hbm [thread:$0]  %s3172_s18, 16, %s5286_s7, [#allocation4]  }
 0xb89   :  { %3973 = dma.done.wait [#allocation4], 16  }
 0xb8a   :  { %3974 = vsyncadd [#allocation4], 4294967280 }
 0xb8b   :  { %3178 = vsyncpa [#allocation3], 1 }
 0xb8c   :  { %3179 = vsyncpa [#allocation6], 1 }
 0xb8d   :  { %3180 = vsyncpa [#allocation9], 1 }
 0xb8e   :  { %3181 = vsyncpa [#allocation12], 1 }
 0xb8f   :  { %3182 = vsyncpa [#allocation4], 1 }

</bundles_post_ra>
